<compile_context>
chip_gen: v6e
topology: v6e:2x2x1
jax: 0.10.0
libtpu: 0.0.40
codegen_flags: <defaults>
</compile_context>

<pallas_src>
import functools

import jax
import jax.numpy as jnp
from jax.experimental import pallas as pl
from jax.experimental.pallas import tpu as pltpu


def _round_up(x, m):
    return ((x + m - 1) // m) * m


# ----------------------------------------------------------------------------
# Kernel 1: out = relu?(x @ w + b), one M-tile per grid step.
# Weight and bias are grid-invariant (resident in VMEM across steps).
# ----------------------------------------------------------------------------
def _matmul_bias_kernel(x_ref, w_ref, b_ref, o_ref, *, relu):
    acc = jnp.dot(x_ref[...], w_ref[...], preferred_element_type=jnp.float32)
    acc = acc + b_ref[...]                 # (1, N) broadcasts over rows
    if relu:
        acc = jnp.maximum(acc, 0.0)
    o_ref[...] = acc.astype(o_ref.dtype)


def _pick_tile_m(M, tile_m):
    """Row-tile size: capped by tile_m, >=2 grid steps when M allows (v7x)."""
    tm = min(tile_m, _round_up(M, 16))
    if M > 32 and pl.cdiv(M, tm) < 2:
        tm = _round_up(pl.cdiv(M, 2), 16)
    return tm


def pallas_linear(x, w, b, *, relu, out_dtype, tile_m=512):
    """x: (M, K) bf16, w: (K, N) bf16, b: (1, N) f32 -> (M, N) out_dtype.

    K must be a multiple of 128.  N is either a multiple of 128 (fc) or the
    full, unpadded channel count (convs: 16 / 32) -- both are legal TPU block
    shapes.  M is tiled with a ragged (cdiv) parallel grid; no padding copy.
    """
    M, K = x.shape
    Kw, N = w.shape
    assert K == Kw and K % 128 == 0

    tm = _pick_tile_m(M, tile_m)
    grid_m = pl.cdiv(M, tm)

    kernel = functools.partial(_matmul_bias_kernel, relu=relu)
    cost = pl.CostEstimate(
        flops=2 * M * K * N,
        transcendentals=0,
        bytes_accessed=(M * K * x.dtype.itemsize
                        + K * N * w.dtype.itemsize
                        + N * 4
                        + M * N * jnp.dtype(out_dtype).itemsize),
    )
    # NOTE: weight/bias blocks are grid-invariant; single-buffering them
    # (pipeline_mode=pl.Buffered(1)) would halve their VMEM footprint, but at
    # <=1.6 MB per weight there is ample headroom on every generation, so we
    # keep the default pipelining for robustness.
    return pl.pallas_call(
        kernel,
        out_shape=jax.ShapeDtypeStruct((M, N), out_dtype),
        grid=(grid_m,),
        in_specs=[
            pl.BlockSpec((tm, K), lambda i: (i, 0)),   # pipelined row tile
            pl.BlockSpec((K, N), lambda i: (0, 0)),    # resident weight
            pl.BlockSpec((1, N), lambda i: (0, 0)),    # resident bias
        ],
        out_specs=pl.BlockSpec((tm, N), lambda i: (i, 0)),
        compiler_params=pltpu.CompilerParams(
            dimension_semantics=("parallel",)),
        cost_estimate=cost,
    )(x, w, b)


# ----------------------------------------------------------------------------
# Kernel 2: fused head  q = relu(x @ w3 + b3) @ w4 + b4   (one pallas_call).
# ----------------------------------------------------------------------------
def _fc_head_kernel(x_ref, w3_ref, b3_ref, w4_ref, b4_ref, o_ref):
    h = jnp.dot(x_ref[...], w3_ref[...], preferred_element_type=jnp.float32)
    h = jnp.maximum(h + b3_ref[...], 0.0).astype(jnp.bfloat16)
    q = jnp.dot(h, w4_ref[...], preferred_element_type=jnp.float32)
    o_ref[...] = (q + b4_ref[...]).astype(o_ref.dtype)


def pallas_fc_head(x, w3, b3, w4, b4, *, tile_m=512):
    """x: (B, 3200) bf16 -> (B, num_actions) f32, fc1+ReLU+fc2 fused."""
    M, K = x.shape
    Kw, H = w3.shape
    Hw, A = w4.shape
    assert K == Kw and H == Hw and K % 128 == 0 and H % 128 == 0

    tm = min(tile_m, _round_up(M, 16))
    grid_m = pl.cdiv(M, tm)
    cost = pl.CostEstimate(
        flops=2 * M * K * H + 2 * M * H * A,
        transcendentals=0,
        bytes_accessed=(M * K * x.dtype.itemsize
                        + K * H * w3.dtype.itemsize
                        + H * A * w4.dtype.itemsize
                        + (H + A) * 4 + M * A * 4),
    )
    return pl.pallas_call(
        _fc_head_kernel,
        out_shape=jax.ShapeDtypeStruct((M, A), jnp.float32),
        grid=(grid_m,),
        in_specs=[
            pl.BlockSpec((tm, K), lambda i: (i, 0)),   # row tile
            pl.BlockSpec((K, H), lambda i: (0, 0)),    # fc1 weight resident
            pl.BlockSpec((1, H), lambda i: (0, 0)),    # fc1 bias
            pl.BlockSpec((H, A), lambda i: (0, 0)),    # fc2 weight resident
            pl.BlockSpec((1, A), lambda i: (0, 0)),    # fc2 bias
        ],
        out_specs=pl.BlockSpec((tm, A), lambda i: (i, 0)),
        compiler_params=pltpu.CompilerParams(
            dimension_semantics=("parallel",)),
        cost_estimate=cost,
    )(x, w3, b3, w4, b4)


# ----------------------------------------------------------------------------
# Glue: NHWC im2col (stack of strided slices; patch order = (kh, kw, c)).
# TODO(synk): for large training batches, fuse the receptive-field gather
# into the Pallas kernel with manual DMA (P4) to avoid the ~4x HBM expansion
# of the materialized im2col matrix; at B=2 it is noise.
# ----------------------------------------------------------------------------
def _im2col_nhwc(x, kh, kw, stride, pad):
    B, H, W, C = x.shape
    xp = jnp.pad(x, ((0, 0), (pad, pad), (pad, pad), (0, 0)))
    OH = (H + 2 * pad - kh) // stride + 1
    OW = (W + 2 * pad - kw) // stride + 1
    patches = []
    for i in range(kh):
        for j in range(kw):
            patches.append(
                xp[:, i:i + stride * OH:stride, j:j + stride * OW:stride, :])
    p = jnp.stack(patches, axis=3)                    # (B, OH, OW, kh*kw, C)
    return p.reshape(B * OH * OW, kh * kw * C), OH, OW


# ----------------------------------------------------------------------------
# Parameter init in torch layout + one-time conversion to kernel layout.
# ----------------------------------------------------------------------------
def _uniform(key, shape, fan_in):
    bound = 1.0 / jnp.sqrt(jnp.float32(fan_in))
    return jax.random.uniform(key, shape, jnp.float32, -bound, bound)


def init_params(num_frames, num_actions, key):
    ks = jax.random.split(key, 8)
    p = {}
    p["conv1_w"] = _uniform(ks[0], (16, num_frames, 8, 8), num_frames * 8 * 8)
    p["conv1_b"] = _uniform(ks[1], (16,), num_frames * 8 * 8)
    p["conv2_w"] = _uniform(ks[2], (32, 16, 4, 4), 16 * 4 * 4)
    p["conv2_b"] = _uniform(ks[3], (32,), 16 * 4 * 4)
    p["fc1_w"] = _uniform(ks[4], (256, 3200), 3200)   # torch layout (out, in)
    p["fc1_b"] = _uniform(ks[5], (256,), 3200)
    p["fc2_w"] = _uniform(ks[6], (num_actions, 256), 256)
    p["fc2_b"] = _uniform(ks[7], (num_actions,), 256)
    return p


def prepare_params(p):
    """One-time torch-layout -> kernel-layout conversion (outside the jit)."""
    kp = {}
    # conv weights: (OC, IC, KH, KW) -> (KH, KW, IC, OC) -> (KH*KW*IC, OC).
    # Output channels stay UNPADDED (16 / 32): full-dim last axis is legal and
    # cuts conv writeback bytes 8-16x vs 128-lane padding.
    w1 = p["conv1_w"].transpose(2, 3, 1, 0).reshape(-1, p["conv1_w"].shape[0])
    kp["w1"] = w1.astype(jnp.bfloat16)
    kp["b1"] = p["conv1_b"].astype(jnp.float32).reshape(1, -1)
    w2 = p["conv2_w"].transpose(2, 3, 1, 0).reshape(-1, p["conv2_w"].shape[0])
    kp["w2"] = w2.astype(jnp.bfloat16)
    kp["b2"] = p["conv2_b"].astype(jnp.float32).reshape(1, -1)
    # fc1: torch flatten order is (c, h, w); our NHWC flatten is (h, w, c).
    # Permute the 3200 input rows once here so the hot path has no transpose.
    w3 = (p["fc1_w"].reshape(-1, 32, 10, 10)        # (out, c, h, w)
          .transpose(0, 2, 3, 1)                    # (out, h, w, c)
          .reshape(p["fc1_w"].shape[0], -1).T)      # (3200, 256)
    kp["w3"] = w3.astype(jnp.bfloat16)
    kp["b3"] = p["fc1_b"].astype(jnp.float32).reshape(1, -1)
    # fc2: (A, 256) -> (256, A), unpadded (A is the full output dim).
    kp["w4"] = p["fc2_w"].T.astype(jnp.bfloat16)
    kp["b4"] = p["fc2_b"].astype(jnp.float32).reshape(1, -1)
    return kp


# ----------------------------------------------------------------------------
# Forward pass (semantics of DeepQNetwork.forward).
# ----------------------------------------------------------------------------
def deep_q_network_forward(kp, x, *, conv_tile_m=512, fc_tile_m=512):
    """x: (B, num_frames, 84, 84) NCHW f32, exactly like the torch module.

    conv_tile_m / fc_tile_m: raise conv_tile_m to 1024-2048 for large-batch
    training on v6e/v7x; keep fc_tile_m <= 512 on v5e (16 MiB scoped VMEM).
    """
    B = x.shape[0]
    # NCHW -> NHWC once, cast to bf16 for the MXU.
    x = x.transpose(0, 2, 3, 1).astype(jnp.bfloat16)

    # conv1: k=8, s=4, p=2 + ReLU          -> (B, 21, 21, 16) bf16
    cols, OH, OW = _im2col_nhwc(x, 8, 8, 4, 2)             # (B*441, 256)
    y = pallas_linear(cols, kp["w1"], kp["b1"], relu=True,
                      out_dtype=jnp.bfloat16, tile_m=conv_tile_m)
    y = y.reshape(B, OH, OW, 16)

    # conv2: k=4, s=2, p=1 + ReLU          -> (B, 10, 10, 32) bf16
    cols, OH, OW = _im2col_nhwc(y, 4, 4, 2, 1)             # (B*100, 256)
    y = pallas_linear(cols, kp["w2"], kp["b2"], relu=True,
                      out_dtype=jnp.bfloat16, tile_m=conv_tile_m)

    # flatten in (h, w, c) order (fc1 rows were permuted at init to match),
    # then fused fc1+ReLU+fc2 in a single pallas_call.
    y = y.reshape(B, OH * OW * 32)                         # (B, 3200) bf16
    return pallas_fc_head(y, kp["w3"], kp["b3"], kp["w4"], kp["b4"],
                          tile_m=fc_tile_m)                # (B, A) f32


if __name__ == "__main__":
    num_frames = 4
    num_actions = 4
    batch = 2
    # fc1.in_features == 3200 implies 84x84 inputs (Atari standard).
    key = jax.random.PRNGKey(0)
    k_x, k_p = jax.random.split(key)
    x = jax.random.normal(k_x, (batch, num_frames, 84, 84), jnp.float32)

    torch_layout_params = init_params(num_frames, num_actions, k_p)
    kparams = prepare_params(torch_layout_params)

    fwd = jax.jit(deep_q_network_forward)
    out = jax.block_until_ready(fwd(kparams, x))
    assert out.shape == (batch, num_actions), out.shape
    assert bool(jnp.all(jnp.isfinite(out))), "non-finite Q-values"
    print("KERNEL_OK")
</pallas_src>

<mosaic_0001>
module attributes {stable_mosaic.version = 11 : i64} {
  func.func @_matmul_bias_kernel(%arg0: i32, %arg1: memref<512x256xbf16, #tpu.memory_space<vmem>>, %arg2: memref<256x16xbf16, #tpu.memory_space<vmem>>, %arg3: memref<1x16xf32, #tpu.memory_space<vmem>>, %arg4: memref<512x16xbf16, #tpu.memory_space<vmem>>) attributes {dimension_semantics = [#tpu.dimension_semantics<parallel>], iteration_bounds = array<i64: 2>, scalar_prefetch = 0 : i64, scratch_operands = 0 : i64, tpu.core_type = #tpu.core_type<tc>, window_params = [{transform_indices = @transform_0, window_bounds = array<i64: 512, 256>}, {pipeline_mode = #tpu.pipeline_mode<synchronous>, transform_indices = @transform_1, window_bounds = array<i64: 256, 16>}, {pipeline_mode = #tpu.pipeline_mode<synchronous>, transform_indices = @transform_2, window_bounds = array<i64: 1, 16>}, {transform_indices = @transform_3, window_bounds = array<i64: 512, 16>}]} {
    %c0 = arith.constant 0 : index
    %c0_0 = arith.constant 0 : index
    %0 = vector.load %arg1[%c0, %c0_0] : memref<512x256xbf16, #tpu.memory_space<vmem>>, vector<512x256xbf16>
    %c0_1 = arith.constant 0 : index
    %c0_2 = arith.constant 0 : index
    %1 = vector.load %arg2[%c0_1, %c0_2] : memref<256x16xbf16, #tpu.memory_space<vmem>>, vector<256x16xbf16>
    %cst = arith.constant dense<0.000000e+00> : vector<512x16xf32>
    %2 = tpu.matmul %0, %1, %cst {dimension_numbers = #tpu.dot_dimension_numbers<[1], [0], [0], [1], [0, 0, 1, 1], [], []>} : vector<512x256xbf16>, vector<256x16xbf16>, vector<512x16xf32> -> vector<512x16xf32>
    %c0_3 = arith.constant 0 : index
    %c0_4 = arith.constant 0 : index
    %3 = vector.load %arg3[%c0_3, %c0_4] : memref<1x16xf32, #tpu.memory_space<vmem>>, vector<1x16xf32>
    %4 = vector.broadcast %3 : vector<1x16xf32> to vector<512x16xf32>
    %5 = arith.addf %2, %4 : vector<512x16xf32>
    %cst_5 = arith.constant 0.000000e+00 : f32
    %6 = vector.broadcast %cst_5 : f32 to vector<512x16xf32>
    %7 = arith.maximumf %5, %6 : vector<512x16xf32>
    %8 = arith.truncf %7 : vector<512x16xf32> to vector<512x16xbf16>
    %c0_6 = arith.constant 0 : index
    %c0_7 = arith.constant 0 : index
    %9 = vector.load %arg4[%c0_6, %c0_7] : memref<512x16xbf16, #tpu.memory_space<vmem>>, vector<512x16xbf16>
    tpu.vector_store %arg4[%c0_6, %c0_7], %8 {strides = array<i32>} : memref<512x16xbf16, #tpu.memory_space<vmem>>, vector<512x16xbf16>,
    return
  }
  func.func @transform_0(%arg0: i32) -> (i32, i32) {
    %c0_i32 = arith.constant 0 : i32
    %c0_i32_0 = arith.constant 0 : i32
    return %arg0, %c0_i32 : i32, i32
  }
  func.func @transform_1(%arg0: i32) -> (i32, i32) {
    %c0_i32 = arith.constant 0 : i32
    %c0_i32_0 = arith.constant 0 : i32
    %c0_i32_1 = arith.constant 0 : i32
    return %c0_i32, %c0_i32_0 : i32, i32
  }
  func.func @transform_2(%arg0: i32) -> (i32, i32) {
    %c0_i32 = arith.constant 0 : i32
    %c0_i32_0 = arith.constant 0 : i32
    %c0_i32_1 = arith.constant 0 : i32
    return %c0_i32, %c0_i32_0 : i32, i32
  }
  func.func @transform_3(%arg0: i32) -> (i32, i32) {
    %c0_i32 = arith.constant 0 : i32
    %c0_i32_0 = arith.constant 0 : i32
    return %arg0, %c0_i32 : i32, i32
  }
}

module attributes {stable_mosaic.version = 11 : i64} {
  func.func @_matmul_bias_kernel(%arg0: i32, %arg1: memref<112x256xbf16, #tpu.memory_space<vmem>>, %arg2: memref<256x32xbf16, #tpu.memory_space<vmem>>, %arg3: memref<1x32xf32, #tpu.memory_space<vmem>>, %arg4: memref<112x32xbf16, #tpu.memory_space<vmem>>) attributes {dimension_semantics = [#tpu.dimension_semantics<parallel>], iteration_bounds = array<i64: 2>, scalar_prefetch = 0 : i64, scratch_operands = 0 : i64, tpu.core_type = #tpu.core_type<tc>, window_params = [{transform_indices = @transform_0, window_bounds = array<i64: 112, 256>}, {pipeline_mode = #tpu.pipeline_mode<synchronous>, transform_indices = @transform_1, window_bounds = array<i64: 256, 32>}, {pipeline_mode = #tpu.pipeline_mode<synchronous>, transform_indices = @transform_2, window_bounds = array<i64: 1, 32>}, {transform_indices = @transform_3, window_bounds = array<i64: 112, 32>}]} {
    %c0 = arith.constant 0 : index
    %c0_0 = arith.constant 0 : index
    %0 = vector.load %arg1[%c0, %c0_0] : memref<112x256xbf16, #tpu.memory_space<vmem>>, vector<112x256xbf16>
    %c0_1 = arith.constant 0 : index
    %c0_2 = arith.constant 0 : index
    %1 = vector.load %arg2[%c0_1, %c0_2] : memref<256x32xbf16, #tpu.memory_space<vmem>>, vector<256x32xbf16>
    %cst = arith.constant dense<0.000000e+00> : vector<112x32xf32>
    %2 = tpu.matmul %0, %1, %cst {dimension_numbers = #tpu.dot_dimension_numbers<[1], [0], [0], [1], [0, 0, 1, 1], [], []>} : vector<112x256xbf16>, vector<256x32xbf16>, vector<112x32xf32> -> vector<112x32xf32>
    %c0_3 = arith.constant 0 : index
    %c0_4 = arith.constant 0 : index
    %3 = vector.load %arg3[%c0_3, %c0_4] : memref<1x32xf32, #tpu.memory_space<vmem>>, vector<1x32xf32>
    %4 = vector.broadcast %3 : vector<1x32xf32> to vector<112x32xf32>
    %5 = arith.addf %2, %4 : vector<112x32xf32>
    %cst_5 = arith.constant 0.000000e+00 : f32
    %6 = vector.broadcast %cst_5 : f32 to vector<112x32xf32>
    %7 = arith.maximumf %5, %6 : vector<112x32xf32>
    %8 = arith.truncf %7 : vector<112x32xf32> to vector<112x32xbf16>
    %c0_6 = arith.constant 0 : index
    %c0_7 = arith.constant 0 : index
    %9 = vector.load %arg4[%c0_6, %c0_7] : memref<112x32xbf16, #tpu.memory_space<vmem>>, vector<112x32xbf16>
    tpu.vector_store %arg4[%c0_6, %c0_7], %8 {strides = array<i32>} : memref<112x32xbf16, #tpu.memory_space<vmem>>, vector<112x32xbf16>,
    return
  }
  func.func @transform_0(%arg0: i32) -> (i32, i32) {
    %c0_i32 = arith.constant 0 : i32
    %c0_i32_0 = arith.constant 0 : i32
    return %arg0, %c0_i32 : i32, i32
  }
  func.func @transform_1(%arg0: i32) -> (i32, i32) {
    %c0_i32 = arith.constant 0 : i32
    %c0_i32_0 = arith.constant 0 : i32
    %c0_i32_1 = arith.constant 0 : i32
    return %c0_i32, %c0_i32_0 : i32, i32
  }
  func.func @transform_2(%arg0: i32) -> (i32, i32) {
    %c0_i32 = arith.constant 0 : i32
    %c0_i32_0 = arith.constant 0 : i32
    %c0_i32_1 = arith.constant 0 : i32
    return %c0_i32, %c0_i32_0 : i32, i32
  }
  func.func @transform_3(%arg0: i32) -> (i32, i32) {
    %c0_i32 = arith.constant 0 : i32
    %c0_i32_0 = arith.constant 0 : i32
    return %arg0, %c0_i32 : i32, i32
  }
}

module attributes {stable_mosaic.version = 11 : i64} {
  func.func @_fc_head_kernel(%arg0: i32, %arg1: memref<16x3200xbf16, #tpu.memory_space<vmem>>, %arg2: memref<3200x256xbf16, #tpu.memory_space<vmem>>, %arg3: memref<1x256xf32, #tpu.memory_space<vmem>>, %arg4: memref<256x4xbf16, #tpu.memory_space<vmem>>, %arg5: memref<1x4xf32, #tpu.memory_space<vmem>>, %arg6: memref<16x4xf32, #tpu.memory_space<vmem>>) attributes {dimension_semantics = [#tpu.dimension_semantics<parallel>], iteration_bounds = array<i64: 1>, scalar_prefetch = 0 : i64, scratch_operands = 0 : i64, tpu.core_type = #tpu.core_type<tc>, window_params = [{transform_indices = @transform_0, window_bounds = array<i64: 16, 3200>}, {pipeline_mode = #tpu.pipeline_mode<synchronous>, transform_indices = @transform_1, window_bounds = array<i64: 3200, 256>}, {pipeline_mode = #tpu.pipeline_mode<synchronous>, transform_indices = @transform_2, window_bounds = array<i64: 1, 256>}, {pipeline_mode = #tpu.pipeline_mode<synchronous>, transform_indices = @transform_3, window_bounds = array<i64: 256, 4>}, {pipeline_mode = #tpu.pipeline_mode<synchronous>, transform_indices = @transform_4, window_bounds = array<i64: 1, 4>}, {transform_indices = @transform_5, window_bounds = array<i64: 16, 4>}]} {
    %c0 = arith.constant 0 : index
    %c0_0 = arith.constant 0 : index
    %0 = vector.load %arg1[%c0, %c0_0] : memref<16x3200xbf16, #tpu.memory_space<vmem>>, vector<16x3200xbf16>
    %c0_1 = arith.constant 0 : index
    %c0_2 = arith.constant 0 : index
    %1 = vector.load %arg2[%c0_1, %c0_2] : memref<3200x256xbf16, #tpu.memory_space<vmem>>, vector<3200x256xbf16>
    %cst = arith.constant dense<0.000000e+00> : vector<16x256xf32>
    %2 = tpu.matmul %0, %1, %cst {dimension_numbers = #tpu.dot_dimension_numbers<[1], [0], [0], [1], [0, 0, 1, 1], [], []>} : vector<16x3200xbf16>, vector<3200x256xbf16>, vector<16x256xf32> -> vector<16x256xf32>
    %c0_3 = arith.constant 0 : index
    %c0_4 = arith.constant 0 : index
    %3 = vector.load %arg3[%c0_3, %c0_4] : memref<1x256xf32, #tpu.memory_space<vmem>>, vector<1x256xf32>
    %4 = vector.broadcast %3 : vector<1x256xf32> to vector<16x256xf32>
    %5 = arith.addf %2, %4 : vector<16x256xf32>
    %cst_5 = arith.constant 0.000000e+00 : f32
    %6 = vector.broadcast %cst_5 : f32 to vector<16x256xf32>
    %7 = arith.maximumf %5, %6 : vector<16x256xf32>
    %8 = arith.truncf %7 : vector<16x256xf32> to vector<16x256xbf16>
    %c0_6 = arith.constant 0 : index
    %c0_7 = arith.constant 0 : index
    %9 = vector.load %arg4[%c0_6, %c0_7] : memref<256x4xbf16, #tpu.memory_space<vmem>>, vector<256x4xbf16>
    %cst_8 = arith.constant dense<0.000000e+00> : vector<16x4xf32>
    %10 = tpu.matmul %8, %9, %cst_8 {dimension_numbers = #tpu.dot_dimension_numbers<[1], [0], [0], [1], [0, 0, 1, 1], [], []>} : vector<16x256xbf16>, vector<256x4xbf16>, vector<16x4xf32> -> vector<16x4xf32>
    %c0_9 = arith.constant 0 : index
    %c0_10 = arith.constant 0 : index
    %11 = vector.load %arg5[%c0_9, %c0_10] : memref<1x4xf32, #tpu.memory_space<vmem>>, vector<1x4xf32>
    %12 = vector.broadcast %11 : vector<1x4xf32> to vector<16x4xf32>
    %13 = arith.addf %10, %12 : vector<16x4xf32>
    %c0_11 = arith.constant 0 : index
    %c0_12 = arith.constant 0 : index
    %14 = vector.load %arg6[%c0_11, %c0_12] : memref<16x4xf32, #tpu.memory_space<vmem>>, vector<16x4xf32>
    tpu.vector_store %arg6[%c0_11, %c0_12], %13 {strides = array<i32>} : memref<16x4xf32, #tpu.memory_space<vmem>>, vector<16x4xf32>,
    return
  }
  func.func @transform_0(%arg0: i32) -> (i32, i32) {
    %c0_i32 = arith.constant 0 : i32
    %c0_i32_0 = arith.constant 0 : i32
    return %arg0, %c0_i32 : i32, i32
  }
  func.func @transform_1(%arg0: i32) -> (i32, i32) {
    %c0_i32 = arith.constant 0 : i32
    %c0_i32_0 = arith.constant 0 : i32
    %c0_i32_1 = arith.constant 0 : i32
    return %c0_i32, %c0_i32_0 : i32, i32
  }
  func.func @transform_2(%arg0: i32) -> (i32, i32) {
    %c0_i32 = arith.constant 0 : i32
    %c0_i32_0 = arith.constant 0 : i32
    %c0_i32_1 = arith.constant 0 : i32
    return %c0_i32, %c0_i32_0 : i32, i32
  }
  func.func @transform_3(%arg0: i32) -> (i32, i32) {
    %c0_i32 = arith.constant 0 : i32
    %c0_i32_0 = arith.constant 0 : i32
    %c0_i32_1 = arith.constant 0 : i32
    return %c0_i32, %c0_i32_0 : i32, i32
  }
  func.func @transform_4(%arg0: i32) -> (i32, i32) {
    %c0_i32 = arith.constant 0 : i32
    %c0_i32_0 = arith.constant 0 : i32
    %c0_i32_1 = arith.constant 0 : i32
    return %c0_i32, %c0_i32_0 : i32, i32
  }
  func.func @transform_5(%arg0: i32) -> (i32, i32) {
    %c0_i32 = arith.constant 0 : i32
    %c0_i32_0 = arith.constant 0 : i32
    return %arg0, %c0_i32 : i32, i32
  }
}

</mosaic_0001>

<bundles_post_ra>
// kernel: deep_q_network_forward.3
= control target key start
LH: loop header
LB: loop body
LE: loop exit
PB: predicated region body
PF: predicated region fallthrough
CT: control target
= control target key end

     0   :  { %s2442_s12 = smov 0   ;;  %s2444_s13 = smov 0   ;;  %s3024_s0 = inlined_call_operand.vmem [shape: bf16[882,256], index: 0, kind: input, shape index: {}]   ;;  %s3025_s1 = inlined_call_operand.vmem [shape: bf16[256,16], index: 1, kind: input, shape index: {}]   ;;  %s3026_s2 = inlined_call_operand.vmem [shape: f32[1,16], index: 2, kind: input, shape index: {}]   ;;  %s3027_s3 = inlined_call_operand.vmem [shape: bf16[882,16], index: 3, kind: output, shape index: {}]  }
   0x1   :  { %s2446_s14 = smov 0  }
   0x2 LB: > { %s2455_s15 = sadd.s32 4294967295, %s2387_s14   ;;  %s2457_s16 = sadd.s32 1, %s2387_s14   ;;  %s2387_s14 = sphi %s2446_s14, %s3034_s14   ;;  %s2383_s13 = sphi %s2444_s13, %s3033_s13   ;;  %s2379_s12 = sphi %s2442_s12, %s3032_s12  }
   0x3   : > { %s85_s17 = ssub.s32 %s2387_s14, %s2457_s16  ;;  %s88_s18 = sadd.s32 1, %s2383_s13 }
   0x4   : > { %p86_p0 = scmp.eq.s32.totalorder %s85_s17, 0  ;;  %p98_p1 = scmp.ne.s32.totalorder %s2383_s13, %s2379_s12 }
   0x5   : > { %p99_p2 = scmp.eq.s32.totalorder %s2455_s15, 1  ;;  %p1865_p3 = scmp.ge.s32.totalorder %s2387_s14, 1 }
   0x6   : > { %s2465_s19 = scalar_select %p86_p0, %s2383_s13, %s88_s18  }
   0x7   : > { %p2467_p4 = por %p99_p2, %p98_p1  ;;  %p149_p5 = scmp.lt.s32.totalorder %s2387_s14, 3 }
   0x9   : > { %p150_p6 = pnand %p1865_p3, %p149_p5 }
   0xa   : > { %s2477_s23 = sshll.u32 (!%p150_p6), %s2455_s15, 6  ;;  %s175_s17 = sand.u32 (!%p150_p6), 1, %s2379_s12  }
   0xb   : > { %153 = sbr.rel (%p150_p6) target bundleno = 487 (0x1e7), region = 32  ;;  %p184_p7 = scmp.lt.s32.totalorder (!%p150_p6), %s2477_s23, 110 }
   0xc   : > { %s1866_s22 = sshll.u32 (!%p150_p6), %s175_s17, 8 }
   0xd   : > { %s2635_s12 = scalar_lea.vmem (!%p150_p6), [#allocation2], %s1866_s22  }
  0x10   : > { %v2221_v0 = vld [vmem:[%s3025_s1 + $0x38] sm:$0xff]   ;;  %v2421_v1 = vmov 0   ;;  %v2222_v2 = vld [vmem:[%s3025_s1 + $0x30] sm:$0xff]   ;;  %v2223_v3 = vld [vmem:[%s3025_s1 + $0x28] sm:$0xff]   ;;  %s185_s28 = scalar_select %p184_p7, %s2477_s23, 110  ;;  %vm1329_vm0 = vcmask 125952  }
  0x11   : > { %720 = vmatprep.subr.bf16.mxu0 %v2421_v1  ;;  %2100 = vmatprep.subr.bf16.mxu1 %v2421_v1  ;;  %v2224_v4 = vld [vmem:[%s3025_s1 + $0x20] sm:$0xff]   ;;  %v2225_v5 = vld [vmem:[%s3025_s1 + $0x18] sm:$0xff]   ;;  %v2226_v7 = vld [vmem:[%s3025_s1 + $0x10] sm:$0xff]   ;;  %s2097_s24 = sshll.u32 (%p2467_p4), %s2455_s15, 8 }
  0x12   : > { %721 = vmatpush1.bf16.msra.mxu0 %v2221_v0  ;;  %2116 = vmatpush1.bf16.msra.mxu1 %v2221_v0  ;;  %s2032_s4 = sshll.u32 %s185_s28, 3  ;;  %v2227_v9 = vld [vmem:[%s3025_s1 + $0x8] sm:$0xff]   ;;  %v2228_v10 = vld [vmem:[%s3025_s1] sm:$0xff]   ;;  %v2229_v11 = vld [vmem:[%s3025_s1 + $0x78] sm:$0xff]   ;;  %s2832_s27 = scalar_lea.vmem (%p2467_p4), %s3027_s3, %s2097_s24  }
  0x13   : > { %722 = vmatprep.subr.bf16.mxu0 %v2421_v1  ;;  %2101 = vmatprep.subr.bf16.mxu1 %v2421_v1  ;;  %s2502_s9 = scalar_lea.vmem %s3024_s0, %s2032_s4  ;;  %v2230_v12 = vld [vmem:[%s3025_s1 + $0x70] sm:$0xff]   ;;  %v2231_v13 = vld [vmem:[%s3025_s1 + $0x68] sm:$0xff]   ;;  %v2232_v14 = vld [vmem:[%s3025_s1 + $0x60] sm:$0xff]  }
  0x14   : > { %v2239_v6 = vld [vmem:[%s2502_s9 + $0x4] ss:$8 sps:$4 sm:$0xff]   ;;  %v2233_v15 = vld [vmem:[%s3025_s1 + $0x58] sm:$0xff]   ;;  %v2234_v16 = vld [vmem:[%s3025_s1 + $0x50] sm:$0xff]  }
  0x15   : > { %v2242_v8 = vld [vmem:[%s2502_s9 + $0x104] ss:$8 sps:$4 sm:$0xff]   ;;  %752 = vmatprep.mubr.bf16.mxu0 %v2239_v6  ;;  %v2237_v19 = vld [vmem:[%s2502_s9] ss:$8 sps:$4 sm:$0xff]   ;;  %v2243_v21 = vld [vmem:[%s2502_s9 + $0x14] ss:$8 sps:$4 sm:$0xff]  }
  0x16   : > { %723 = vmatpush1.bf16.msra.mxu0 %v2222_v2  ;;  %2117 = vmatpush1.bf16.msra.mxu1 %v2222_v2  ;;  %v2235_v17 = vld [vmem:[%s3025_s1 + $0x48] sm:$0xff]   ;;  %v2236_v18 = vld [vmem:[%s3025_s1 + $0x40] sm:$0xff]   ;;  %v2245_v22 = vld [vmem:[%s2502_s9 + $0x114] ss:$8 sps:$4 sm:$0xff]  }
  0x17   : > { %724 = vmatprep.subr.bf16.mxu0 %v2421_v1  ;;  %2102 = vmatprep.subr.bf16.mxu1 %v2421_v1  ;;  %v2240_v20 = vld [vmem:[%s2502_s9 + $0x100] ss:$8 sps:$4 sm:$0xff]   ;;  %v2247_v23 = vld [vmem:[%s2502_s9 + $0x10] ss:$8 sps:$4 sm:$0xff]   ;;  %v2249_v25 = vld [vmem:[%s2502_s9 + $0x24] ss:$8 sps:$4 sm:$0xff]  }
  0x18   : > { %880 = vmatprep.mubr.bf16.mxu1 %v2242_v8  ;;  %v2248_v24 = vld [vmem:[%s2502_s9 + $0x110] ss:$8 sps:$4 sm:$0xff]   ;;  %v2251_v26 = vld [vmem:[%s2502_s9 + $0x124] ss:$8 sps:$4 sm:$0xff]   ;;  %v2253_v27 = vld [vmem:[%s2502_s9 + $0x20] ss:$8 sps:$4 sm:$0xff]  }
  0x19   : > { %v2254_v28 = vld [vmem:[%s2502_s9 + $0x120] ss:$8 sps:$4 sm:$0xff]   ;;  %v2255_v29 = vld [vmem:[%s2502_s9 + $0x34] ss:$8 sps:$4 sm:$0xff]   ;;  %v2259_v31 = vld [vmem:[%s2502_s9 + $0x30] ss:$8 sps:$4 sm:$0xff]  }
  0x1a   : > { %725 = vmatpush1.bf16.msra.mxu0 %v2223_v3  ;;  %2118 = vmatpush1.bf16.msra.mxu1 %v2223_v3  ;;  %v2257_v30 = vld [vmem:[%s2502_s9 + $0x134] ss:$8 sps:$4 sm:$0xff]   ;;  %v2260_v32 = vld [vmem:[%s2502_s9 + $0x130] ss:$8 sps:$4 sm:$0xff]   ;;  %v2261_v33 = vld [vmem:[%s2502_s9 + $0x44] ss:$8 sps:$4 sm:$0xff]  }
  0x1b   : > { %726 = vmatprep.subr.bf16.mxu0 %v2421_v1  ;;  %2103 = vmatprep.subr.bf16.mxu1 %v2421_v1  ;;  %v2263_v34 = vld [vmem:[%s2502_s9 + $0x144] ss:$8 sps:$4 sm:$0xff]   ;;  %v2265_v35 = vld [vmem:[%s2502_s9 + $0x40] ss:$8 sps:$4 sm:$0xff]   ;;  %v2267_v37 = vld [vmem:[%s2502_s9 + $0x54] ss:$8 sps:$4 sm:$0xff]  }
  0x1c   : > { %v2266_v36 = vld [vmem:[%s2502_s9 + $0x140] ss:$8 sps:$4 sm:$0xff]   ;;  %v2269_v38 = vld [vmem:[%s2502_s9 + $0x154] ss:$8 sps:$4 sm:$0xff]   ;;  %v2271_v39 = vld [vmem:[%s2502_s9 + $0x50] ss:$8 sps:$4 sm:$0xff]  }
  0x1d   : > { %v2272_v40 = vld [vmem:[%s2502_s9 + $0x150] ss:$8 sps:$4 sm:$0xff]   ;;  %v2273_v41 = vld [vmem:[%s2502_s9 + $0x64] ss:$8 sps:$4 sm:$0xff]   ;;  %v2277_v43 = vld [vmem:[%s2502_s9 + $0x60] ss:$8 sps:$4 sm:$0xff]  }
  0x1e   : > { %727 = vmatpush1.bf16.msra.mxu0 %v2224_v4  ;;  %2119 = vmatpush1.bf16.msra.mxu1 %v2224_v4  ;;  %v2275_v42 = vld [vmem:[%s2502_s9 + $0x164] ss:$8 sps:$4 sm:$0xff]   ;;  %v2278_v44 = vld [vmem:[%s2502_s9 + $0x160] ss:$8 sps:$4 sm:$0xff]   ;;  %v2279_v45 = vld [vmem:[%s2502_s9 + $0x74] ss:$8 sps:$4 sm:$0xff]  }
  0x1f   : > { %728 = vmatprep.subr.bf16.mxu0 %v2421_v1  ;;  %2104 = vmatprep.subr.bf16.mxu1 %v2421_v1  ;;  %v2281_v46 = vld [vmem:[%s2502_s9 + $0x174] ss:$8 sps:$4 sm:$0xff]   ;;  %v2283_v47 = vld [vmem:[%s2502_s9 + $0x70] ss:$8 sps:$4 sm:$0xff]   ;;  %v2285_v49 = vld [vmem:[%s2502_s9 + $0x84] ss:$8 sps:$4 sm:$0xff]  }
  0x20   : > { %v2284_v48 = vld [vmem:[%s2502_s9 + $0x170] ss:$8 sps:$4 sm:$0xff]   ;;  %v2287_v50 = vld [vmem:[%s2502_s9 + $0x184] ss:$8 sps:$4 sm:$0xff]   ;;  %v2289_v51 = vld [vmem:[%s2502_s9 + $0x80] ss:$8 sps:$4 sm:$0xff]  }
  0x21   : > { %v2290_v52 = vld [vmem:[%s2502_s9 + $0x180] ss:$8 sps:$4 sm:$0xff]   ;;  %v2291_v53 = vld [vmem:[%s2502_s9 + $0x94] ss:$8 sps:$4 sm:$0xff]   ;;  %v2295_v55 = vld [vmem:[%s2502_s9 + $0x90] ss:$8 sps:$4 sm:$0xff]  }
  0x22   : > { %729 = vmatpush1.bf16.msra.mxu0 %v2225_v5  ;;  %2120 = vmatpush1.bf16.msra.mxu1 %v2225_v5  ;;  %v2293_v54 = vld [vmem:[%s2502_s9 + $0x194] ss:$8 sps:$4 sm:$0xff]   ;;  %v2296_v56 = vld [vmem:[%s2502_s9 + $0x190] ss:$8 sps:$4 sm:$0xff]   ;;  %v2297_v57 = vld [vmem:[%s2502_s9 + $0xa4] ss:$8 sps:$4 sm:$0xff]  }
  0x23   : > { %730 = vmatprep.subr.bf16.mxu0 %v2421_v1  ;;  %2105 = vmatprep.subr.bf16.mxu1 %v2421_v1  ;;  %v2299_v58 = vld [vmem:[%s2502_s9 + $0x1a4] ss:$8 sps:$4 sm:$0xff]   ;;  %v2301_v59 = vld [vmem:[%s2502_s9 + $0xa0] ss:$8 sps:$4 sm:$0xff]   ;;  %v2303_v61 = vld [vmem:[%s2502_s9 + $0xb4] ss:$8 sps:$4 sm:$0xff]  }
  0x24   : > { %v2302_v60 = vld [vmem:[%s2502_s9 + $0x1a0] ss:$8 sps:$4 sm:$0xff]   ;;  %v2305_v62 = vld [vmem:[%s2502_s9 + $0x1b4] ss:$8 sps:$4 sm:$0xff]   ;;  %v2307_v63 = vld [vmem:[%s2502_s9 + $0xb0] ss:$8 sps:$4 sm:$0xff]  }
  0x25   : > { %v2308_v0 = vld [vmem:[%s2502_s9 + $0x1b0] ss:$8 sps:$4 sm:$0xff]   ;;  %v2311_v2 = vld [vmem:[%s2502_s9 + $0x1c4] ss:$8 sps:$4 sm:$0xff]   ;;  %v2313_v3 = vld [vmem:[%s2502_s9 + $0xc0] ss:$8 sps:$4 sm:$0xff]  }
  0x26   : > { %731 = vmatpush1.bf16.msra.mxu0 %v2226_v7  ;;  %2121 = vmatpush1.bf16.msra.mxu1 %v2226_v7  ;;  %v2314_v4 = vld [vmem:[%s2502_s9 + $0x1c0] ss:$8 sps:$4 sm:$0xff]   ;;  %v2315_v5 = vld [vmem:[%s2502_s9 + $0xd4] ss:$8 sps:$4 sm:$0xff]   ;;  %v2319_v7 = vld [vmem:[%s2502_s9 + $0xd0] ss:$8 sps:$4 sm:$0xff]  }
  0x27   : > { %732 = vmatprep.subr.bf16.mxu0 %v2421_v1  ;;  %2106 = vmatprep.subr.bf16.mxu1 %v2421_v1  ;;  %v2317_v6 = vld [vmem:[%s2502_s9 + $0x1d4] ss:$8 sps:$4 sm:$0xff]   ;;  %v2320_v8 = vld [vmem:[%s2502_s9 + $0x1d0] ss:$8 sps:$4 sm:$0xff]  }
  0x2a   : > { %733 = vmatpush1.bf16.msra.mxu0 %v2227_v9  ;;  %2122 = vmatpush1.bf16.msra.mxu1 %v2227_v9  ;;  %v2321_v9 = vld [vmem:[%s2502_s9 + $0xe4] ss:$8 sps:$4 sm:$0xff]  }
  0x2b   : > { %734 = vmatprep.subr.bf16.mxu0 %v2421_v1  ;;  %2107 = vmatprep.subr.bf16.mxu1 %v2421_v1 }
  0x2e   : > { %735 = vmatpush1.bf16.msra.mxu0 %v2228_v10  ;;  %2123 = vmatpush1.bf16.msra.mxu1 %v2228_v10  ;;  %v2323_v10 = vld [vmem:[%s2502_s9 + $0x1e4] ss:$8 sps:$4 sm:$0xff]  }
  0x2f   : > { %736 = vmatprep.subr.bf16.mxu0 %v2421_v1  ;;  %2108 = vmatprep.subr.bf16.mxu1 %v2421_v1 }
  0x32   : > { %737 = vmatpush2.bf16.msra.mxu0 %v2229_v11  ;;  %2124 = vmatpush2.bf16.msra.mxu1 %v2229_v11  ;;  %v2325_v11 = vld [vmem:[%s2502_s9 + $0xe0] ss:$8 sps:$4 sm:$0xff]  }
  0x33   : > { %738 = vmatprep.subr.bf16.mxu0 %v2421_v1  ;;  %2109 = vmatprep.subr.bf16.mxu1 %v2421_v1 }
  0x36   : > { %739 = vmatpush2.bf16.msra.mxu0 %v2230_v12  ;;  %2125 = vmatpush2.bf16.msra.mxu1 %v2230_v12  ;;  %v2326_v12 = vld [vmem:[%s2502_s9 + $0x1e0] ss:$8 sps:$4 sm:$0xff]  }
  0x37   : > { %740 = vmatprep.subr.bf16.mxu0 %v2421_v1  ;;  %2110 = vmatprep.subr.bf16.mxu1 %v2421_v1 }
  0x3a   : > { %741 = vmatpush2.bf16.msra.mxu0 %v2231_v13  ;;  %2126 = vmatpush2.bf16.msra.mxu1 %v2231_v13  ;;  %v2327_v13 = vld [vmem:[%s2502_s9 + $0xf4] ss:$8 sps:$4 sm:$0xff]  }
  0x3b   : > { %742 = vmatprep.subr.bf16.mxu0 %v2421_v1  ;;  %2111 = vmatprep.subr.bf16.mxu1 %v2421_v1 }
  0x3e   : > { %743 = vmatpush2.bf16.msra.mxu0 %v2232_v14  ;;  %2127 = vmatpush2.bf16.msra.mxu1 %v2232_v14  ;;  %v2329_v14 = vld [vmem:[%s2502_s9 + $0x1f4] ss:$8 sps:$4 sm:$0xff]  }
  0x3f   : > { %744 = vmatprep.subr.bf16.mxu0 %v2421_v1  ;;  %2112 = vmatprep.subr.bf16.mxu1 %v2421_v1 }
  0x42   : > { %745 = vmatpush2.bf16.msra.mxu0 %v2233_v15  ;;  %2128 = vmatpush2.bf16.msra.mxu1 %v2233_v15  ;;  %v2331_v15 = vld [vmem:[%s2502_s9 + $0xf0] ss:$8 sps:$4 sm:$0xff]  }
  0x43   : > { %746 = vmatprep.subr.bf16.mxu0 %v2421_v1  ;;  %2113 = vmatprep.subr.bf16.mxu1 %v2421_v1 }
  0x46   : > { %747 = vmatpush2.bf16.msra.mxu0 %v2234_v16  ;;  %2129 = vmatpush2.bf16.msra.mxu1 %v2234_v16  ;;  %v2332_v16 = vld [vmem:[%s2502_s9 + $0x1f0] ss:$8 sps:$4 sm:$0xff]  }
  0x47   : > { %748 = vmatprep.subr.bf16.mxu0 %v2421_v1  ;;  %2114 = vmatprep.subr.bf16.mxu1 %v2421_v1 }
  0x4a   : > { %749 = vmatpush2.bf16.msra.mxu0 %v2235_v17  ;;  %2130 = vmatpush2.bf16.msra.mxu1 %v2235_v17  ;;  %v2629_v17 = vld [vmem:[%s3026_s2] ss:$0 sm:$0xff] }
  0x4b   : > { %750 = vmatprep.subr.bf16.mxu0 %v2421_v1  ;;  %2115 = vmatprep.subr.bf16.mxu1 %v2421_v1  ;;  %v2309_v1 = vld [vmem:[%s2502_s9 + $0xc4] ss:$8 sps:$4 sm:$0xff]   ;;  %s1402_s9 = ssub.s32 (%p2467_p4), 111, %s2477_s23 }
  0x4c   : > { %p1403_p8 = scmp.lt.s32.totalorder (%p2467_p4), %s1402_s9, 64 }
  0x4e   : > { %751 = vmatpush2.bf16.msra.mxu0 %v2236_v18  ;;  %2131 = vmatpush2.bf16.msra.mxu1 %v2236_v18 }
  0x51   : > { %753 = vmatmul.mubr.bf16.vlgmr.msra.gmra.mxu0 %v2237_v19  ;;  %881 = vmatmul.mubr.bf16.vlgmr.msra.gmra.mxu1 %v2240_v20 }
  0x52   : > { %760 = vmatprep.mubr.bf16.mxu0 %v2243_v21  ;;  %888 = vmatprep.mubr.bf16.mxu1 %v2245_v22 }
  0x59   : > { %761 = vmatmul.mubr.bf16.gmra.mxu0 %v2247_v23  ;;  %889 = vmatmul.mubr.bf16.gmra.mxu1 %v2248_v24 }
  0x5a   : > { %768 = vmatprep.mubr.bf16.mxu0 %v2249_v25  ;;  %896 = vmatprep.mubr.bf16.mxu1 %v2251_v26 }
  0x61   : > { %769 = vmatmul.mubr.bf16.gmra.mxu0 %v2253_v27  ;;  %897 = vmatmul.mubr.bf16.gmra.mxu1 %v2254_v28 }
  0x62   : > { %776 = vmatprep.mubr.bf16.mxu0 %v2255_v29  ;;  %904 = vmatprep.mubr.bf16.mxu1 %v2257_v30 }
  0x69   : > { %777 = vmatmul.mubr.bf16.gmra.mxu0 %v2259_v31  ;;  %905 = vmatmul.mubr.bf16.gmra.mxu1 %v2260_v32 }
  0x6a   : > { %784 = vmatprep.mubr.bf16.mxu0 %v2261_v33  ;;  %912 = vmatprep.mubr.bf16.mxu1 %v2263_v34 }
  0x71   : > { %785 = vmatmul.mubr.bf16.gmra.mxu0 %v2265_v35  ;;  %913 = vmatmul.mubr.bf16.gmra.mxu1 %v2266_v36 }
  0x72   : > { %792 = vmatprep.mubr.bf16.mxu0 %v2267_v37  ;;  %920 = vmatprep.mubr.bf16.mxu1 %v2269_v38 }
  0x79   : > { %793 = vmatmul.mubr.bf16.gmra.mxu0 %v2271_v39  ;;  %921 = vmatmul.mubr.bf16.gmra.mxu1 %v2272_v40 }
  0x7a   : > { %800 = vmatprep.mubr.bf16.mxu0 %v2273_v41  ;;  %928 = vmatprep.mubr.bf16.mxu1 %v2275_v42 }
  0x81   : > { %801 = vmatmul.mubr.bf16.gmra.mxu0 %v2277_v43  ;;  %929 = vmatmul.mubr.bf16.gmra.mxu1 %v2278_v44 }
  0x82   : > { %808 = vmatprep.mubr.bf16.mxu0 %v2279_v45  ;;  %936 = vmatprep.mubr.bf16.mxu1 %v2281_v46 }
  0x89   : > { %809 = vmatmul.mubr.bf16.gmra.mxu0 %v2283_v47  ;;  %937 = vmatmul.mubr.bf16.gmra.mxu1 %v2284_v48 }
  0x8a   : > { %816 = vmatprep.mubr.bf16.mxu0 %v2285_v49  ;;  %944 = vmatprep.mubr.bf16.mxu1 %v2287_v50 }
  0x91   : > { %817 = vmatmul.mubr.bf16.gmra.mxu0 %v2289_v51  ;;  %945 = vmatmul.mubr.bf16.gmra.mxu1 %v2290_v52 }
  0x92   : > { %824 = vmatprep.mubr.bf16.mxu0 %v2291_v53  ;;  %952 = vmatprep.mubr.bf16.mxu1 %v2293_v54 }
  0x99   : > { %825 = vmatmul.mubr.bf16.gmra.mxu0 %v2295_v55  ;;  %953 = vmatmul.mubr.bf16.gmra.mxu1 %v2296_v56 }
  0x9a   : > { %832 = vmatprep.mubr.bf16.mxu0 %v2297_v57  ;;  %960 = vmatprep.mubr.bf16.mxu1 %v2299_v58 }
  0xa1   : > { %833 = vmatmul.mubr.bf16.gmra.mxu0 %v2301_v59  ;;  %961 = vmatmul.mubr.bf16.gmra.mxu1 %v2302_v60 }
  0xa2   : > { %840 = vmatprep.mubr.bf16.mxu0 %v2303_v61  ;;  %968 = vmatprep.mubr.bf16.mxu1 %v2305_v62 }
  0xa9   : > { %841 = vmatmul.mubr.bf16.gmra.mxu0 %v2307_v63  ;;  %969 = vmatmul.mubr.bf16.gmra.mxu1 %v2308_v0 }
  0xaa   : > { %848 = vmatprep.mubr.bf16.mxu0 %v2309_v1  ;;  %976 = vmatprep.mubr.bf16.mxu1 %v2311_v2 }
  0xb1   : > { %849 = vmatmul.mubr.bf16.gmra.mxu0 %v2313_v3  ;;  %977 = vmatmul.mubr.bf16.gmra.mxu1 %v2314_v4 }
  0xb2   : > { %856 = vmatprep.mubr.bf16.mxu0 %v2315_v5  ;;  %984 = vmatprep.mubr.bf16.mxu1 %v2317_v6 }
  0xb9   : > { %857 = vmatmul.mubr.bf16.gmra.mxu0 %v2319_v7  ;;  %985 = vmatmul.mubr.bf16.gmra.mxu1 %v2320_v8 }
  0xba   : > { %864 = vmatprep.mubr.bf16.mxu0 %v2321_v9  ;;  %992 = vmatprep.mubr.bf16.mxu1 %v2323_v10 }
  0xc1   : > { %865 = vmatmul.mubr.bf16.gmra.mxu0 %v2325_v11  ;;  %993 = vmatmul.mubr.bf16.gmra.mxu1 %v2326_v12 }
  0xc2   : > { %872 = vmatprep.mubr.bf16.mxu0 %v2327_v13  ;;  %1000 = vmatprep.mubr.bf16.mxu1 %v2329_v14 }
  0xc9   : > { %873 = vmatmul.mubr.bf16.gmra.mxu0 %v2331_v15  ;;  %1001 = vmatmul.mubr.bf16.gmra.mxu1 %v2332_v16 }
 0x111   : > { %v754_v18 = vpop.f32.mrf.mxu0  ;;  %v882_v19 = vpop.f32.mrf.mxu1 }
 0x112   : > { %v755_v20 = vadd.f32 %v2629_v17, %v754_v18  ;;  %v883_v21 = vadd.f32 %v2629_v17, %v882_v19 }
 0x113   : > { %v756_v22 = vpop.f32.mrf.mxu0  ;;  %v884_v23 = vpop.f32.mrf.mxu1 }
 0x114   : > { %v1009_v24 = vmax.f32 %v755_v20, 0.0  ;;  %v1041_v25 = vmax.f32 %v883_v21, 0.0 }
 0x115   : > { %v757_v26 = vpop.f32.mrf.mxu0  ;;  %v885_v27 = vpop.f32.mrf.mxu1 }
 0x116   : > { %v2033_v28 = vpack.c.bf16 %v1009_v24, %v1009_v24  ;;  %v2065_v29 = vpack.c.bf16 %v1041_v25, %v1041_v25  ;;  %v758_v30 = vadd.f32 %v2629_v17, %v757_v26  ;;  %v886_v31 = vadd.f32 %v2629_v17, %v885_v27 }
 0x117   : > { %v759_v32 = vpop.f32.mrf.mxu0  ;;  %v887_v33 = vpop.f32.mrf.mxu1 }
 0x118   : > { %1330 = vst.msk [vmem:[%s2635_s12] sm:$0xf] %vm1329_vm0, %v2033_v28  ;;  %1362 = vst.msk [vmem:[%s2635_s12 + $0x80] sm:$0xf] %vm1329_vm0, %v2065_v29  ;;  %v1010_v34 = vmax.f32 %v758_v30, 0.0  ;;  %v1042_v35 = vmax.f32 %v886_v31, 0.0 }
 0x119   : > { %v762_v36 = vpop.f32.mrf.mxu0  ;;  %v890_v37 = vpop.f32.mrf.mxu1 }
 0x11a   : > { %v2034_v38 = vpack.c.bf16 %v1010_v34, %v1010_v34  ;;  %v2066_v39 = vpack.c.bf16 %v1042_v35, %v1042_v35  ;;  %v763_v40 = vadd.f32 %v2629_v17, %v762_v36  ;;  %v891_v41 = vadd.f32 %v2629_v17, %v890_v37 }
 0x11b   : > { %v764_v42 = vpop.f32.mrf.mxu0  ;;  %v892_v43 = vpop.f32.mrf.mxu1 }
 0x11c   : > { %1331 = vst.msk [vmem:[%s2635_s12 + $0x4] sm:$0xf] %vm1329_vm0, %v2034_v38  ;;  %1363 = vst.msk [vmem:[%s2635_s12 + $0x84] sm:$0xf] %vm1329_vm0, %v2066_v39  ;;  %v1011_v44 = vmax.f32 %v763_v40, 0.0  ;;  %v1043_v45 = vmax.f32 %v891_v41, 0.0 }
 0x11d   : > { %v765_v46 = vpop.f32.mrf.mxu0  ;;  %v893_v47 = vpop.f32.mrf.mxu1 }
 0x11e   : > { %v2035_v48 = vpack.c.bf16 %v1011_v44, %v1011_v44  ;;  %v2067_v49 = vpack.c.bf16 %v1043_v45, %v1043_v45  ;;  %v766_v50 = vadd.f32 %v2629_v17, %v765_v46  ;;  %v894_v51 = vadd.f32 %v2629_v17, %v893_v47 }
 0x11f   : > { %v767_v52 = vpop.f32.mrf.mxu0  ;;  %v895_v53 = vpop.f32.mrf.mxu1 }
 0x120   : > { %1332 = vst.msk [vmem:[%s2635_s12 + $0x8] sm:$0xf] %vm1329_vm0, %v2035_v48  ;;  %1364 = vst.msk [vmem:[%s2635_s12 + $0x88] sm:$0xf] %vm1329_vm0, %v2067_v49  ;;  %v1012_v54 = vmax.f32 %v766_v50, 0.0  ;;  %v1044_v55 = vmax.f32 %v894_v51, 0.0 }
 0x121   : > { %v770_v56 = vpop.f32.mrf.mxu0  ;;  %v898_v57 = vpop.f32.mrf.mxu1 }
 0x122   : > { %v2036_v58 = vpack.c.bf16 %v1012_v54, %v1012_v54  ;;  %v2068_v59 = vpack.c.bf16 %v1044_v55, %v1044_v55  ;;  %v771_v60 = vadd.f32 %v2629_v17, %v770_v56  ;;  %v899_v61 = vadd.f32 %v2629_v17, %v898_v57 }
 0x123   : > { %v772_v62 = vpop.f32.mrf.mxu0  ;;  %v900_v63 = vpop.f32.mrf.mxu1 }
 0x124   : > { %1333 = vst.msk [vmem:[%s2635_s12 + $0xc] sm:$0xf] %vm1329_vm0, %v2036_v58  ;;  %1365 = vst.msk [vmem:[%s2635_s12 + $0x8c] sm:$0xf] %vm1329_vm0, %v2068_v59  ;;  %v1013_v0 = vmax.f32 %v771_v60, 0.0  ;;  %v1045_v1 = vmax.f32 %v899_v61, 0.0 }
 0x125   : > { %v773_v2 = vpop.f32.mrf.mxu0  ;;  %v901_v3 = vpop.f32.mrf.mxu1 }
 0x126   : > { %v2037_v4 = vpack.c.bf16 %v1013_v0, %v1013_v0  ;;  %v2069_v5 = vpack.c.bf16 %v1045_v1, %v1045_v1  ;;  %v774_v6 = vadd.f32 %v2629_v17, %v773_v2  ;;  %v902_v7 = vadd.f32 %v2629_v17, %v901_v3 }
 0x127   : > { %v775_v8 = vpop.f32.mrf.mxu0  ;;  %v903_v9 = vpop.f32.mrf.mxu1 }
 0x128   : > { %1334 = vst.msk [vmem:[%s2635_s12 + $0x10] sm:$0xf] %vm1329_vm0, %v2037_v4  ;;  %1366 = vst.msk [vmem:[%s2635_s12 + $0x90] sm:$0xf] %vm1329_vm0, %v2069_v5  ;;  %v1014_v10 = vmax.f32 %v774_v6, 0.0  ;;  %v1046_v11 = vmax.f32 %v902_v7, 0.0 }
 0x129   : > { %v778_v12 = vpop.f32.mrf.mxu0  ;;  %v906_v13 = vpop.f32.mrf.mxu1 }
 0x12a   : > { %v2038_v14 = vpack.c.bf16 %v1014_v10, %v1014_v10  ;;  %v2070_v15 = vpack.c.bf16 %v1046_v11, %v1046_v11  ;;  %v779_v16 = vadd.f32 %v2629_v17, %v778_v12  ;;  %v907_v18 = vadd.f32 %v2629_v17, %v906_v13 }
 0x12b   : > { %v780_v19 = vpop.f32.mrf.mxu0  ;;  %v908_v20 = vpop.f32.mrf.mxu1 }
 0x12c   : > { %1335 = vst.msk [vmem:[%s2635_s12 + $0x14] sm:$0xf] %vm1329_vm0, %v2038_v14  ;;  %1367 = vst.msk [vmem:[%s2635_s12 + $0x94] sm:$0xf] %vm1329_vm0, %v2070_v15  ;;  %v1015_v21 = vmax.f32 %v779_v16, 0.0  ;;  %v1047_v22 = vmax.f32 %v907_v18, 0.0 }
 0x12d   : > { %v781_v23 = vpop.f32.mrf.mxu0  ;;  %v909_v24 = vpop.f32.mrf.mxu1 }
 0x12e   : > { %v2039_v25 = vpack.c.bf16 %v1015_v21, %v1015_v21  ;;  %v2071_v26 = vpack.c.bf16 %v1047_v22, %v1047_v22  ;;  %v782_v27 = vadd.f32 %v2629_v17, %v781_v23  ;;  %v910_v28 = vadd.f32 %v2629_v17, %v909_v24 }
 0x12f   : > { %v783_v29 = vpop.f32.mrf.mxu0  ;;  %v911_v30 = vpop.f32.mrf.mxu1 }
 0x130   : > { %1336 = vst.msk [vmem:[%s2635_s12 + $0x18] sm:$0xf] %vm1329_vm0, %v2039_v25  ;;  %1368 = vst.msk [vmem:[%s2635_s12 + $0x98] sm:$0xf] %vm1329_vm0, %v2071_v26  ;;  %v1016_v31 = vmax.f32 %v782_v27, 0.0  ;;  %v1048_v32 = vmax.f32 %v910_v28, 0.0 }
 0x131   : > { %v786_v33 = vpop.f32.mrf.mxu0  ;;  %v914_v34 = vpop.f32.mrf.mxu1 }
 0x132   : > { %v2040_v35 = vpack.c.bf16 %v1016_v31, %v1016_v31  ;;  %v2072_v36 = vpack.c.bf16 %v1048_v32, %v1048_v32  ;;  %v787_v37 = vadd.f32 %v2629_v17, %v786_v33  ;;  %v915_v38 = vadd.f32 %v2629_v17, %v914_v34 }
 0x133   : > { %v788_v39 = vpop.f32.mrf.mxu0  ;;  %v916_v40 = vpop.f32.mrf.mxu1 }
 0x134   : > { %1337 = vst.msk [vmem:[%s2635_s12 + $0x1c] sm:$0xf] %vm1329_vm0, %v2040_v35  ;;  %1369 = vst.msk [vmem:[%s2635_s12 + $0x9c] sm:$0xf] %vm1329_vm0, %v2072_v36  ;;  %v1017_v41 = vmax.f32 %v787_v37, 0.0  ;;  %v1049_v42 = vmax.f32 %v915_v38, 0.0 }
 0x135   : > { %v789_v43 = vpop.f32.mrf.mxu0  ;;  %v917_v44 = vpop.f32.mrf.mxu1 }
 0x136   : > { %v2041_v45 = vpack.c.bf16 %v1017_v41, %v1017_v41  ;;  %v2073_v46 = vpack.c.bf16 %v1049_v42, %v1049_v42  ;;  %v790_v47 = vadd.f32 %v2629_v17, %v789_v43  ;;  %v918_v48 = vadd.f32 %v2629_v17, %v917_v44 }
 0x137   : > { %v791_v49 = vpop.f32.mrf.mxu0  ;;  %v919_v50 = vpop.f32.mrf.mxu1 }
 0x138   : > { %1338 = vst.msk [vmem:[%s2635_s12 + $0x20] sm:$0xf] %vm1329_vm0, %v2041_v45  ;;  %1370 = vst.msk [vmem:[%s2635_s12 + $0xa0] sm:$0xf] %vm1329_vm0, %v2073_v46  ;;  %v1018_v51 = vmax.f32 %v790_v47, 0.0  ;;  %v1050_v52 = vmax.f32 %v918_v48, 0.0 }
 0x139   : > { %v794_v53 = vpop.f32.mrf.mxu0  ;;  %v922_v54 = vpop.f32.mrf.mxu1 }
 0x13a   : > { %v2042_v55 = vpack.c.bf16 %v1018_v51, %v1018_v51  ;;  %v2074_v56 = vpack.c.bf16 %v1050_v52, %v1050_v52  ;;  %v795_v57 = vadd.f32 %v2629_v17, %v794_v53  ;;  %v923_v58 = vadd.f32 %v2629_v17, %v922_v54 }
 0x13b   : > { %v796_v59 = vpop.f32.mrf.mxu0  ;;  %v924_v60 = vpop.f32.mrf.mxu1 }
 0x13c   : > { %1339 = vst.msk [vmem:[%s2635_s12 + $0x24] sm:$0xf] %vm1329_vm0, %v2042_v55  ;;  %1371 = vst.msk [vmem:[%s2635_s12 + $0xa4] sm:$0xf] %vm1329_vm0, %v2074_v56  ;;  %v1019_v61 = vmax.f32 %v795_v57, 0.0  ;;  %v1051_v62 = vmax.f32 %v923_v58, 0.0 }
 0x13d   : > { %v797_v63 = vpop.f32.mrf.mxu0  ;;  %v925_v0 = vpop.f32.mrf.mxu1 }
 0x13e   : > { %v2043_v1 = vpack.c.bf16 %v1019_v61, %v1019_v61  ;;  %v2075_v2 = vpack.c.bf16 %v1051_v62, %v1051_v62  ;;  %v798_v3 = vadd.f32 %v2629_v17, %v797_v63  ;;  %v926_v4 = vadd.f32 %v2629_v17, %v925_v0 }
 0x13f   : > { %v799_v5 = vpop.f32.mrf.mxu0  ;;  %v927_v6 = vpop.f32.mrf.mxu1 }
 0x140   : > { %1340 = vst.msk [vmem:[%s2635_s12 + $0x28] sm:$0xf] %vm1329_vm0, %v2043_v1  ;;  %1372 = vst.msk [vmem:[%s2635_s12 + $0xa8] sm:$0xf] %vm1329_vm0, %v2075_v2  ;;  %v1020_v7 = vmax.f32 %v798_v3, 0.0  ;;  %v1052_v8 = vmax.f32 %v926_v4, 0.0 }
 0x141   : > { %v802_v9 = vpop.f32.mrf.mxu0  ;;  %v930_v10 = vpop.f32.mrf.mxu1 }
 0x142   : > { %v2044_v11 = vpack.c.bf16 %v1020_v7, %v1020_v7  ;;  %v2076_v12 = vpack.c.bf16 %v1052_v8, %v1052_v8  ;;  %v803_v13 = vadd.f32 %v2629_v17, %v802_v9  ;;  %v931_v14 = vadd.f32 %v2629_v17, %v930_v10 }
 0x143   : > { %v804_v15 = vpop.f32.mrf.mxu0  ;;  %v932_v16 = vpop.f32.mrf.mxu1 }
 0x144   : > { %1341 = vst.msk [vmem:[%s2635_s12 + $0x2c] sm:$0xf] %vm1329_vm0, %v2044_v11  ;;  %1373 = vst.msk [vmem:[%s2635_s12 + $0xac] sm:$0xf] %vm1329_vm0, %v2076_v12  ;;  %v1021_v18 = vmax.f32 %v803_v13, 0.0  ;;  %v1053_v19 = vmax.f32 %v931_v14, 0.0 }
 0x145   : > { %v805_v20 = vpop.f32.mrf.mxu0  ;;  %v933_v21 = vpop.f32.mrf.mxu1 }
 0x146   : > { %v2045_v22 = vpack.c.bf16 %v1021_v18, %v1021_v18  ;;  %v2077_v23 = vpack.c.bf16 %v1053_v19, %v1053_v19  ;;  %v806_v24 = vadd.f32 %v2629_v17, %v805_v20  ;;  %v934_v25 = vadd.f32 %v2629_v17, %v933_v21 }
 0x147   : > { %v807_v26 = vpop.f32.mrf.mxu0  ;;  %v935_v27 = vpop.f32.mrf.mxu1 }
 0x148   : > { %1342 = vst.msk [vmem:[%s2635_s12 + $0x30] sm:$0xf] %vm1329_vm0, %v2045_v22  ;;  %1374 = vst.msk [vmem:[%s2635_s12 + $0xb0] sm:$0xf] %vm1329_vm0, %v2077_v23  ;;  %v1022_v28 = vmax.f32 %v806_v24, 0.0  ;;  %v1054_v29 = vmax.f32 %v934_v25, 0.0 }
 0x149   : > { %v810_v30 = vpop.f32.mrf.mxu0  ;;  %v938_v31 = vpop.f32.mrf.mxu1 }
 0x14a   : > { %v2046_v32 = vpack.c.bf16 %v1022_v28, %v1022_v28  ;;  %v2078_v33 = vpack.c.bf16 %v1054_v29, %v1054_v29  ;;  %v811_v34 = vadd.f32 %v2629_v17, %v810_v30  ;;  %v939_v35 = vadd.f32 %v2629_v17, %v938_v31 }
 0x14b   : > { %v812_v36 = vpop.f32.mrf.mxu0  ;;  %v940_v37 = vpop.f32.mrf.mxu1 }
 0x14c   : > { %1343 = vst.msk [vmem:[%s2635_s12 + $0x34] sm:$0xf] %vm1329_vm0, %v2046_v32  ;;  %1375 = vst.msk [vmem:[%s2635_s12 + $0xb4] sm:$0xf] %vm1329_vm0, %v2078_v33  ;;  %v1023_v38 = vmax.f32 %v811_v34, 0.0  ;;  %v1055_v39 = vmax.f32 %v939_v35, 0.0 }
 0x14d   : > { %v813_v40 = vpop.f32.mrf.mxu0  ;;  %v941_v41 = vpop.f32.mrf.mxu1 }
 0x14e   : > { %v2047_v42 = vpack.c.bf16 %v1023_v38, %v1023_v38  ;;  %v2079_v43 = vpack.c.bf16 %v1055_v39, %v1055_v39  ;;  %v814_v44 = vadd.f32 %v2629_v17, %v813_v40  ;;  %v942_v45 = vadd.f32 %v2629_v17, %v941_v41 }
 0x14f   : > { %v815_v46 = vpop.f32.mrf.mxu0  ;;  %v943_v47 = vpop.f32.mrf.mxu1 }
 0x150   : > { %1344 = vst.msk [vmem:[%s2635_s12 + $0x38] sm:$0xf] %vm1329_vm0, %v2047_v42  ;;  %1376 = vst.msk [vmem:[%s2635_s12 + $0xb8] sm:$0xf] %vm1329_vm0, %v2079_v43  ;;  %v1024_v48 = vmax.f32 %v814_v44, 0.0  ;;  %v1056_v49 = vmax.f32 %v942_v45, 0.0 }
 0x151   : > { %v818_v50 = vpop.f32.mrf.mxu0  ;;  %v946_v51 = vpop.f32.mrf.mxu1 }
 0x152   : > { %v2048_v52 = vpack.c.bf16 %v1024_v48, %v1024_v48  ;;  %v2080_v53 = vpack.c.bf16 %v1056_v49, %v1056_v49  ;;  %v819_v54 = vadd.f32 %v2629_v17, %v818_v50  ;;  %v947_v55 = vadd.f32 %v2629_v17, %v946_v51 }
 0x153   : > { %v820_v56 = vpop.f32.mrf.mxu0  ;;  %v948_v57 = vpop.f32.mrf.mxu1 }
 0x154   : > { %1345 = vst.msk [vmem:[%s2635_s12 + $0x3c] sm:$0xf] %vm1329_vm0, %v2048_v52  ;;  %1377 = vst.msk [vmem:[%s2635_s12 + $0xbc] sm:$0xf] %vm1329_vm0, %v2080_v53  ;;  %v1025_v58 = vmax.f32 %v819_v54, 0.0  ;;  %v1057_v59 = vmax.f32 %v947_v55, 0.0 }
 0x155   : > { %v821_v60 = vpop.f32.mrf.mxu0  ;;  %v949_v61 = vpop.f32.mrf.mxu1 }
 0x156   : > { %v2049_v62 = vpack.c.bf16 %v1025_v58, %v1025_v58  ;;  %v2081_v63 = vpack.c.bf16 %v1057_v59, %v1057_v59  ;;  %v822_v0 = vadd.f32 %v2629_v17, %v821_v60  ;;  %v950_v1 = vadd.f32 %v2629_v17, %v949_v61 }
 0x157   : > { %v823_v2 = vpop.f32.mrf.mxu0  ;;  %v951_v3 = vpop.f32.mrf.mxu1 }
 0x158   : > { %1346 = vst.msk [vmem:[%s2635_s12 + $0x40] sm:$0xf] %vm1329_vm0, %v2049_v62  ;;  %1378 = vst.msk [vmem:[%s2635_s12 + $0xc0] sm:$0xf] %vm1329_vm0, %v2081_v63  ;;  %v1026_v4 = vmax.f32 %v822_v0, 0.0  ;;  %v1058_v5 = vmax.f32 %v950_v1, 0.0 }
 0x159   : > { %v826_v6 = vpop.f32.mrf.mxu0  ;;  %v954_v7 = vpop.f32.mrf.mxu1 }
 0x15a   : > { %v2050_v8 = vpack.c.bf16 %v1026_v4, %v1026_v4  ;;  %v2082_v9 = vpack.c.bf16 %v1058_v5, %v1058_v5  ;;  %v827_v10 = vadd.f32 %v2629_v17, %v826_v6  ;;  %v955_v11 = vadd.f32 %v2629_v17, %v954_v7 }
 0x15b   : > { %v828_v12 = vpop.f32.mrf.mxu0  ;;  %v956_v13 = vpop.f32.mrf.mxu1 }
 0x15c   : > { %1347 = vst.msk [vmem:[%s2635_s12 + $0x44] sm:$0xf] %vm1329_vm0, %v2050_v8  ;;  %1379 = vst.msk [vmem:[%s2635_s12 + $0xc4] sm:$0xf] %vm1329_vm0, %v2082_v9  ;;  %v1027_v14 = vmax.f32 %v827_v10, 0.0  ;;  %v1059_v15 = vmax.f32 %v955_v11, 0.0 }
 0x15d   : > { %v829_v16 = vpop.f32.mrf.mxu0  ;;  %v957_v18 = vpop.f32.mrf.mxu1 }
 0x15e   : > { %v2051_v19 = vpack.c.bf16 %v1027_v14, %v1027_v14  ;;  %v2083_v20 = vpack.c.bf16 %v1059_v15, %v1059_v15  ;;  %v830_v21 = vadd.f32 %v2629_v17, %v829_v16  ;;  %v958_v22 = vadd.f32 %v2629_v17, %v957_v18 }
 0x15f   : > { %v831_v23 = vpop.f32.mrf.mxu0  ;;  %v959_v24 = vpop.f32.mrf.mxu1 }
 0x160   : > { %1348 = vst.msk [vmem:[%s2635_s12 + $0x48] sm:$0xf] %vm1329_vm0, %v2051_v19  ;;  %1380 = vst.msk [vmem:[%s2635_s12 + $0xc8] sm:$0xf] %vm1329_vm0, %v2083_v20  ;;  %v1028_v25 = vmax.f32 %v830_v21, 0.0  ;;  %v1060_v26 = vmax.f32 %v958_v22, 0.0 }
 0x161   : > { %v834_v27 = vpop.f32.mrf.mxu0  ;;  %v962_v28 = vpop.f32.mrf.mxu1 }
 0x162   : > { %v2052_v29 = vpack.c.bf16 %v1028_v25, %v1028_v25  ;;  %v2084_v30 = vpack.c.bf16 %v1060_v26, %v1060_v26  ;;  %v835_v31 = vadd.f32 %v2629_v17, %v834_v27  ;;  %v963_v32 = vadd.f32 %v2629_v17, %v962_v28 }
 0x163   : > { %v836_v33 = vpop.f32.mrf.mxu0  ;;  %v964_v34 = vpop.f32.mrf.mxu1 }
 0x164   : > { %1349 = vst.msk [vmem:[%s2635_s12 + $0x4c] sm:$0xf] %vm1329_vm0, %v2052_v29  ;;  %1381 = vst.msk [vmem:[%s2635_s12 + $0xcc] sm:$0xf] %vm1329_vm0, %v2084_v30  ;;  %v1029_v35 = vmax.f32 %v835_v31, 0.0  ;;  %v1061_v36 = vmax.f32 %v963_v32, 0.0 }
 0x165   : > { %v837_v37 = vpop.f32.mrf.mxu0  ;;  %v965_v38 = vpop.f32.mrf.mxu1 }
 0x166   : > { %v2053_v39 = vpack.c.bf16 %v1029_v35, %v1029_v35  ;;  %v2085_v40 = vpack.c.bf16 %v1061_v36, %v1061_v36  ;;  %v838_v41 = vadd.f32 %v2629_v17, %v837_v37  ;;  %v966_v42 = vadd.f32 %v2629_v17, %v965_v38 }
 0x167   : > { %v839_v43 = vpop.f32.mrf.mxu0  ;;  %v967_v44 = vpop.f32.mrf.mxu1 }
 0x168   : > { %1350 = vst.msk [vmem:[%s2635_s12 + $0x50] sm:$0xf] %vm1329_vm0, %v2053_v39  ;;  %1382 = vst.msk [vmem:[%s2635_s12 + $0xd0] sm:$0xf] %vm1329_vm0, %v2085_v40  ;;  %v1030_v45 = vmax.f32 %v838_v41, 0.0  ;;  %v1062_v46 = vmax.f32 %v966_v42, 0.0 }
 0x169   : > { %v842_v47 = vpop.f32.mrf.mxu0  ;;  %v970_v48 = vpop.f32.mrf.mxu1 }
 0x16a   : > { %v2054_v49 = vpack.c.bf16 %v1030_v45, %v1030_v45  ;;  %v2086_v50 = vpack.c.bf16 %v1062_v46, %v1062_v46  ;;  %v843_v51 = vadd.f32 %v2629_v17, %v842_v47  ;;  %v971_v52 = vadd.f32 %v2629_v17, %v970_v48 }
 0x16b   : > { %v844_v53 = vpop.f32.mrf.mxu0  ;;  %v972_v54 = vpop.f32.mrf.mxu1 }
 0x16c   : > { %1351 = vst.msk [vmem:[%s2635_s12 + $0x54] sm:$0xf] %vm1329_vm0, %v2054_v49  ;;  %1383 = vst.msk [vmem:[%s2635_s12 + $0xd4] sm:$0xf] %vm1329_vm0, %v2086_v50  ;;  %v1031_v55 = vmax.f32 %v843_v51, 0.0  ;;  %v1063_v56 = vmax.f32 %v971_v52, 0.0 }
 0x16d   : > { %v845_v57 = vpop.f32.mrf.mxu0  ;;  %v973_v58 = vpop.f32.mrf.mxu1 }
 0x16e   : > { %v2055_v59 = vpack.c.bf16 %v1031_v55, %v1031_v55  ;;  %v2087_v60 = vpack.c.bf16 %v1063_v56, %v1063_v56  ;;  %v846_v61 = vadd.f32 %v2629_v17, %v845_v57  ;;  %v974_v62 = vadd.f32 %v2629_v17, %v973_v58 }
 0x16f   : > { %v847_v63 = vpop.f32.mrf.mxu0  ;;  %v975_v0 = vpop.f32.mrf.mxu1 }
 0x170   : > { %1352 = vst.msk [vmem:[%s2635_s12 + $0x58] sm:$0xf] %vm1329_vm0, %v2055_v59  ;;  %1384 = vst.msk [vmem:[%s2635_s12 + $0xd8] sm:$0xf] %vm1329_vm0, %v2087_v60  ;;  %v1032_v1 = vmax.f32 %v846_v61, 0.0  ;;  %v1064_v2 = vmax.f32 %v974_v62, 0.0 }
 0x171   : > { %v850_v3 = vpop.f32.mrf.mxu0  ;;  %v978_v4 = vpop.f32.mrf.mxu1 }
 0x172   : > { %v2056_v5 = vpack.c.bf16 %v1032_v1, %v1032_v1  ;;  %v2088_v6 = vpack.c.bf16 %v1064_v2, %v1064_v2  ;;  %v851_v7 = vadd.f32 %v2629_v17, %v850_v3  ;;  %v979_v8 = vadd.f32 %v2629_v17, %v978_v4 }
 0x173   : > { %v852_v9 = vpop.f32.mrf.mxu0  ;;  %v980_v10 = vpop.f32.mrf.mxu1 }
 0x174   : > { %1353 = vst.msk [vmem:[%s2635_s12 + $0x5c] sm:$0xf] %vm1329_vm0, %v2056_v5  ;;  %1385 = vst.msk [vmem:[%s2635_s12 + $0xdc] sm:$0xf] %vm1329_vm0, %v2088_v6  ;;  %v1033_v11 = vmax.f32 %v851_v7, 0.0  ;;  %v1065_v12 = vmax.f32 %v979_v8, 0.0 }
 0x175   : > { %v853_v13 = vpop.f32.mrf.mxu0  ;;  %v981_v14 = vpop.f32.mrf.mxu1 }
 0x176   : > { %v2057_v15 = vpack.c.bf16 %v1033_v11, %v1033_v11  ;;  %v2089_v16 = vpack.c.bf16 %v1065_v12, %v1065_v12  ;;  %v854_v18 = vadd.f32 %v2629_v17, %v853_v13  ;;  %v982_v19 = vadd.f32 %v2629_v17, %v981_v14 }
 0x177   : > { %v855_v20 = vpop.f32.mrf.mxu0  ;;  %v983_v21 = vpop.f32.mrf.mxu1 }
 0x178   : > { %1354 = vst.msk [vmem:[%s2635_s12 + $0x60] sm:$0xf] %vm1329_vm0, %v2057_v15  ;;  %1386 = vst.msk [vmem:[%s2635_s12 + $0xe0] sm:$0xf] %vm1329_vm0, %v2089_v16  ;;  %v1034_v22 = vmax.f32 %v854_v18, 0.0  ;;  %v1066_v23 = vmax.f32 %v982_v19, 0.0 }
 0x179   : > { %v858_v24 = vpop.f32.mrf.mxu0  ;;  %v986_v25 = vpop.f32.mrf.mxu1 }
 0x17a   : > { %v2058_v26 = vpack.c.bf16 %v1034_v22, %v1034_v22  ;;  %v2090_v27 = vpack.c.bf16 %v1066_v23, %v1066_v23  ;;  %v859_v28 = vadd.f32 %v2629_v17, %v858_v24  ;;  %v987_v29 = vadd.f32 %v2629_v17, %v986_v25 }
 0x17b   : > { %v860_v30 = vpop.f32.mrf.mxu0  ;;  %v988_v31 = vpop.f32.mrf.mxu1 }
 0x17c   : > { %1355 = vst.msk [vmem:[%s2635_s12 + $0x64] sm:$0xf] %vm1329_vm0, %v2058_v26  ;;  %1387 = vst.msk [vmem:[%s2635_s12 + $0xe4] sm:$0xf] %vm1329_vm0, %v2090_v27  ;;  %v1035_v32 = vmax.f32 %v859_v28, 0.0  ;;  %v1067_v33 = vmax.f32 %v987_v29, 0.0 }
 0x17d   : > { %v861_v34 = vpop.f32.mrf.mxu0  ;;  %v989_v35 = vpop.f32.mrf.mxu1 }
 0x17e   : > { %v2059_v36 = vpack.c.bf16 %v1035_v32, %v1035_v32  ;;  %v2091_v37 = vpack.c.bf16 %v1067_v33, %v1067_v33  ;;  %v862_v38 = vadd.f32 %v2629_v17, %v861_v34  ;;  %v990_v39 = vadd.f32 %v2629_v17, %v989_v35 }
 0x17f   : > { %v863_v40 = vpop.f32.mrf.mxu0  ;;  %v991_v41 = vpop.f32.mrf.mxu1 }
 0x180   : > { %1356 = vst.msk [vmem:[%s2635_s12 + $0x68] sm:$0xf] %vm1329_vm0, %v2059_v36  ;;  %1388 = vst.msk [vmem:[%s2635_s12 + $0xe8] sm:$0xf] %vm1329_vm0, %v2091_v37  ;;  %v1036_v42 = vmax.f32 %v862_v38, 0.0  ;;  %v1068_v43 = vmax.f32 %v990_v39, 0.0 }
 0x181   : > { %v866_v44 = vpop.f32.mrf.mxu0  ;;  %v994_v45 = vpop.f32.mrf.mxu1 }
 0x182   : > { %v2060_v46 = vpack.c.bf16 %v1036_v42, %v1036_v42  ;;  %v2092_v47 = vpack.c.bf16 %v1068_v43, %v1068_v43  ;;  %v867_v48 = vadd.f32 %v2629_v17, %v866_v44  ;;  %v995_v49 = vadd.f32 %v2629_v17, %v994_v45 }
 0x183   : > { %v868_v50 = vpop.f32.mrf.mxu0  ;;  %v996_v51 = vpop.f32.mrf.mxu1 }
 0x184   : > { %1357 = vst.msk [vmem:[%s2635_s12 + $0x6c] sm:$0xf] %vm1329_vm0, %v2060_v46  ;;  %1389 = vst.msk [vmem:[%s2635_s12 + $0xec] sm:$0xf] %vm1329_vm0, %v2092_v47  ;;  %v1037_v52 = vmax.f32 %v867_v48, 0.0  ;;  %v1069_v53 = vmax.f32 %v995_v49, 0.0 }
 0x185   : > { %v869_v54 = vpop.f32.mrf.mxu0  ;;  %v997_v55 = vpop.f32.mrf.mxu1 }
 0x186   : > { %v2061_v56 = vpack.c.bf16 %v1037_v52, %v1037_v52  ;;  %v2093_v57 = vpack.c.bf16 %v1069_v53, %v1069_v53  ;;  %v870_v58 = vadd.f32 %v2629_v17, %v869_v54  ;;  %v998_v59 = vadd.f32 %v2629_v17, %v997_v55 }
 0x187   : > { %v871_v60 = vpop.f32.mrf.mxu0  ;;  %v999_v61 = vpop.f32.mrf.mxu1 }
 0x188   : > { %1358 = vst.msk [vmem:[%s2635_s12 + $0x70] sm:$0xf] %vm1329_vm0, %v2061_v56  ;;  %1390 = vst.msk [vmem:[%s2635_s12 + $0xf0] sm:$0xf] %vm1329_vm0, %v2093_v57  ;;  %v1038_v62 = vmax.f32 %v870_v58, 0.0  ;;  %v1070_v63 = vmax.f32 %v998_v59, 0.0 }
 0x189   : > { %v874_v0 = vpop.f32.mrf.mxu0  ;;  %v1002_v1 = vpop.f32.mrf.mxu1 }
 0x18a   : > { %v2062_v2 = vpack.c.bf16 %v1038_v62, %v1038_v62  ;;  %v2094_v3 = vpack.c.bf16 %v1070_v63, %v1070_v63  ;;  %v875_v4 = vadd.f32 %v2629_v17, %v874_v0  ;;  %v1003_v5 = vadd.f32 %v2629_v17, %v1002_v1 }
 0x18b   : > { %v876_v6 = vpop.f32.mrf.mxu0  ;;  %v1004_v7 = vpop.f32.mrf.mxu1 }
 0x18c   : > { %1359 = vst.msk [vmem:[%s2635_s12 + $0x74] sm:$0xf] %vm1329_vm0, %v2062_v2  ;;  %1391 = vst.msk [vmem:[%s2635_s12 + $0xf4] sm:$0xf] %vm1329_vm0, %v2094_v3  ;;  %v1039_v8 = vmax.f32 %v875_v4, 0.0  ;;  %v1071_v9 = vmax.f32 %v1003_v5, 0.0 }
 0x18d   : > { %v877_v10 = vpop.f32.mrf.mxu0  ;;  %v1005_v11 = vpop.f32.mrf.mxu1 }
 0x18e   : > { %v2063_v12 = vpack.c.bf16 %v1039_v8, %v1039_v8  ;;  %v2095_v13 = vpack.c.bf16 %v1071_v9, %v1071_v9  ;;  %v878_v14 = vadd.f32 %v2629_v17, %v877_v10  ;;  %v1006_v15 = vadd.f32 %v2629_v17, %v1005_v11 }
 0x18f   : > { %v879_v16 = vpop.f32.mrf.mxu0  ;;  %v1007_v18 = vpop.f32.mrf.mxu1 }
 0x190   : > { %1360 = vst.msk [vmem:[%s2635_s12 + $0x78] sm:$0xf] %vm1329_vm0, %v2063_v12  ;;  %1392 = vst.msk [vmem:[%s2635_s12 + $0xf8] sm:$0xf] %vm1329_vm0, %v2095_v13  ;;  %v1040_v19 = vmax.f32 %v878_v14, 0.0  ;;  %v1072_v20 = vmax.f32 %v1006_v15, 0.0 }
 0x191   : > { %1400 = sbr.rel (!%p2467_p4) target bundleno = 487 (0x1e7), region = 36 }
 0x192   : > { %v2064_v21 = vpack.c.bf16 %v1040_v19, %v1040_v19  ;;  %v2096_v22 = vpack.c.bf16 %v1072_v20, %v1072_v20 }
 0x194   : > { %1361 = vst.msk [vmem:[%s2635_s12 + $0x7c] sm:$0xf] %vm1329_vm0, %v2064_v21  ;;  %1393 = vst.msk [vmem:[%s2635_s12 + $0xfc] sm:$0xf] %vm1329_vm0, %v2096_v22 }
 0x196   : > { %s3036_s9 = smov (!%p1403_p8, %s1402_s9), 64 }
 0x197   : > { %s2017_s28 = sshll.u32 %s3036_s9, 6 }
 0x198   : > { %p2020_p9 = scmp.eq.s32.totalorder %s2017_s28, 0 }
 0x199   : > { %s2838_s29 = sshrl.u32 (!%p2020_p9), %s3036_s9, 6 }
 0x19a   : > { %1411 = sbr.rel (%p2020_p9) target bundleno = 487 (0x1e7), region = 40  ;;  %p2021_p10 = scmp.le.s32.totalorder (!%p2020_p9), %s2838_s29, 0 }
 0x19f   : > { %1818 = sbr.rel (%p2021_p10) target bundleno = 470 (0x1d6), region = 112  ;;  %s3029_s15 = smov (!%p2021_p10), %s2832_s27 }
 0x1a0   : > { %s3030_s20 = smov (!%p2021_p10), %s2635_s12  ;;  %s2847_s23 = smov (!%p2021_p10), 0  }
 0x1a1   : > { %s2849_s30 = smov (!%p2021_p10), 0  }
 0x1a4 LB: >> { %v1428_v17 = vld [vmem:[%s2395_s20] sm:$0xf]  ;;  %v1430_v23 = vld [vmem:[%s2395_s20 + $0x4] sm:$0xf]  ;;  %v1432_v24 = vld [vmem:[%s2395_s20 + $0x8] sm:$0xf]  ;;  %s2403_s30 = sphi %s2849_s30, %s1422_s30   ;;  %s2399_s23 = sphi %s2847_s23, %s3031_s23   ;;  %s2395_s20 = sphi %s3030_s20, %s1561_s20   ;;  %s2391_s15 = sphi %s3029_s15, %s1562_s15  }
 0x1a5   : >> { %1429 = vst [vmem:[%s2391_s15] sm:$0xf] %v1428_v17  ;;  %1431 = vst [vmem:[%s2391_s15 + $0x4] sm:$0xf] %v1430_v23  ;;  %v1434_v25 = vld [vmem:[%s2395_s20 + $0xc] sm:$0xf]  ;;  %s1556_s4 = sadd.s32 1, %s2399_s23 }
 0x1a6   : >> { %1433 = vst [vmem:[%s2391_s15 + $0x8] sm:$0xf] %v1432_v24  ;;  %v1436_v26 = vld [vmem:[%s2395_s20 + $0x10] sm:$0xf]  ;;  %v1438_v27 = vld [vmem:[%s2395_s20 + $0x14] sm:$0xf]  ;;  %p1557_p11 = scmp.ge.s32.totalorder %s1556_s4, %s2838_s29 }
 0x1a7   : >> { %1435 = vst [vmem:[%s2391_s15 + $0xc] sm:$0xf] %v1434_v25  ;;  %1437 = vst [vmem:[%s2391_s15 + $0x10] sm:$0xf] %v1436_v26  ;;  %v1440_v28 = vld [vmem:[%s2395_s20 + $0x18] sm:$0xf] }
 0x1a8   : >> { %1439 = vst [vmem:[%s2391_s15 + $0x14] sm:$0xf] %v1438_v27  ;;  %v1442_v29 = vld [vmem:[%s2395_s20 + $0x1c] sm:$0xf]  ;;  %v1444_v30 = vld [vmem:[%s2395_s20 + $0x20] sm:$0xf] }
 0x1a9   : >> { %1441 = vst [vmem:[%s2391_s15 + $0x18] sm:$0xf] %v1440_v28  ;;  %1443 = vst [vmem:[%s2391_s15 + $0x1c] sm:$0xf] %v1442_v29  ;;  %v1446_v31 = vld [vmem:[%s2395_s20 + $0x24] sm:$0xf] }
 0x1aa   : >> { %1445 = vst [vmem:[%s2391_s15 + $0x20] sm:$0xf] %v1444_v30  ;;  %v1448_v32 = vld [vmem:[%s2395_s20 + $0x28] sm:$0xf]  ;;  %v1450_v33 = vld [vmem:[%s2395_s20 + $0x2c] sm:$0xf] }
 0x1ab   : >> { %1447 = vst [vmem:[%s2391_s15 + $0x24] sm:$0xf] %v1446_v31  ;;  %1449 = vst [vmem:[%s2391_s15 + $0x28] sm:$0xf] %v1448_v32  ;;  %v1452_v34 = vld [vmem:[%s2395_s20 + $0x30] sm:$0xf] }
 0x1ac   : >> { %1451 = vst [vmem:[%s2391_s15 + $0x2c] sm:$0xf] %v1450_v33  ;;  %v1454_v35 = vld [vmem:[%s2395_s20 + $0x34] sm:$0xf]  ;;  %v1456_v36 = vld [vmem:[%s2395_s20 + $0x38] sm:$0xf] }
 0x1ad   : >> { %1453 = vst [vmem:[%s2391_s15 + $0x30] sm:$0xf] %v1452_v34  ;;  %1455 = vst [vmem:[%s2391_s15 + $0x34] sm:$0xf] %v1454_v35  ;;  %v1458_v37 = vld [vmem:[%s2395_s20 + $0x3c] sm:$0xf] }
 0x1ae   : >> { %1457 = vst [vmem:[%s2391_s15 + $0x38] sm:$0xf] %v1456_v36  ;;  %v1460_v38 = vld [vmem:[%s2395_s20 + $0x40] sm:$0xf]  ;;  %v1462_v39 = vld [vmem:[%s2395_s20 + $0x44] sm:$0xf] }
 0x1af   : >> { %1459 = vst [vmem:[%s2391_s15 + $0x3c] sm:$0xf] %v1458_v37  ;;  %1461 = vst [vmem:[%s2391_s15 + $0x40] sm:$0xf] %v1460_v38  ;;  %v1464_v40 = vld [vmem:[%s2395_s20 + $0x48] sm:$0xf] }
 0x1b0   : >> { %1463 = vst [vmem:[%s2391_s15 + $0x44] sm:$0xf] %v1462_v39  ;;  %v1466_v41 = vld [vmem:[%s2395_s20 + $0x4c] sm:$0xf]  ;;  %v1468_v42 = vld [vmem:[%s2395_s20 + $0x50] sm:$0xf] }
 0x1b1   : >> { %1465 = vst [vmem:[%s2391_s15 + $0x48] sm:$0xf] %v1464_v40  ;;  %1467 = vst [vmem:[%s2391_s15 + $0x4c] sm:$0xf] %v1466_v41  ;;  %v1470_v43 = vld [vmem:[%s2395_s20 + $0x54] sm:$0xf] }
 0x1b2   : >> { %1469 = vst [vmem:[%s2391_s15 + $0x50] sm:$0xf] %v1468_v42  ;;  %v1472_v44 = vld [vmem:[%s2395_s20 + $0x58] sm:$0xf]  ;;  %v1474_v45 = vld [vmem:[%s2395_s20 + $0x5c] sm:$0xf] }
 0x1b3   : >> { %1471 = vst [vmem:[%s2391_s15 + $0x54] sm:$0xf] %v1470_v43  ;;  %1473 = vst [vmem:[%s2391_s15 + $0x58] sm:$0xf] %v1472_v44  ;;  %v1476_v46 = vld [vmem:[%s2395_s20 + $0x60] sm:$0xf] }
 0x1b4   : >> { %1475 = vst [vmem:[%s2391_s15 + $0x5c] sm:$0xf] %v1474_v45  ;;  %v1478_v47 = vld [vmem:[%s2395_s20 + $0x64] sm:$0xf]  ;;  %v1480_v48 = vld [vmem:[%s2395_s20 + $0x68] sm:$0xf] }
 0x1b5   : >> { %1477 = vst [vmem:[%s2391_s15 + $0x60] sm:$0xf] %v1476_v46  ;;  %1479 = vst [vmem:[%s2391_s15 + $0x64] sm:$0xf] %v1478_v47  ;;  %v1482_v49 = vld [vmem:[%s2395_s20 + $0x6c] sm:$0xf] }
 0x1b6   : >> { %1481 = vst [vmem:[%s2391_s15 + $0x68] sm:$0xf] %v1480_v48  ;;  %v1484_v50 = vld [vmem:[%s2395_s20 + $0x70] sm:$0xf]  ;;  %v1486_v51 = vld [vmem:[%s2395_s20 + $0x74] sm:$0xf] }
 0x1b7   : >> { %1483 = vst [vmem:[%s2391_s15 + $0x6c] sm:$0xf] %v1482_v49  ;;  %1485 = vst [vmem:[%s2391_s15 + $0x70] sm:$0xf] %v1484_v50  ;;  %v1488_v52 = vld [vmem:[%s2395_s20 + $0x78] sm:$0xf] }
 0x1b8   : >> { %1487 = vst [vmem:[%s2391_s15 + $0x74] sm:$0xf] %v1486_v51  ;;  %v1490_v53 = vld [vmem:[%s2395_s20 + $0x7c] sm:$0xf]  ;;  %v1492_v54 = vld [vmem:[%s2395_s20 + $0x80] sm:$0xf] }
 0x1b9   : >> { %1489 = vst [vmem:[%s2391_s15 + $0x78] sm:$0xf] %v1488_v52  ;;  %1491 = vst [vmem:[%s2391_s15 + $0x7c] sm:$0xf] %v1490_v53  ;;  %v1494_v55 = vld [vmem:[%s2395_s20 + $0x84] sm:$0xf] }
 0x1ba   : >> { %1493 = vst [vmem:[%s2391_s15 + $0x80] sm:$0xf] %v1492_v54  ;;  %v1496_v56 = vld [vmem:[%s2395_s20 + $0x88] sm:$0xf]  ;;  %v1498_v57 = vld [vmem:[%s2395_s20 + $0x8c] sm:$0xf] }
 0x1bb   : >> { %1495 = vst [vmem:[%s2391_s15 + $0x84] sm:$0xf] %v1494_v55  ;;  %1497 = vst [vmem:[%s2391_s15 + $0x88] sm:$0xf] %v1496_v56  ;;  %v1500_v58 = vld [vmem:[%s2395_s20 + $0x90] sm:$0xf] }
 0x1bc   : >> { %1499 = vst [vmem:[%s2391_s15 + $0x8c] sm:$0xf] %v1498_v57  ;;  %v1502_v59 = vld [vmem:[%s2395_s20 + $0x94] sm:$0xf]  ;;  %v1504_v60 = vld [vmem:[%s2395_s20 + $0x98] sm:$0xf] }
 0x1bd   : >> { %1501 = vst [vmem:[%s2391_s15 + $0x90] sm:$0xf] %v1500_v58  ;;  %1503 = vst [vmem:[%s2391_s15 + $0x94] sm:$0xf] %v1502_v59  ;;  %v1506_v61 = vld [vmem:[%s2395_s20 + $0x9c] sm:$0xf] }
 0x1be   : >> { %1505 = vst [vmem:[%s2391_s15 + $0x98] sm:$0xf] %v1504_v60  ;;  %v1508_v62 = vld [vmem:[%s2395_s20 + $0xa0] sm:$0xf]  ;;  %v1510_v63 = vld [vmem:[%s2395_s20 + $0xa4] sm:$0xf] }
 0x1bf   : >> { %1507 = vst [vmem:[%s2391_s15 + $0x9c] sm:$0xf] %v1506_v61  ;;  %1509 = vst [vmem:[%s2391_s15 + $0xa0] sm:$0xf] %v1508_v62  ;;  %v1512_v0 = vld [vmem:[%s2395_s20 + $0xa8] sm:$0xf] }
 0x1c0   : >> { %1511 = vst [vmem:[%s2391_s15 + $0xa4] sm:$0xf] %v1510_v63  ;;  %v1514_v1 = vld [vmem:[%s2395_s20 + $0xac] sm:$0xf]  ;;  %v1516_v2 = vld [vmem:[%s2395_s20 + $0xb0] sm:$0xf] }
 0x1c1   : >> { %1513 = vst [vmem:[%s2391_s15 + $0xa8] sm:$0xf] %v1512_v0  ;;  %1515 = vst [vmem:[%s2391_s15 + $0xac] sm:$0xf] %v1514_v1  ;;  %v1518_v3 = vld [vmem:[%s2395_s20 + $0xb4] sm:$0xf] }
 0x1c2   : >> { %1517 = vst [vmem:[%s2391_s15 + $0xb0] sm:$0xf] %v1516_v2  ;;  %v1520_v4 = vld [vmem:[%s2395_s20 + $0xb8] sm:$0xf]  ;;  %v1522_v5 = vld [vmem:[%s2395_s20 + $0xbc] sm:$0xf] }
 0x1c3   : >> { %1519 = vst [vmem:[%s2391_s15 + $0xb4] sm:$0xf] %v1518_v3  ;;  %1521 = vst [vmem:[%s2391_s15 + $0xb8] sm:$0xf] %v1520_v4  ;;  %v1524_v6 = vld [vmem:[%s2395_s20 + $0xc0] sm:$0xf] }
 0x1c4   : >> { %1523 = vst [vmem:[%s2391_s15 + $0xbc] sm:$0xf] %v1522_v5  ;;  %v1526_v7 = vld [vmem:[%s2395_s20 + $0xc4] sm:$0xf]  ;;  %v1528_v8 = vld [vmem:[%s2395_s20 + $0xc8] sm:$0xf] }
 0x1c5   : >> { %1525 = vst [vmem:[%s2391_s15 + $0xc0] sm:$0xf] %v1524_v6  ;;  %1527 = vst [vmem:[%s2391_s15 + $0xc4] sm:$0xf] %v1526_v7  ;;  %v1530_v9 = vld [vmem:[%s2395_s20 + $0xcc] sm:$0xf] }
 0x1c6   : >> { %1529 = vst [vmem:[%s2391_s15 + $0xc8] sm:$0xf] %v1528_v8  ;;  %v1532_v10 = vld [vmem:[%s2395_s20 + $0xd0] sm:$0xf]  ;;  %v1534_v11 = vld [vmem:[%s2395_s20 + $0xd4] sm:$0xf] }
 0x1c7   : >> { %1531 = vst [vmem:[%s2391_s15 + $0xcc] sm:$0xf] %v1530_v9  ;;  %1533 = vst [vmem:[%s2391_s15 + $0xd0] sm:$0xf] %v1532_v10  ;;  %v1536_v12 = vld [vmem:[%s2395_s20 + $0xd8] sm:$0xf] }
 0x1c8   : >> { %1535 = vst [vmem:[%s2391_s15 + $0xd4] sm:$0xf] %v1534_v11  ;;  %v1538_v13 = vld [vmem:[%s2395_s20 + $0xdc] sm:$0xf]  ;;  %v1540_v14 = vld [vmem:[%s2395_s20 + $0xe0] sm:$0xf] }
 0x1c9   : >> { %1537 = vst [vmem:[%s2391_s15 + $0xd8] sm:$0xf] %v1536_v12  ;;  %1539 = vst [vmem:[%s2391_s15 + $0xdc] sm:$0xf] %v1538_v13  ;;  %v1542_v15 = vld [vmem:[%s2395_s20 + $0xe4] sm:$0xf] }
 0x1ca   : >> { %1541 = vst [vmem:[%s2391_s15 + $0xe0] sm:$0xf] %v1540_v14  ;;  %v1544_v16 = vld [vmem:[%s2395_s20 + $0xe8] sm:$0xf]  ;;  %v1546_v18 = vld [vmem:[%s2395_s20 + $0xec] sm:$0xf] }
 0x1cb   : >> { %1543 = vst [vmem:[%s2391_s15 + $0xe4] sm:$0xf] %v1542_v15  ;;  %1545 = vst [vmem:[%s2391_s15 + $0xe8] sm:$0xf] %v1544_v16  ;;  %v1548_v19 = vld [vmem:[%s2395_s20 + $0xf0] sm:$0xf] }
 0x1cc   : >> { %1547 = vst [vmem:[%s2391_s15 + $0xec] sm:$0xf] %v1546_v18  ;;  %v1550_v20 = vld [vmem:[%s2395_s20 + $0xf4] sm:$0xf]  ;;  %v1552_v21 = vld [vmem:[%s2395_s20 + $0xf8] sm:$0xf] }
 0x1cd   : >> { %1549 = vst [vmem:[%s2391_s15 + $0xf0] sm:$0xf] %v1548_v19  ;;  %1551 = vst [vmem:[%s2391_s15 + $0xf4] sm:$0xf] %v1550_v20  ;;  %v1554_v22 = vld [vmem:[%s2395_s20 + $0xfc] sm:$0xf] }
 0x1ce   : >> { %1553 = vst [vmem:[%s2391_s15 + $0xf8] sm:$0xf] %v1552_v21  ;;  %1555 = vst [vmem:[%s2391_s15 + $0xfc] sm:$0xf] %v1554_v22  ;;  %s3038_s4 = smov (%p1557_p11, %s1556_s4), 0  ;;  %s1422_s30 = sadd.s32 1, %s2403_s30  }
 0x1cf   : >> { %s2022_s5 = sshll.u32 %s3038_s4, 8  ;;  %p1421_p12 = scmp.ge.s32.totalorder %s1422_s30, %s2838_s29 }
 0x1d0   : >> { %s1561_s20 = scalar_lea.vmem %s2635_s12, %s2022_s5 [#allocation2]   ;;  %s1562_s15 = scalar_lea.vmem %s2832_s27, %s2022_s5  }
 0x1d1   : >> { %s3031_s23 = smov %s3038_s4  ;;  %1424 = sbr.rel (!%p1421_p12) target bundleno = 420 (0x1a4), region = 118 }
 0x1d6 PF: > { %s3006_s6 = sand.u32 63, %s3036_s9   ;;  %s2098_s7 = sshll.u32 %s2838_s29, 8 }
 0x1d7   : > { %s1567_s8 = scalar_lea.vmem %s2635_s12, %s2098_s7 [#allocation2]   ;;  %s1569_s10 = scalar_lea.vmem %s2832_s27, %s2098_s7  }
 0x1d8   : > { %p2027_p13 = scmp.le.s32.totalorder %s3006_s6, 0 }
 0x1d9   : > { %s2405_s11 = smov (!%p2027_p13), %s1569_s10   ;;  %s2409_s14 = smov (!%p2027_p13), %s1567_s8  }
 0x1da   : > { %1832 = sbr.rel (%p2027_p13) target bundleno = 487 (0x1e7), region = 123  ;;  %s2413_s17 = smov (!%p2027_p13), 0  }
 0x1db   : > { %s2417_s18 = smov (!%p2027_p13), 0  }
 0x1df LB: >> { %v1579_v17 = vld [vmem:[%s2411_s14] sm:$0xf]  ;;  %s1581_s21 = sadd.s32 1, %s2415_s17  ;;  %s1573_s18 = sadd.s32 1, %s2419_s18   ;;  %s2419_s18 = sphi %s2417_s18, %s1573_s18   ;;  %s2415_s17 = sphi %s2413_s17, %s2414_s17   ;;  %s2411_s14 = sphi %s2409_s14, %s1586_s14   ;;  %s2407_s11 = sphi %s2405_s11, %s1587_s11  }
 0x1e0   : >> { %1580 = vst [vmem:[%s2407_s11] sm:$0xf] %v1579_v17  ;;  %p1582_p0 = scmp.ge.s32.totalorder %s1581_s21, %s3006_s6  ;;  %p1572_p1 = scmp.ge.s32.totalorder %s1573_s18, %s3006_s6 }
 0x1e2   : >> { %s3040_s21 = smov (%p1582_p0, %s1581_s21), 0  ;;  %1575 = sbr.rel (!%p1572_p1) target bundleno = 479 (0x1df), region = 129 }
 0x1e3   : >> { %s2028_s22 = sshll.u32 %s3040_s21, 2  ;;  %s2414_s17 = smov %s3040_s21  }
 0x1e4   : >> { %s1586_s14 = scalar_lea.vmem %s1567_s8, %s2028_s22 [#allocation2]   ;;  %s1587_s11 = scalar_lea.vmem %s1569_s10, %s2028_s22  }
 0x1e7 PF: > { %p10_p2 = scmp.ge.s32.totalorder %s2457_s16, 4   ;;  %s3032_s12 = smov %s2383_s13 }
 0x1e8   : > { %s3033_s13 = smov %s2465_s19  ;;  %s3034_s14 = smov %s2457_s16 }
 0x1e9   :  { %12 = sbr.rel (!%p10_p2) target bundleno = 2 (0x2), region = 140 }

// kernel: deep_q_network_forward.4
= control target key start
LH: loop header
LB: loop body
LE: loop exit
PB: predicated region body
PF: predicated region fallthrough
CT: control target
= control target key end

     0   :  { %s1256_s12 = smov 0   ;;  %s1258_s13 = smov 0   ;;  %s1485_s0 = inlined_call_operand.vmem [shape: bf16[200,256], index: 0, kind: input, shape index: {}]   ;;  %s1486_s1 = inlined_call_operand.vmem [shape: bf16[256,32], index: 1, kind: input, shape index: {}]   ;;  %s1487_s2 = inlined_call_operand.vmem [shape: f32[1,32], index: 2, kind: input, shape index: {}]   ;;  %s1488_s3 = inlined_call_operand.vmem [shape: bf16[200,32], index: 3, kind: output, shape index: {}]  }
   0x1   :  { %s1260_s14 = smov 0  }
   0x2 LB: > { %s1269_s15 = sadd.s32 4294967295, %s1202_s14   ;;  %s1271_s16 = sadd.s32 1, %s1202_s14   ;;  %s1202_s14 = sphi %s1260_s14, %s1495_s14   ;;  %s1198_s13 = sphi %s1258_s13, %s1494_s13   ;;  %s1194_s12 = sphi %s1256_s12, %s1493_s12  }
   0x3   : > { %s85_s17 = ssub.s32 %s1202_s14, %s1271_s16  ;;  %s88_s18 = sadd.s32 1, %s1198_s13 }
   0x4   : > { %p86_p0 = scmp.eq.s32.totalorder %s85_s17, 0  ;;  %p98_p1 = scmp.ne.s32.totalorder %s1198_s13, %s1194_s12 }
   0x5   : > { %p99_p2 = scmp.eq.s32.totalorder %s1269_s15, 1  ;;  %p867_p3 = scmp.ge.s32.totalorder %s1202_s14, 1 }
   0x6   : > { %s1279_s19 = scalar_select %p86_p0, %s1198_s13, %s88_s18  }
   0x7   : > { %p1281_p4 = por %p99_p2, %p98_p1  ;;  %p149_p5 = scmp.lt.s32.totalorder %s1202_s14, 3 }
   0x9   : > { %p150_p6 = pnand %p867_p3, %p149_p5 }
   0xa   : > { %s1289_s23 = smul.u32 (!%p150_p6), 14, %s1269_s15 }
   0xb   : > { %153 = sbr.rel (%p150_p6) target bundleno = 344 (0x158), region = 32 }
   0xc   : > { %p184_p7 = scmp.lt.s32.totalorder (!%p150_p6), %s1289_s23, 24 }
  0x10   : > { %v1107_v0 = vld [vmem:[%s1486_s1 + $0x78] sm:$0xff]   ;;  %v1109_v2 = vld [vmem:[%s1486_s1 + $0x70] sm:$0xff]   ;;  %v1111_v4 = vld [vmem:[%s1486_s1 + $0x68] sm:$0xff]   ;;  %s185_s7 = scalar_select %p184_p7, %s1289_s23, 24  ;;  %vm579_vm0 = vcmask 257024  }
  0x11   : > { %v1108_v1 = vld [vmem:[%s1486_s1 + $0x38] sm:$0xff]   ;;  %943 = vmatprep.subr.bf16.mxu0 %v1107_v0  ;;  %1001 = vmatprep.subr.bf16.mxu1 %v1107_v0  ;;  %v1110_v3 = vld [vmem:[%s1486_s1 + $0x30] sm:$0xff]   ;;  %v1112_v5 = vld [vmem:[%s1486_s1 + $0x28] sm:$0xff]   ;;  %s602_s22 = ssub.s32 (%p1281_p4), 25, %s1289_s23 }
  0x12   : > { %944 = vmatpush3.bf16.msra.mxu0 %v1108_v1  ;;  %1009 = vmatpush3.bf16.msra.mxu1 %v1108_v1  ;;  %v1113_v6 = vld [vmem:[%s1486_s1 + $0x60] sm:$0xff]   ;;  %s927_s14 = sshll.u32 %s185_s7, 3  ;;  %v1115_v8 = vld [vmem:[%s1486_s1 + $0x58] sm:$0xff]   ;;  %v1117_v10 = vld [vmem:[%s1486_s1 + $0x50] sm:$0xff]   ;;  %p603_p8 = scmp.lt.s32.totalorder (%p1281_p4), %s602_s22, 14 }
  0x13   : > { %945 = vmatprep.subr.bf16.mxu0 %v1109_v2  ;;  %1002 = vmatprep.subr.bf16.mxu1 %v1109_v2  ;;  %v1114_v7 = vld [vmem:[%s1486_s1 + $0x20] sm:$0xff]   ;;  %s1320_s24 = scalar_lea.vmem %s1485_s0, %s927_s14  ;;  %v1116_v9 = vld [vmem:[%s1486_s1 + $0x18] sm:$0xff]   ;;  %v1118_v13 = vld [vmem:[%s1486_s1 + $0x10] sm:$0xff]   ;;  %s175_s14 = sand.u32 1, %s1194_s12  }
  0x14   : > { %v1125_v11 = vld [vmem:[%s1320_s24 + $0x4] ss:$8 sps:$4 sm:$0xff]   ;;  %v1123_v18 = vld [vmem:[%s1320_s24] ss:$8 sps:$4 sm:$0xff]   ;;  %v1129_v20 = vld [vmem:[%s1320_s24 + $0x14] ss:$8 sps:$4 sm:$0xff]  }
  0x15   : > { %v1128_v12 = vld [vmem:[%s1320_s24 + $0x44] ss:$8 sps:$4 sm:$0xff]   ;;  %452 = vmatprep.mubr.bf16.mxu0 %v1125_v11  ;;  %v1126_v19 = vld [vmem:[%s1320_s24 + $0x40] ss:$8 sps:$4 sm:$0xff]   ;;  %v1132_v21 = vld [vmem:[%s1320_s24 + $0x54] ss:$8 sps:$4 sm:$0xff]  }
  0x16   : > { %946 = vmatpush3.bf16.msra.mxu0 %v1110_v3  ;;  %1010 = vmatpush3.bf16.msra.mxu1 %v1110_v3  ;;  %v1119_v14 = vld [vmem:[%s1486_s1 + $0x48] sm:$0xff]   ;;  %v1121_v16 = vld [vmem:[%s1486_s1 + $0x40] sm:$0xff]   ;;  %v1131_v22 = vld [vmem:[%s1320_s24 + $0x10] ss:$8 sps:$4 sm:$0xff]   ;;  %s1017_s21 = smul.u32 56, %s175_s14 }
  0x17   : > { %947 = vmatprep.subr.bf16.mxu0 %v1111_v4  ;;  %1003 = vmatprep.subr.bf16.mxu1 %v1111_v4  ;;  %v1120_v15 = vld [vmem:[%s1486_s1 + $0x8] sm:$0xff]   ;;  %v1122_v17 = vld [vmem:[%s1486_s1] sm:$0xff]   ;;  %v1134_v23 = vld [vmem:[%s1320_s24 + $0x50] ss:$8 sps:$4 sm:$0xff]  }
  0x18   : > { %484 = vmatprep.mubr.bf16.mxu1 %v1128_v12  ;;  %v1135_v24 = vld [vmem:[%s1320_s24 + $0x24] ss:$8 sps:$4 sm:$0xff]   ;;  %v1137_v26 = vld [vmem:[%s1320_s24 + $0x20] ss:$8 sps:$4 sm:$0xff]   ;;  %v1141_v28 = vld [vmem:[%s1320_s24 + $0x34] ss:$8 sps:$4 sm:$0xff]  }
  0x19   : > { %v1138_v25 = vld [vmem:[%s1320_s24 + $0x64] ss:$8 sps:$4 sm:$0xff]   ;;  %v1140_v27 = vld [vmem:[%s1320_s24 + $0x60] ss:$8 sps:$4 sm:$0xff]   ;;  %v1143_v29 = vld [vmem:[%s1320_s24 + $0x30] ss:$8 sps:$4 sm:$0xff]  }
  0x1a   : > { %948 = vmatpush3.bf16.msra.mxu0 %v1112_v5  ;;  %1011 = vmatpush3.bf16.msra.mxu1 %v1112_v5  ;;  %v1361_v32 = vld [vmem:[%s1487_s2] ss:$0 sm:$0xff]  ;;  %s1367_s12 = scalar_lea.vmem [#allocation2], %s1017_s21   ;;  %s942_s24 = smul.u32 (%p1281_p4), 56, %s1269_s15 }
  0x1b   : > { %949 = vmatprep.subr.bf16.mxu0 %v1113_v6  ;;  %1004 = vmatprep.subr.bf16.mxu1 %v1113_v6 }
  0x1c   : > { %s1414_s27 = scalar_lea.vmem (%p1281_p4), %s1488_s3, %s942_s24  }
  0x1e   : > { %950 = vmatpush3.bf16.msra.mxu0 %v1114_v7  ;;  %1012 = vmatpush3.bf16.msra.mxu1 %v1114_v7 }
  0x1f   : > { %951 = vmatprep.subr.bf16.mxu0 %v1115_v8  ;;  %1005 = vmatprep.subr.bf16.mxu1 %v1115_v8 }
  0x22   : > { %952 = vmatpush3.bf16.msra.mxu0 %v1116_v9  ;;  %1013 = vmatpush3.bf16.msra.mxu1 %v1116_v9 }
  0x23   : > { %953 = vmatprep.subr.bf16.mxu0 %v1117_v10  ;;  %1006 = vmatprep.subr.bf16.mxu1 %v1117_v10 }
  0x26   : > { %954 = vmatpush3.bf16.msra.mxu0 %v1118_v13  ;;  %1014 = vmatpush3.bf16.msra.mxu1 %v1118_v13 }
  0x27   : > { %955 = vmatprep.subr.bf16.mxu0 %v1119_v14  ;;  %1007 = vmatprep.subr.bf16.mxu1 %v1119_v14 }
  0x2a   : > { %956 = vmatpush3.bf16.msra.mxu0 %v1120_v15  ;;  %1015 = vmatpush3.bf16.msra.mxu1 %v1120_v15 }
  0x2b   : > { %957 = vmatprep.subr.bf16.mxu0 %v1121_v16  ;;  %1008 = vmatprep.subr.bf16.mxu1 %v1121_v16 }
  0x2e   : > { %958 = vmatpush3.bf16.msra.mxu0 %v1122_v17  ;;  %1016 = vmatpush3.bf16.msra.mxu1 %v1122_v17 }
  0x31   : > { %453 = vmatmul.mubr.bf16.vlgmr.msra.gmra.mxu0 %v1123_v18  ;;  %485 = vmatmul.mubr.bf16.vlgmr.msra.gmra.mxu1 %v1126_v19 }
  0x32   : > { %460 = vmatprep.mubr.bf16.mxu0 %v1129_v20  ;;  %492 = vmatprep.mubr.bf16.mxu1 %v1132_v21 }
  0x39   : > { %461 = vmatmul.mubr.bf16.gmra.mxu0 %v1131_v22  ;;  %493 = vmatmul.mubr.bf16.gmra.mxu1 %v1134_v23 }
  0x3a   : > { %468 = vmatprep.mubr.bf16.mxu0 %v1135_v24  ;;  %500 = vmatprep.mubr.bf16.mxu1 %v1138_v25 }
  0x41   : > { %469 = vmatmul.mubr.bf16.gmra.mxu0 %v1137_v26  ;;  %501 = vmatmul.mubr.bf16.gmra.mxu1 %v1140_v27 }
  0x42   : > { %476 = vmatprep.mubr.bf16.mxu0 %v1141_v28 }
  0x49   : > { %477 = vmatmul.mubr.bf16.gmra.mxu0 %v1143_v29 }
  0xf1   : > { %v959_v30 = vpop.f32.mrf.mxu0  ;;  %v983_v31 = vpop.f32.mrf.mxu1 }
  0xf3   : > { %v960_v33 = vpop.f32.mrf.mxu0  ;;  %v984_v34 = vpop.f32.mrf.mxu1 }
  0xf4   : > { %v961_v35 = vadd.f32 %v960_v33, %v959_v30  ;;  %v985_v36 = vadd.f32 %v984_v34, %v983_v31 }
  0xf5   : > { %v962_v37 = vpop.f32.mrf.mxu0  ;;  %v986_v38 = vpop.f32.mrf.mxu1 }
  0xf6   : > { %v455_v39 = vadd.f32 %v961_v35, %v1361_v32  ;;  %v487_v40 = vadd.f32 %v985_v36, %v1361_v32 }
  0xf7   : > { %v963_v41 = vpop.f32.mrf.mxu0  ;;  %v987_v42 = vpop.f32.mrf.mxu1 }
  0xf8   : > { %v509_v43 = vmax.f32 %v455_v39, 0.0  ;;  %v517_v44 = vmax.f32 %v487_v40, 0.0  ;;  %v964_v45 = vadd.f32 %v963_v41, %v962_v37  ;;  %v988_v46 = vadd.f32 %v987_v42, %v986_v38 }
  0xf9   : > { %v965_v47 = vpop.f32.mrf.mxu0  ;;  %v989_v48 = vpop.f32.mrf.mxu1 }
  0xfa   : > { %v928_v49 = vpack.c.bf16 %v509_v43, %v509_v43  ;;  %v936_v50 = vpack.c.bf16 %v517_v44, %v517_v44  ;;  %v458_v51 = vadd.f32 %v964_v45, %v1361_v32  ;;  %v490_v52 = vadd.f32 %v988_v46, %v1361_v32 }
  0xfb   : > { %v966_v53 = vpop.f32.mrf.mxu0  ;;  %v990_v54 = vpop.f32.mrf.mxu1 }
  0xfc   : > { %580 = vst.msk [vmem:[%s1367_s12] sm:$0xf] %vm579_vm0, %v928_v49  ;;  %588 = vst.msk [vmem:[%s1367_s12 + $0x20] sm:$0xf] %vm579_vm0, %v936_v50  ;;  %v510_v55 = vmax.f32 %v458_v51, 0.0  ;;  %v518_v56 = vmax.f32 %v490_v52, 0.0  ;;  %v967_v57 = vadd.f32 %v966_v53, %v965_v47  ;;  %v991_v58 = vadd.f32 %v990_v54, %v989_v48 }
  0xfd   : > { %v968_v59 = vpop.f32.mrf.mxu0  ;;  %v992_v60 = vpop.f32.mrf.mxu1 }
  0xfe   : > { %v929_v61 = vpack.c.bf16 %v510_v55, %v510_v55  ;;  %v937_v62 = vpack.c.bf16 %v518_v56, %v518_v56  ;;  %v463_v63 = vadd.f32 %v967_v57, %v1361_v32  ;;  %v495_v0 = vadd.f32 %v991_v58, %v1361_v32 }
  0xff   : > { %v969_v1 = vpop.f32.mrf.mxu0  ;;  %v993_v2 = vpop.f32.mrf.mxu1 }
 0x100   : > { %581 = vst.msk [vmem:[%s1367_s12 + $0x4] sm:$0xf] %vm579_vm0, %v929_v61  ;;  %589 = vst.msk [vmem:[%s1367_s12 + $0x24] sm:$0xf] %vm579_vm0, %v937_v62  ;;  %v511_v3 = vmax.f32 %v463_v63, 0.0  ;;  %v519_v4 = vmax.f32 %v495_v0, 0.0  ;;  %v970_v5 = vadd.f32 %v969_v1, %v968_v59  ;;  %v994_v6 = vadd.f32 %v993_v2, %v992_v60 }
 0x101   : > { %v971_v7 = vpop.f32.mrf.mxu0  ;;  %v995_v8 = vpop.f32.mrf.mxu1 }
 0x102   : > { %v930_v9 = vpack.c.bf16 %v511_v3, %v511_v3  ;;  %v938_v10 = vpack.c.bf16 %v519_v4, %v519_v4  ;;  %v466_v11 = vadd.f32 %v970_v5, %v1361_v32  ;;  %v498_v12 = vadd.f32 %v994_v6, %v1361_v32 }
 0x103   : > { %v972_v13 = vpop.f32.mrf.mxu0  ;;  %v996_v14 = vpop.f32.mrf.mxu1 }
 0x104   : > { %582 = vst.msk [vmem:[%s1367_s12 + $0x8] sm:$0xf] %vm579_vm0, %v930_v9  ;;  %590 = vst.msk [vmem:[%s1367_s12 + $0x28] sm:$0xf] %vm579_vm0, %v938_v10  ;;  %v512_v15 = vmax.f32 %v466_v11, 0.0  ;;  %v520_v16 = vmax.f32 %v498_v12, 0.0  ;;  %v973_v17 = vadd.f32 %v972_v13, %v971_v7  ;;  %v997_v18 = vadd.f32 %v996_v14, %v995_v8 }
 0x105   : > { %v974_v19 = vpop.f32.mrf.mxu0  ;;  %v998_v20 = vpop.f32.mrf.mxu1 }
 0x106   : > { %v931_v21 = vpack.c.bf16 %v512_v15, %v512_v15  ;;  %v939_v22 = vpack.c.bf16 %v520_v16, %v520_v16  ;;  %v471_v23 = vadd.f32 %v973_v17, %v1361_v32  ;;  %v503_v24 = vadd.f32 %v997_v18, %v1361_v32 }
 0x107   : > { %v975_v25 = vpop.f32.mrf.mxu0  ;;  %v999_v26 = vpop.f32.mrf.mxu1 }
 0x108   : > { %583 = vst.msk [vmem:[%s1367_s12 + $0xc] sm:$0xf] %vm579_vm0, %v931_v21  ;;  %591 = vst.msk [vmem:[%s1367_s12 + $0x2c] sm:$0xf] %vm579_vm0, %v939_v22  ;;  %v513_v27 = vmax.f32 %v471_v23, 0.0  ;;  %v521_v28 = vmax.f32 %v503_v24, 0.0  ;;  %v976_v29 = vadd.f32 %v975_v25, %v974_v19  ;;  %v1000_v30 = vadd.f32 %v999_v26, %v998_v20 }
 0x109   : > { %v977_v31 = vpop.f32.mrf.mxu0 }
 0x10a   : > { %v932_v33 = vpack.c.bf16 %v513_v27, %v513_v27  ;;  %v940_v34 = vpack.c.bf16 %v521_v28, %v521_v28  ;;  %v474_v35 = vadd.f32 %v976_v29, %v1361_v32  ;;  %v506_v36 = vadd.f32 %v1000_v30, %v1361_v32 }
 0x10b   : > { %v978_v37 = vpop.f32.mrf.mxu0 }
 0x10c   : > { %584 = vst.msk [vmem:[%s1367_s12 + $0x10] sm:$0xf] %vm579_vm0, %v932_v33  ;;  %592 = vst.msk [vmem:[%s1367_s12 + $0x30] sm:$0xf] %vm579_vm0, %v940_v34  ;;  %v514_v38 = vmax.f32 %v474_v35, 0.0  ;;  %v522_v39 = vmax.f32 %v506_v36, 0.0  ;;  %v979_v40 = vadd.f32 %v978_v37, %v977_v31 }
 0x10d   : > { %v980_v41 = vpop.f32.mrf.mxu0 }
 0x10e   : > { %v933_v42 = vpack.c.bf16 %v514_v38, %v514_v38  ;;  %v941_v43 = vpack.c.bf16 %v522_v39, %v522_v39  ;;  %v479_v44 = vadd.f32 %v979_v40, %v1361_v32 }
 0x10f   : > { %v981_v45 = vpop.f32.mrf.mxu0 }
 0x110   : > { %585 = vst.msk [vmem:[%s1367_s12 + $0x14] sm:$0xf] %vm579_vm0, %v933_v42  ;;  %593 = vst.msk [vmem:[%s1367_s12 + $0x34] sm:$0xf] %vm579_vm0, %v941_v43  ;;  %v515_v46 = vmax.f32 %v479_v44, 0.0  ;;  %v982_v47 = vadd.f32 %v981_v45, %v980_v41 }
 0x112   : > { %v934_v48 = vpack.c.bf16 %v515_v46, %v515_v46  ;;  %v482_v49 = vadd.f32 %v982_v47, %v1361_v32 }
 0x114   : > { %586 = vst.msk [vmem:[%s1367_s12 + $0x18] sm:$0xf] %vm579_vm0, %v934_v48  ;;  %v516_v50 = vmax.f32 %v482_v49, 0.0  ;;  %600 = sbr.rel (!%p1281_p4) target bundleno = 344 (0x158), region = 36 }
 0x116   : > { %v935_v51 = vpack.c.bf16 %v516_v50, %v516_v50 }
 0x118   : > { %587 = vst.msk [vmem:[%s1367_s12 + $0x1c] sm:$0xf] %vm579_vm0, %v935_v51 }
 0x119   : > { %s1497_s22 = smov (!%p603_p8, %s602_s22), 14 }
 0x11a   : > { %s915_s28 = sshll.u32 %s1497_s22, 6 }
 0x11b   : > { %p918_p9 = scmp.eq.s32.totalorder %s915_s28, 0 }
 0x11c   : > { %1144 = sdivrem.u32 (!%p918_p9), %s1497_s22, 14 }
 0x11d   : > { %611 = sbr.rel (%p918_p9) target bundleno = 344 (0x158), region = 40 }
 0x125   : > { %s1420_s20 = spop.drf %1144 }
 0x126   : > { %p919_p10 = scmp.le.s32.totalorder %s1420_s20, 0 }
 0x127   : > { %s1490_s15 = smov (!%p919_p10), %s1414_s27  ;;  %s1491_s23 = smov (!%p919_p10), %s1367_s12 }
 0x128   : > { %820 = sbr.rel (%p919_p10) target bundleno = 319 (0x13f), region = 112  ;;  %s1429_s29 = smov (!%p919_p10), 0  }
 0x129   : > { %s1431_s30 = smov (!%p919_p10), 0  }
 0x12d LB: >> { %v629_v32 = vld [vmem:[%s1210_s23] sm:$0xf]  ;;  %v631_v52 = vld [vmem:[%s1210_s23 + $0x4] sm:$0xf]  ;;  %v633_v53 = vld [vmem:[%s1210_s23 + $0x8] sm:$0xf]  ;;  %s1218_s30 = sphi %s1431_s30, %s623_s30   ;;  %s1214_s29 = sphi %s1429_s29, %s1492_s29   ;;  %s1210_s23 = sphi %s1491_s23, %s662_s23   ;;  %s1206_s15 = sphi %s1490_s15, %s663_s15  }
 0x12e   : >> { %630 = vst [vmem:[%s1206_s15] sm:$0xf] %v629_v32  ;;  %632 = vst [vmem:[%s1206_s15 + $0x4] sm:$0xf] %v631_v52  ;;  %v635_v54 = vld [vmem:[%s1210_s23 + $0xc] sm:$0xf]  ;;  %s657_s4 = sadd.s32 1, %s1214_s29 }
 0x12f   : >> { %634 = vst [vmem:[%s1206_s15 + $0x8] sm:$0xf] %v633_v53  ;;  %v637_v55 = vld [vmem:[%s1210_s23 + $0x10] sm:$0xf]  ;;  %v639_v56 = vld [vmem:[%s1210_s23 + $0x14] sm:$0xf]  ;;  %p658_p11 = scmp.ge.s32.totalorder %s657_s4, %s1420_s20 }
 0x130   : >> { %636 = vst [vmem:[%s1206_s15 + $0xc] sm:$0xf] %v635_v54  ;;  %638 = vst [vmem:[%s1206_s15 + $0x10] sm:$0xf] %v637_v55  ;;  %v641_v57 = vld [vmem:[%s1210_s23 + $0x18] sm:$0xf] }
 0x131   : >> { %640 = vst [vmem:[%s1206_s15 + $0x14] sm:$0xf] %v639_v56  ;;  %v643_v58 = vld [vmem:[%s1210_s23 + $0x1c] sm:$0xf]  ;;  %v645_v59 = vld [vmem:[%s1210_s23 + $0x20] sm:$0xf] }
 0x132   : >> { %642 = vst [vmem:[%s1206_s15 + $0x18] sm:$0xf] %v641_v57  ;;  %644 = vst [vmem:[%s1206_s15 + $0x1c] sm:$0xf] %v643_v58  ;;  %v647_v60 = vld [vmem:[%s1210_s23 + $0x24] sm:$0xf] }
 0x133   : >> { %646 = vst [vmem:[%s1206_s15 + $0x20] sm:$0xf] %v645_v59  ;;  %v649_v61 = vld [vmem:[%s1210_s23 + $0x28] sm:$0xf]  ;;  %v651_v62 = vld [vmem:[%s1210_s23 + $0x2c] sm:$0xf] }
 0x134   : >> { %648 = vst [vmem:[%s1206_s15 + $0x24] sm:$0xf] %v647_v60  ;;  %650 = vst [vmem:[%s1206_s15 + $0x28] sm:$0xf] %v649_v61  ;;  %v653_v63 = vld [vmem:[%s1210_s23 + $0x30] sm:$0xf] }
 0x135   : >> { %652 = vst [vmem:[%s1206_s15 + $0x2c] sm:$0xf] %v651_v62  ;;  %v655_v0 = vld [vmem:[%s1210_s23 + $0x34] sm:$0xf]  ;;  %654 = vst [vmem:[%s1206_s15 + $0x30] sm:$0xf] %v653_v63 }
 0x136   : >> { %656 = vst [vmem:[%s1206_s15 + $0x34] sm:$0xf] %v655_v0  ;;  %s1499_s4 = smov (%p658_p11, %s657_s4), 0  ;;  %s623_s30 = sadd.s32 1, %s1218_s30  }
 0x137   : >> { %s660_s5 = smul.u32 56, %s1499_s4  ;;  %p622_p12 = scmp.ge.s32.totalorder %s623_s30, %s1420_s20 }
 0x138   : >> { %s1492_s29 = smov %s1499_s4 }
 0x139   : >> { %s662_s23 = scalar_lea.vmem %s1367_s12, %s660_s5 [#allocation2]   ;;  %s663_s15 = scalar_lea.vmem %s1414_s27, %s660_s5  }
 0x13a   : > { %625 = sbr.rel (!%p622_p12) target bundleno = 301 (0x12d), region = 118 }
 0x13f PF: > { %1146 = sdivrem.u32 %s1497_s22, 14 }
 0x140   : > { %s920_s6 = smul.u32 56, %s1420_s20 }
 0x142   : > { %s668_s7 = scalar_lea.vmem %s1367_s12, %s920_s6 [#allocation2]   ;;  %s670_s8 = scalar_lea.vmem %s1414_s27, %s920_s6  }
 0x148   : > { %s1147_s9 = spop.drf %1146 }
 0x149   : > { %p922_p13 = scmp.le.s32.totalorder %s1147_s9, 0 }
 0x14a   : > { %s1220_s10 = smov (!%p922_p13), %s670_s8   ;;  %s1224_s11 = smov (!%p922_p13), %s668_s7  }
 0x14b   : > { %834 = sbr.rel (%p922_p13) target bundleno = 344 (0x158), region = 123  ;;  %s1228_s14 = smov (!%p922_p13), 0  }
 0x14c   : > { %s1232_s17 = smov (!%p922_p13), 0  }
 0x150 LB: >> { %v680_v1 = vld [vmem:[%s1226_s11] sm:$0xf]  ;;  %s682_s18 = sadd.s32 1, %s1230_s14  ;;  %s674_s17 = sadd.s32 1, %s1234_s17   ;;  %s1234_s17 = sphi %s1232_s17, %s674_s17   ;;  %s1230_s14 = sphi %s1228_s14, %s1229_s14   ;;  %s1226_s11 = sphi %s1224_s11, %s687_s11   ;;  %s1222_s10 = sphi %s1220_s10, %s688_s10  }
 0x151   : >> { %681 = vst [vmem:[%s1222_s10] sm:$0xf] %v680_v1  ;;  %p683_p0 = scmp.ge.s32.totalorder %s682_s18, %s1147_s9  ;;  %p673_p1 = scmp.ge.s32.totalorder %s674_s17, %s1147_s9 }
 0x153   : >> { %s1501_s18 = smov (%p683_p0, %s682_s18), 0  ;;  %676 = sbr.rel (!%p673_p1) target bundleno = 336 (0x150), region = 129 }
 0x154   : >> { %s923_s21 = sshll.u32 %s1501_s18, 2  ;;  %s1229_s14 = smov %s1501_s18  }
 0x155   : >> { %s687_s11 = scalar_lea.vmem %s668_s7, %s923_s21 [#allocation2]   ;;  %s688_s10 = scalar_lea.vmem %s670_s8, %s923_s21  }
 0x158 PF: > { %p10_p2 = scmp.ge.s32.totalorder %s1271_s16, 4   ;;  %s1493_s12 = smov %s1198_s13 }
 0x159   : > { %s1494_s13 = smov %s1279_s19  ;;  %s1495_s14 = smov %s1271_s16 }
 0x15a   :  { %12 = sbr.rel (!%p10_p2) target bundleno = 2 (0x2), region = 140 }

// kernel: deep_q_network_forward.5
= control target key start
LH: loop header
LB: loop body
LE: loop exit
PB: predicated region body
PF: predicated region fallthrough
CT: control target
= control target key end

     0   :  { %10 = vsyncpa [#allocation3], 0  ;;  %v456_v38 = vlaneseq  ;;  %v4862_v39 = vmov 1966171168   ;;  %vm3721_vm0 = vcmask 31744   ;;  %s6379_s0 = inlined_call_operand.vmem [shape: bf16[2,3200], index: 0, kind: input, shape index: {}]   ;;  %s6380_s1 = inlined_call_operand.vmem [shape: bf16[3200,256], index: 1, kind: input, shape index: {}]   ;;  %s6381_s2 = inlined_call_operand.vmem [shape: f32[1,256], index: 2, kind: input, shape index: {}]   ;;  %s6382_s3 = inlined_call_operand.vmem [shape: bf16[256,4], index: 3, kind: input, shape index: {}]   ;;  %s6383_s4 = inlined_call_operand.vmem [shape: f32[1,4], index: 4, kind: input, shape index: {}]   ;;  %s6384_s5 = inlined_call_operand.hbm [shape: f32[2,4], index: 5, kind: output, shape index: {}]  }
   0x1   :  { %v4184_v0 = vld [vmem:[%s6380_s1 + $0x74] ss:$8 sps:$4 sm:$0xff]   ;;  %v4186_v1 = vld [vmem:[%s6380_s1 + $0x70] ss:$8 sps:$4 sm:$0xff]   ;;  %v4190_v4 = vld [vmem:[%s6380_s1 + $0x64] ss:$8 sps:$4 sm:$0xff]   ;;  %v507_v40 = vunpack.c.l.s4 %v4862_v39 }
   0x2   :  { %v4187_v2 = vld [vmem:[%s6380_s1 + $0x174] ss:$8 sps:$4 sm:$0xff]   ;;  %v4189_v3 = vld [vmem:[%s6380_s1 + $0x170] ss:$8 sps:$4 sm:$0xff]   ;;  %2980 = vmatprep.subr.bf16.mxu0 %v4184_v0  ;;  %v4192_v5 = vld [vmem:[%s6380_s1 + $0x60] ss:$8 sps:$4 sm:$0xff]  }
   0x3   :  { %2981 = vmatpush1.bf16.msra.mxu0 %v4186_v1  ;;  %3023 = vmatprep.subr.bf16.mxu1 %v4187_v2  ;;  %v4193_v6 = vld [vmem:[%s6380_s1 + $0x164] ss:$8 sps:$4 sm:$0xff]   ;;  %v4195_v7 = vld [vmem:[%s6380_s1 + $0x160] ss:$8 sps:$4 sm:$0xff]   ;;  %v4196_v8 = vld [vmem:[%s6380_s1 + $0x54] ss:$8 sps:$4 sm:$0xff]   ;;  %v508_v46 = vunpack.c.0.s8 %v507_v40 }
   0x4   :  { %3024 = vmatpush1.bf16.msra.mxu1 %v4189_v3  ;;  %2982 = vmatprep.subr.bf16.mxu0 %v4190_v4  ;;  %v4199_v9 = vld [vmem:[%s6380_s1 + $0x154] ss:$8 sps:$4 sm:$0xff]   ;;  %v4198_v10 = vld [vmem:[%s6380_s1 + $0x50] ss:$8 sps:$4 sm:$0xff]   ;;  %v4202_v12 = vld [vmem:[%s6380_s1 + $0x44] ss:$8 sps:$4 sm:$0xff]  }
   0x5   :  { %3025 = vmatprep.subr.bf16.mxu1 %v4193_v6  ;;  %v4201_v11 = vld [vmem:[%s6380_s1 + $0x150] ss:$8 sps:$4 sm:$0xff]   ;;  %v4205_v13 = vld [vmem:[%s6380_s1 + $0x144] ss:$8 sps:$4 sm:$0xff]   ;;  %v4204_v14 = vld [vmem:[%s6380_s1 + $0x40] ss:$8 sps:$4 sm:$0xff]  }
   0x6   :  { %v4207_v15 = vld [vmem:[%s6380_s1 + $0x140] ss:$8 sps:$4 sm:$0xff]   ;;  %v4208_v16 = vld [vmem:[%s6380_s1 + $0x34] ss:$8 sps:$4 sm:$0xff]   ;;  %v4210_v18 = vld [vmem:[%s6380_s1 + $0x30] ss:$8 sps:$4 sm:$0xff]  }
   0x7   :  { %2983 = vmatpush1.bf16.msra.mxu0 %v4192_v5  ;;  %v4211_v17 = vld [vmem:[%s6380_s1 + $0x134] ss:$8 sps:$4 sm:$0xff]   ;;  %v4213_v19 = vld [vmem:[%s6380_s1 + $0x130] ss:$8 sps:$4 sm:$0xff]   ;;  %v4214_v20 = vld [vmem:[%s6380_s1 + $0x24] ss:$8 sps:$4 sm:$0xff]  }
   0x8   :  { %3026 = vmatpush1.bf16.msra.mxu1 %v4195_v7  ;;  %2984 = vmatprep.subr.bf16.mxu0 %v4196_v8  ;;  %v4217_v21 = vld [vmem:[%s6380_s1 + $0x124] ss:$8 sps:$4 sm:$0xff]   ;;  %v4216_v22 = vld [vmem:[%s6380_s1 + $0x20] ss:$8 sps:$4 sm:$0xff]   ;;  %v4220_v24 = vld [vmem:[%s6380_s1 + $0x14] ss:$8 sps:$4 sm:$0xff]  }
   0x9   :  { %3027 = vmatprep.subr.bf16.mxu1 %v4199_v9  ;;  %v4219_v23 = vld [vmem:[%s6380_s1 + $0x120] ss:$8 sps:$4 sm:$0xff]   ;;  %v4223_v25 = vld [vmem:[%s6380_s1 + $0x114] ss:$8 sps:$4 sm:$0xff]   ;;  %v4222_v26 = vld [vmem:[%s6380_s1 + $0x10] ss:$8 sps:$4 sm:$0xff]  }
   0xa   :  { %v4225_v27 = vld [vmem:[%s6380_s1 + $0x110] ss:$8 sps:$4 sm:$0xff]   ;;  %v4226_v28 = vld [vmem:[%s6380_s1 + $0x4] ss:$8 sps:$4 sm:$0xff]   ;;  %v4228_v30 = vld [vmem:[%s6380_s1] ss:$8 sps:$4 sm:$0xff]  }
   0xb   :  { %2985 = vmatpush1.bf16.msra.mxu0 %v4198_v10  ;;  %v4229_v29 = vld [vmem:[%s6380_s1 + $0x104] ss:$8 sps:$4 sm:$0xff]   ;;  %v4231_v31 = vld [vmem:[%s6380_s1 + $0x100] ss:$8 sps:$4 sm:$0xff]   ;;  %v4232_v32 = vld [vmem:[%s6380_s1 + $0xf4] ss:$8 sps:$4 sm:$0xff]  }
   0xc   :  { %3028 = vmatpush1.bf16.msra.mxu1 %v4201_v11  ;;  %2986 = vmatprep.subr.bf16.mxu0 %v4202_v12  ;;  %v4235_v33 = vld [vmem:[%s6380_s1 + $0x1f4] ss:$8 sps:$4 sm:$0xff]   ;;  %v4234_v34 = vld [vmem:[%s6380_s1 + $0xf0] ss:$8 sps:$4 sm:$0xff]   ;;  %v4238_v36 = vld [vmem:[%s6380_s1 + $0xe4] ss:$8 sps:$4 sm:$0xff]  }
   0xd   :  { %3029 = vmatprep.subr.bf16.mxu1 %v4205_v13  ;;  %v4237_v35 = vld [vmem:[%s6380_s1 + $0x1f0] ss:$8 sps:$4 sm:$0xff]   ;;  %v4241_v37 = vld [vmem:[%s6380_s1 + $0x1e4] ss:$8 sps:$4 sm:$0xff]   ;;  %v4240_v41 = vld [vmem:[%s6380_s1 + $0xe0] ss:$8 sps:$4 sm:$0xff]  }
   0xe   :  { %v4243_v42 = vld [vmem:[%s6380_s1 + $0x1e0] ss:$8 sps:$4 sm:$0xff]   ;;  %v4244_v43 = vld [vmem:[%s6380_s1 + $0xd4] ss:$8 sps:$4 sm:$0xff]   ;;  %v5023_v45 = vshrl.u32 %v456_v38, 7 }
   0xf   :  { %2987 = vmatpush1.bf16.msra.mxu0 %v4204_v14  ;;  %v4247_v44 = vld [vmem:[%s6380_s1 + $0x1d4] ss:$8 sps:$4 sm:$0xff]   ;;  %v4246_v47 = vld [vmem:[%s6380_s1 + $0xd0] ss:$8 sps:$4 sm:$0xff]   ;;  %v4250_v49 = vld [vmem:[%s6380_s1 + $0xc4] ss:$8 sps:$4 sm:$0xff]  }
  0x10   :  { %3030 = vmatpush1.bf16.msra.mxu1 %v4207_v15  ;;  %2988 = vmatprep.subr.bf16.mxu0 %v4208_v16  ;;  %v4249_v48 = vld [vmem:[%s6380_s1 + $0x1d0] ss:$8 sps:$4 sm:$0xff]   ;;  %v4252_v50 = vld [vmem:[%s6380_s1 + $0xc0] ss:$8 sps:$4 sm:$0xff]   ;;  %v4253_v51 = vld [vmem:[%s6380_s1 + $0x1c4] ss:$8 sps:$4 sm:$0xff]   ;;  %v5044_v53 = vsub.s32 %v508_v46, %v5023_v45 }
  0x11   :  { %3031 = vmatprep.subr.bf16.mxu1 %v4211_v17  ;;  %v4255_v52 = vld [vmem:[%s6380_s1 + $0x1c0] ss:$8 sps:$4 sm:$0xff]   ;;  %v4256_v54 = vld [vmem:[%s6380_s1 + $0xb4] ss:$8 sps:$4 sm:$0xff]   ;;  %v4258_v56 = vld [vmem:[%s6380_s1 + $0xb0] ss:$8 sps:$4 sm:$0xff]  }
  0x12   :  { %v4279_v55 = vld [vmem:[%s6379_s0] ss:$25 sps:$4 sm:$0xff]   ;;  %v4282_v58 = vld [vmem:[%s6379_s0 + $0x32] ss:$25 sps:$4 sm:$0xff]  }
  0x13   :  { %2989 = vmatpush1.bf16.msra.mxu0 %v4210_v18  ;;  %v4259_v57 = vld [vmem:[%s6380_s1 + $0x1b4] ss:$8 sps:$4 sm:$0xff]   ;;  %v4261_v60 = vld [vmem:[%s6380_s1 + $0x1b0] ss:$8 sps:$4 sm:$0xff]   ;;  %v4262_v61 = vld [vmem:[%s6380_s1 + $0xa4] ss:$8 sps:$4 sm:$0xff]   ;;  %v512_v63 = vrot.slane %v4279_v55, %v5044_v53  ;;  %v526_v1 = vrot.slane %v4282_v58, %v5044_v53 }
  0x14   :  { %3032 = vmatpush1.bf16.msra.mxu1 %v4213_v19  ;;  %2990 = vmatprep.subr.bf16.mxu0 %v4214_v20  ;;  %v4285_v59 = vld [vmem:[%s6379_s0 + $0x64] ss:$25 sps:$4 sm:$0xff]   ;;  %v4288_v62 = vld [vmem:[%s6379_s0 + $0x96] ss:$25 sps:$4 sm:$0xff]  }
  0x15   :  { %3033 = vmatprep.subr.bf16.mxu1 %v4217_v21  ;;  %v4265_v0 = vld [vmem:[%s6380_s1 + $0x1a4] ss:$8 sps:$4 sm:$0xff]   ;;  %v540_v2 = vrot.slane %v4285_v59, %v5044_v53  ;;  %v554_v5 = vrot.slane %v4288_v62, %v5044_v53  ;;  %v4290_v7 = vld [vmem:[%s6379_s0 + $0x9a] ss:$25 sps:$4 sm:$0xff]   ;;  %v563_v8 = vcombine.high %v512_v63, %v526_v1  ;;  %v4264_v10 = vld [vmem:[%s6380_s1 + $0xa0] ss:$8 sps:$4 sm:$0xff]   ;;  %v562_v21 = vcombine.low %v512_v63, %v526_v1 }
  0x16   :  { %v4281_v3 = vld [vmem:[%s6379_s0 + $0x4] ss:$25 sps:$4 sm:$0xff]   ;;  %v4284_v4 = vld [vmem:[%s6379_s0 + $0x36] ss:$25 sps:$4 sm:$0xff]   ;;  %v5116_v19 = vrot.slane %v4290_v7, %v5044_v53 }
  0x17   :  { %2991 = vmatpush1.bf16.msra.mxu0 %v4216_v22  ;;  %v4287_v6 = vld [vmem:[%s6379_s0 + $0x68] ss:$25 sps:$4 sm:$0xff]   ;;  %v567_v9 = vcombine.high %v540_v2, %v554_v5  ;;  %v590_v11 = vrot.slane %v563_v8, %v5044_v53  ;;  %v4268_v13 = vld [vmem:[%s6380_s1 + $0x94] ss:$8 sps:$4 sm:$0xff]   ;;  %v5107_v16 = vrot.slane %v4281_v3, %v5044_v53  ;;  %v5110_v17 = vrot.slane %v4284_v4, %v5044_v53  ;;  %v4292_v39 = vld [vmem:[%s6380_s1 + $0x270] ss:$8 sps:$4 sm:$0xff]  }
  0x18   :  { %3034 = vmatpush1.bf16.msra.mxu1 %v4219_v23  ;;  %2992 = vmatprep.subr.bf16.mxu0 %v4220_v24  ;;  %v4267_v12 = vld [vmem:[%s6380_s1 + $0x1a0] ss:$8 sps:$4 sm:$0xff]   ;;  %v4271_v15 = vld [vmem:[%s6380_s1 + $0x194] ss:$8 sps:$4 sm:$0xff]   ;;  %v5113_v18 = vrot.slane %v4287_v6, %v5044_v53  ;;  %v566_v22 = vcombine.low %v540_v2, %v554_v5  ;;  %v4270_v24 = vld [vmem:[%s6380_s1 + $0x90] ss:$8 sps:$4 sm:$0xff]  }
  0x19   :  { %3035 = vmatprep.subr.bf16.mxu1 %v4223_v25  ;;  %v618_v14 = vrot.slane %v567_v9, %v5044_v53  ;;  %v4273_v25 = vld [vmem:[%s6380_s1 + $0x190] ss:$8 sps:$4 sm:$0xff]   ;;  %v4315_v55 = vld [vmem:[%s6380_s1 + $0x344] ss:$8 sps:$4 sm:$0xff]   ;;  %v4318_v58 = vld [vmem:[%s6380_s1 + $0x234] ss:$8 sps:$4 sm:$0xff]  }
  0x1a   :  { %v4321_v59 = vld [vmem:[%s6380_s1 + $0x334] ss:$8 sps:$4 sm:$0xff]   ;;  %v4324_v62 = vld [vmem:[%s6380_s1 + $0x224] ss:$8 sps:$4 sm:$0xff]   ;;  %v4325_v1 = vld [vmem:[%s6380_s1 + $0x320] ss:$8 sps:$4 sm:$0xff]  }
  0x1b   :  { %2993 = vmatpush1.bf16.msra.mxu0 %v4222_v26  ;;  %v630_v20 = vcombine.low %v590_v11, %v618_v14  ;;  %v631_v23 = vcombine.high %v590_v11, %v618_v14  ;;  %v4274_v26 = vld [vmem:[%s6380_s1 + $0x84] ss:$8 sps:$4 sm:$0xff]   ;;  %v4330_v2 = vld [vmem:[%s6380_s1 + $0x214] ss:$8 sps:$4 sm:$0xff]   ;;  %v4328_v4 = vld [vmem:[%s6380_s1 + $0x210] ss:$8 sps:$4 sm:$0xff]  }
  0x1c   :  { %3036 = vmatpush1.bf16.msra.mxu1 %v4225_v27  ;;  %2994 = vmatprep.subr.bf16.mxu0 %v4226_v28  ;;  %v4277_v27 = vld [vmem:[%s6380_s1 + $0x184] ss:$8 sps:$4 sm:$0xff]   ;;  %v565_v28 = vcombine.high %v5107_v16, %v5110_v17  ;;  %v4333_v3 = vld [vmem:[%s6380_s1 + $0x314] ss:$8 sps:$4 sm:$0xff]   ;;  %v4331_v5 = vld [vmem:[%s6380_s1 + $0x310] ss:$8 sps:$4 sm:$0xff]  }
  0x1d   :  { %3037 = vmatprep.subr.bf16.mxu1 %v4229_v29  ;;  %3012 = vmatprep.mubr.bf16.mxu0 %v630_v20  ;;  %v569_v29 = vcombine.high %v5113_v18, %v5116_v19  ;;  %v4327_v63 = vld [vmem:[%s6380_s1 + $0x324] ss:$8 sps:$4 sm:$0xff]   ;;  %v4334_v8 = vld [vmem:[%s6380_s1 + $0x200] ss:$8 sps:$4 sm:$0xff]   ;;  %v4345_v11 = vld [vmem:[%s6380_s1 + $0x3f4] ss:$8 sps:$4 sm:$0xff]  }
  0x1e   :  { %3055 = vmatprep.mubr.bf16.mxu1 %v631_v23  ;;  %v4336_v6 = vld [vmem:[%s6380_s1 + $0x204] ss:$8 sps:$4 sm:$0xff]   ;;  %v4337_v9 = vld [vmem:[%s6380_s1 + $0x300] ss:$8 sps:$4 sm:$0xff]   ;;  %v4357_v23 = vld [vmem:[%s6380_s1 + $0x3d4] ss:$8 sps:$4 sm:$0xff]  }
  0x1f   :  { %2995 = vmatpush1.bf16.msra.mxu0 %v4228_v30  ;;  %v576_v30 = vrot.slane %v562_v21, %v5044_v53  ;;  %v4339_v7 = vld [vmem:[%s6380_s1 + $0x304] ss:$8 sps:$4 sm:$0xff]   ;;  %v4346_v20 = vld [vmem:[%s6380_s1 + $0x2e0] ss:$8 sps:$4 sm:$0xff]  }
  0x20   :  { %3038 = vmatpush1.bf16.msra.mxu1 %v4231_v31  ;;  %2996 = vmatprep.subr.bf16.mxu0 %v4232_v32  ;;  %v604_v31 = vrot.slane %v566_v22, %v5044_v53  ;;  %v4276_v32 = vld [vmem:[%s6380_s1 + $0x80] ss:$8 sps:$4 sm:$0xff]   ;;  %v4348_v14 = vld [vmem:[%s6380_s1 + $0x2e4] ss:$8 sps:$4 sm:$0xff]   ;;  %v4354_v22 = vld [vmem:[%s6380_s1 + $0x2d4] ss:$8 sps:$4 sm:$0xff]  }
  0x21   :  { %3039 = vmatprep.subr.bf16.mxu1 %v4235_v33  ;;  %v4291_v33 = vld [vmem:[%s6380_s1 + $0x180] ss:$8 sps:$4 sm:$0xff]  }
  0x22   :  { %v626_v38 = vcombine.low %v576_v30, %v604_v31  ;;  %v627_v40 = vcombine.high %v576_v30, %v604_v31  ;;  %v4349_v21 = vld [vmem:[%s6380_s1 + $0x3e0] ss:$8 sps:$4 sm:$0xff]   ;;  %v4366_v30 = vld [vmem:[%s6380_s1 + $0x2b4] ss:$8 sps:$4 sm:$0xff]  }
  0x23   :  { %2997 = vmatpush2.bf16.msra.mxu0 %v4234_v34  ;;  %v4294_v34 = vld [vmem:[%s6380_s1 + $0x274] ss:$8 sps:$4 sm:$0xff]  }
  0x24   :  { %3040 = vmatpush2.bf16.msra.mxu1 %v4237_v35  ;;  %2998 = vmatprep.subr.bf16.mxu0 %v4238_v36  ;;  %v4297_v35 = vld [vmem:[%s6380_s1 + $0x374] ss:$8 sps:$4 sm:$0xff]   ;;  %v597_v36 = vrot.slane %v565_v28, %v5044_v53  ;;  %v4358_v28 = vld [vmem:[%s6380_s1 + $0x2c0] ss:$8 sps:$4 sm:$0xff]  }
  0x25   :  { %3041 = vmatprep.subr.bf16.mxu1 %v4241_v37  ;;  %v625_v37 = vrot.slane %v569_v29, %v5044_v53  ;;  %v4361_v29 = vld [vmem:[%s6380_s1 + $0x3c0] ss:$8 sps:$4 sm:$0xff]   ;;  %v4369_v31 = vld [vmem:[%s6380_s1 + $0x3b4] ss:$8 sps:$4 sm:$0xff]  }
  0x27   :  { %2999 = vmatpush2.bf16.msra.mxu0 %v4240_v41  ;;  %v4295_v41 = vld [vmem:[%s6380_s1 + $0x370] ss:$8 sps:$4 sm:$0xff]   ;;  %v633_v46 = vcombine.high %v597_v36, %v625_v37 }
  0x28   :  { %3042 = vmatpush2.bf16.msra.mxu1 %v4243_v42  ;;  %3000 = vmatprep.subr.bf16.mxu0 %v4244_v43  ;;  %v4300_v42 = vld [vmem:[%s6380_s1 + $0x264] ss:$8 sps:$4 sm:$0xff]  }
  0x29   :  { %3043 = vmatprep.subr.bf16.mxu1 %v4247_v44  ;;  %v4303_v43 = vld [vmem:[%s6380_s1 + $0x364] ss:$8 sps:$4 sm:$0xff]   ;;  %v632_v44 = vcombine.low %v597_v36, %v625_v37  ;;  %v4370_v36 = vld [vmem:[%s6380_s1 + $0x2a0] ss:$8 sps:$4 sm:$0xff]  }
  0x2a   :  { %v4373_v37 = vld [vmem:[%s6380_s1 + $0x3a0] ss:$8 sps:$4 sm:$0xff]  }
  0x2b   :  { %3001 = vmatpush2.bf16.msra.mxu0 %v4246_v47  ;;  %v4298_v47 = vld [vmem:[%s6380_s1 + $0x260] ss:$8 sps:$4 sm:$0xff]  }
  0x2c   :  { %3044 = vmatpush2.bf16.msra.mxu1 %v4249_v48  ;;  %3002 = vmatprep.subr.bf16.mxu0 %v4250_v49  ;;  %v4301_v48 = vld [vmem:[%s6380_s1 + $0x360] ss:$8 sps:$4 sm:$0xff]   ;;  %v4306_v49 = vld [vmem:[%s6380_s1 + $0x254] ss:$8 sps:$4 sm:$0xff]  }
  0x2d   :  { %3045 = vmatprep.subr.bf16.mxu1 %v4253_v51  ;;  %v4304_v51 = vld [vmem:[%s6380_s1 + $0x250] ss:$8 sps:$4 sm:$0xff]  }
  0x2f   :  { %3003 = vmatpush2.bf16.msra.mxu0 %v4252_v50  ;;  %v4309_v50 = vld [vmem:[%s6380_s1 + $0x354] ss:$8 sps:$4 sm:$0xff]  }
  0x30   :  { %3046 = vmatpush2.bf16.msra.mxu1 %v4255_v52  ;;  %3004 = vmatprep.subr.bf16.mxu0 %v4256_v54  ;;  %v4307_v52 = vld [vmem:[%s6380_s1 + $0x350] ss:$8 sps:$4 sm:$0xff]   ;;  %v4312_v54 = vld [vmem:[%s6380_s1 + $0x244] ss:$8 sps:$4 sm:$0xff]  }
  0x31   :  { %3047 = vmatprep.subr.bf16.mxu1 %v4259_v57  ;;  %v4313_v57 = vld [vmem:[%s6380_s1 + $0x340] ss:$8 sps:$4 sm:$0xff]  }
  0x33   :  { %3005 = vmatpush2.bf16.msra.mxu0 %v4258_v56  ;;  %v4310_v56 = vld [vmem:[%s6380_s1 + $0x240] ss:$8 sps:$4 sm:$0xff]  }
  0x34   :  { %3048 = vmatpush2.bf16.msra.mxu1 %v4261_v60  ;;  %3006 = vmatprep.subr.bf16.mxu0 %v4262_v61  ;;  %v4316_v60 = vld [vmem:[%s6380_s1 + $0x230] ss:$8 sps:$4 sm:$0xff]  }
  0x35   :  { %3049 = vmatprep.subr.bf16.mxu1 %v4265_v0  ;;  %v4319_v61 = vld [vmem:[%s6380_s1 + $0x330] ss:$8 sps:$4 sm:$0xff]   ;;  %v4322_v0 = vld [vmem:[%s6380_s1 + $0x220] ss:$8 sps:$4 sm:$0xff]  }
  0x37   :  { %3007 = vmatpush2.bf16.msra.mxu0 %v4264_v10  ;;  %v4342_v10 = vld [vmem:[%s6380_s1 + $0x2f4] ss:$8 sps:$4 sm:$0xff]  }
  0x38   :  { %3050 = vmatpush2.bf16.msra.mxu1 %v4267_v12  ;;  %3008 = vmatprep.subr.bf16.mxu0 %v4268_v13  ;;  %v4340_v12 = vld [vmem:[%s6380_s1 + $0x2f0] ss:$8 sps:$4 sm:$0xff]  }
  0x39   :  { %3051 = vmatprep.subr.bf16.mxu1 %v4271_v15  ;;  %v4343_v13 = vld [vmem:[%s6380_s1 + $0x3f0] ss:$8 sps:$4 sm:$0xff]   ;;  %v4351_v15 = vld [vmem:[%s6380_s1 + $0x3e4] ss:$8 sps:$4 sm:$0xff]  }
  0x3b   :  { %3009 = vmatpush2.bf16.msra.mxu0 %v4270_v24  ;;  %v4352_v24 = vld [vmem:[%s6380_s1 + $0x2d0] ss:$8 sps:$4 sm:$0xff]  }
  0x3c   :  { %3052 = vmatpush2.bf16.msra.mxu1 %v4273_v25  ;;  %3010 = vmatprep.subr.bf16.mxu0 %v4274_v26  ;;  %v4355_v25 = vld [vmem:[%s6380_s1 + $0x3d0] ss:$8 sps:$4 sm:$0xff]   ;;  %v4360_v26 = vld [vmem:[%s6380_s1 + $0x2c4] ss:$8 sps:$4 sm:$0xff]  }
  0x3d   :  { %3053 = vmatprep.subr.bf16.mxu1 %v4277_v27  ;;  %v4363_v27 = vld [vmem:[%s6380_s1 + $0x3c4] ss:$8 sps:$4 sm:$0xff]  }
  0x3f   :  { %3011 = vmatpush2.bf16.msra.mxu0 %v4276_v32  ;;  %v4364_v32 = vld [vmem:[%s6380_s1 + $0x2b0] ss:$8 sps:$4 sm:$0xff]  }
  0x40   :  { %3054 = vmatpush2.bf16.msra.mxu1 %v4291_v33  ;;  %3066 = vmatprep.subr.bf16.mxu0 %v4294_v34  ;;  %v4367_v33 = vld [vmem:[%s6380_s1 + $0x3b0] ss:$8 sps:$4 sm:$0xff]   ;;  %v4372_v34 = vld [vmem:[%s6380_s1 + $0x2a4] ss:$8 sps:$4 sm:$0xff]  }
  0x41   :  { %3109 = vmatprep.subr.bf16.mxu1 %v4297_v35  ;;  %v4375_v35 = vld [vmem:[%s6380_s1 + $0x3a4] ss:$8 sps:$4 sm:$0xff]  }
  0x42   :  { %3013 = vmatmul.mubr.bf16.vlgmr.msra.gmra.mxu0 %v626_v38  ;;  %v4378_v38 = vld [vmem:[%s6380_s1 + $0x294] ss:$8 sps:$4 sm:$0xff]  }
  0x43   :  { %3067 = vmatpush1.bf16.msra.mxu0 %v4292_v39  ;;  %3056 = vmatmul.mubr.bf16.vlgmr.msra.gmra.mxu1 %v627_v40  ;;  %v4381_v39 = vld [vmem:[%s6380_s1 + $0x394] ss:$8 sps:$4 sm:$0xff]   ;;  %v564_v40 = vcombine.low %v5107_v16, %v5110_v17  ;;  %v4387_v16 = vld [vmem:[%s6380_s1 + $0x384] ss:$8 sps:$4 sm:$0xff]  }
  0x44   :  { %3110 = vmatpush1.bf16.msra.mxu1 %v4295_v41  ;;  %3068 = vmatprep.subr.bf16.mxu0 %v4300_v42  ;;  %v568_v41 = vcombine.low %v5113_v18, %v5116_v19  ;;  %v4376_v42 = vld [vmem:[%s6380_s1 + $0x290] ss:$8 sps:$4 sm:$0xff]   ;;  %v4382_v19 = vld [vmem:[%s6380_s1 + $0x280] ss:$8 sps:$4 sm:$0xff]  }
  0x45   :  { %3111 = vmatprep.subr.bf16.mxu1 %v4303_v43  ;;  %3098 = vmatprep.mubr.bf16.mxu0 %v632_v44  ;;  %v4379_v43 = vld [vmem:[%s6380_s1 + $0x390] ss:$8 sps:$4 sm:$0xff]   ;;  %v4384_v44 = vld [vmem:[%s6380_s1 + $0x284] ss:$8 sps:$4 sm:$0xff]   ;;  %v583_v17 = vrot.slane %v564_v40, %v5044_v53 }
  0x46   :  { %3141 = vmatprep.mubr.bf16.mxu1 %v633_v46  ;;  %v611_v18 = vrot.slane %v568_v41, %v5044_v53  ;;  %v4385_v46 = vld [vmem:[%s6380_s1 + $0x380] ss:$8 sps:$4 sm:$0xff]   ;;  %v4444_v40 = vld [vmem:[%s6380_s1 + $0x4e4] ss:$8 sps:$4 sm:$0xff]  }
  0x47   :  { %3069 = vmatpush1.bf16.msra.mxu0 %v4298_v47  ;;  %v4390_v47 = vld [vmem:[%s6380_s1 + $0x474] ss:$8 sps:$4 sm:$0xff]   ;;  %v4447_v41 = vld [vmem:[%s6380_s1 + $0x5e4] ss:$8 sps:$4 sm:$0xff]  }
  0x48   :  { %3112 = vmatpush1.bf16.msra.mxu1 %v4301_v48  ;;  %3070 = vmatprep.subr.bf16.mxu0 %v4306_v49  ;;  %v4393_v48 = vld [vmem:[%s6380_s1 + $0x574] ss:$8 sps:$4 sm:$0xff]   ;;  %v628_v49 = vcombine.low %v583_v17, %v611_v18 }
  0x49   :  { %3113 = vmatprep.subr.bf16.mxu1 %v4309_v50  ;;  %v4388_v50 = vld [vmem:[%s6380_s1 + $0x470] ss:$8 sps:$4 sm:$0xff]  }
  0x4b   :  { %3071 = vmatpush1.bf16.msra.mxu0 %v4304_v51  ;;  %v629_v51 = vcombine.high %v583_v17, %v611_v18  ;;  %v4448_v17 = vld [vmem:[%s6380_s1 + $0x4d0] ss:$8 sps:$4 sm:$0xff]  }
  0x4c   :  { %3114 = vmatpush1.bf16.msra.mxu1 %v4307_v52  ;;  %3072 = vmatprep.subr.bf16.mxu0 %v4312_v54  ;;  %v4391_v52 = vld [vmem:[%s6380_s1 + $0x570] ss:$8 sps:$4 sm:$0xff]   ;;  %v4396_v54 = vld [vmem:[%s6380_s1 + $0x464] ss:$8 sps:$4 sm:$0xff]  }
  0x4d   :  { %3115 = vmatprep.subr.bf16.mxu1 %v4315_v55  ;;  %v4399_v55 = vld [vmem:[%s6380_s1 + $0x564] ss:$8 sps:$4 sm:$0xff]   ;;  %v4451_v18 = vld [vmem:[%s6380_s1 + $0x5d0] ss:$8 sps:$4 sm:$0xff]  }
  0x4f   :  { %3073 = vmatpush1.bf16.msra.mxu0 %v4310_v56  ;;  %v4394_v56 = vld [vmem:[%s6380_s1 + $0x460] ss:$8 sps:$4 sm:$0xff]  }
  0x50   :  { %3116 = vmatpush1.bf16.msra.mxu1 %v4313_v57  ;;  %3074 = vmatprep.subr.bf16.mxu0 %v4318_v58  ;;  %v4397_v57 = vld [vmem:[%s6380_s1 + $0x560] ss:$8 sps:$4 sm:$0xff]   ;;  %v4402_v58 = vld [vmem:[%s6380_s1 + $0x454] ss:$8 sps:$4 sm:$0xff]  }
  0x51   :  { %3117 = vmatprep.subr.bf16.mxu1 %v4321_v59  ;;  %v4405_v59 = vld [vmem:[%s6380_s1 + $0x554] ss:$8 sps:$4 sm:$0xff]  }
  0x53   :  { %3075 = vmatpush1.bf16.msra.mxu0 %v4316_v60  ;;  %v4400_v60 = vld [vmem:[%s6380_s1 + $0x450] ss:$8 sps:$4 sm:$0xff]  }
  0x54   :  { %3118 = vmatpush1.bf16.msra.mxu1 %v4319_v61  ;;  %3076 = vmatprep.subr.bf16.mxu0 %v4324_v62  ;;  %v4403_v61 = vld [vmem:[%s6380_s1 + $0x550] ss:$8 sps:$4 sm:$0xff]   ;;  %v4408_v62 = vld [vmem:[%s6380_s1 + $0x444] ss:$8 sps:$4 sm:$0xff]  }
  0x55   :  { %3119 = vmatprep.subr.bf16.mxu1 %v4327_v63  ;;  %v4484_v63 = vld [vmem:[%s6379_s0 + $0x8] ss:$25 sps:$4 sm:$0xff]  }
  0x57   :  { %3077 = vmatpush1.bf16.msra.mxu0 %v4322_v0  ;;  %v4486_v0 = vld [vmem:[%s6379_s0 + $0x3a] ss:$25 sps:$4 sm:$0xff]  }
  0x58   :  { %3120 = vmatpush1.bf16.msra.mxu1 %v4325_v1  ;;  %3078 = vmatprep.subr.bf16.mxu0 %v4330_v2  ;;  %v4488_v1 = vld [vmem:[%s6379_s0 + $0x6c] ss:$25 sps:$4 sm:$0xff]   ;;  %v4490_v2 = vld [vmem:[%s6379_s0 + $0x9e] ss:$25 sps:$4 sm:$0xff]  }
  0x59   :  { %3121 = vmatprep.subr.bf16.mxu1 %v4333_v3  ;;  %v4411_v3 = vld [vmem:[%s6380_s1 + $0x544] ss:$8 sps:$4 sm:$0xff]  }
  0x5b   :  { %3079 = vmatpush1.bf16.msra.mxu0 %v4328_v4  ;;  %v5397_v4 = vrot.slane %v4484_v63, %v5044_v53  ;;  %v4477_v63 = vld [vmem:[%s6380_s1 + $0x594] ss:$8 sps:$4 sm:$0xff]  }
  0x5c   :  { %3122 = vmatpush1.bf16.msra.mxu1 %v4331_v5  ;;  %3080 = vmatprep.subr.bf16.mxu0 %v4336_v6  ;;  %v5400_v5 = vrot.slane %v4486_v0, %v5044_v53  ;;  %v5403_v6 = vrot.slane %v4488_v1, %v5044_v53 }
  0x5d   :  { %3123 = vmatprep.subr.bf16.mxu1 %v4339_v7  ;;  %v5406_v7 = vrot.slane %v4490_v2, %v5044_v53 }
  0x5e   :  { %v698_v2 = vcombine.low %v5397_v4, %v5400_v5 }
  0x5f   :  { %3081 = vmatpush1.bf16.msra.mxu0 %v4334_v8  ;;  %v4406_v8 = vld [vmem:[%s6380_s1 + $0x440] ss:$8 sps:$4 sm:$0xff]  }
  0x60   :  { %3124 = vmatpush1.bf16.msra.mxu1 %v4337_v9  ;;  %3082 = vmatprep.subr.bf16.mxu0 %v4342_v10  ;;  %v699_v9 = vcombine.high %v5397_v4, %v5400_v5  ;;  %v4409_v10 = vld [vmem:[%s6380_s1 + $0x540] ss:$8 sps:$4 sm:$0xff]   ;;  %v4475_v4 = vld [vmem:[%s6380_s1 + $0x590] ss:$8 sps:$4 sm:$0xff]   ;;  %v4480_v5 = vld [vmem:[%s6380_s1 + $0x484] ss:$8 sps:$4 sm:$0xff]  }
  0x61   :  { %3125 = vmatprep.subr.bf16.mxu1 %v4345_v11  ;;  %v4414_v11 = vld [vmem:[%s6380_s1 + $0x434] ss:$8 sps:$4 sm:$0xff]  }
  0x63   :  { %3083 = vmatpush2.bf16.msra.mxu0 %v4340_v12  ;;  %v703_v12 = vcombine.high %v5403_v6, %v5406_v7 }
  0x64   :  { %3126 = vmatpush2.bf16.msra.mxu1 %v4343_v13  ;;  %3084 = vmatprep.subr.bf16.mxu0 %v4348_v14  ;;  %v4417_v13 = vld [vmem:[%s6380_s1 + $0x534] ss:$8 sps:$4 sm:$0xff]   ;;  %v726_v14 = vrot.slane %v699_v9, %v5044_v53 }
  0x65   :  { %3127 = vmatprep.subr.bf16.mxu1 %v4351_v15  ;;  %v754_v15 = vrot.slane %v703_v12, %v5044_v53  ;;  %v712_v12 = vrot.slane %v698_v2, %v5044_v53  ;;  %v4554_v2 = vld [vmem:[%s6380_s1 + $0x6d4] ss:$8 sps:$4 sm:$0xff]  }
  0x67   :  { %3085 = vmatpush2.bf16.msra.mxu0 %v4346_v20  ;;  %v4412_v20 = vld [vmem:[%s6380_s1 + $0x430] ss:$8 sps:$4 sm:$0xff]  }
  0x68   :  { %3128 = vmatpush2.bf16.msra.mxu1 %v4349_v21  ;;  %3086 = vmatprep.subr.bf16.mxu0 %v4354_v22  ;;  %v4415_v21 = vld [vmem:[%s6380_s1 + $0x530] ss:$8 sps:$4 sm:$0xff]   ;;  %v4420_v22 = vld [vmem:[%s6380_s1 + $0x424] ss:$8 sps:$4 sm:$0xff]  }
  0x69   :  { %3129 = vmatprep.subr.bf16.mxu1 %v4357_v23  ;;  %v766_v23 = vcombine.low %v726_v14, %v754_v15 }
  0x6b   :  { %3087 = vmatpush2.bf16.msra.mxu0 %v4352_v24  ;;  %v767_v24 = vcombine.high %v726_v14, %v754_v15  ;;  %v4478_v14 = vld [vmem:[%s6380_s1 + $0x480] ss:$8 sps:$4 sm:$0xff]  }
  0x6c   :  { %3130 = vmatpush2.bf16.msra.mxu1 %v4355_v25  ;;  %3088 = vmatprep.subr.bf16.mxu0 %v4360_v26  ;;  %v4423_v25 = vld [vmem:[%s6380_s1 + $0x524] ss:$8 sps:$4 sm:$0xff]   ;;  %v4418_v26 = vld [vmem:[%s6380_s1 + $0x420] ss:$8 sps:$4 sm:$0xff]  }
  0x6d   :  { %3131 = vmatprep.subr.bf16.mxu1 %v4363_v27  ;;  %v4421_v27 = vld [vmem:[%s6380_s1 + $0x520] ss:$8 sps:$4 sm:$0xff]  }
  0x6e   :  { %v4481_v15 = vld [vmem:[%s6380_s1 + $0x580] ss:$8 sps:$4 sm:$0xff]  }
  0x6f   :  { %3089 = vmatpush2.bf16.msra.mxu0 %v4358_v28  ;;  %v4426_v28 = vld [vmem:[%s6380_s1 + $0x414] ss:$8 sps:$4 sm:$0xff]  }
  0x70   :  { %3132 = vmatpush2.bf16.msra.mxu1 %v4361_v29  ;;  %3090 = vmatprep.subr.bf16.mxu0 %v4366_v30  ;;  %v4429_v29 = vld [vmem:[%s6380_s1 + $0x514] ss:$8 sps:$4 sm:$0xff]   ;;  %v4424_v30 = vld [vmem:[%s6380_s1 + $0x410] ss:$8 sps:$4 sm:$0xff]  }
  0x71   :  { %3133 = vmatprep.subr.bf16.mxu1 %v4369_v31  ;;  %v4427_v31 = vld [vmem:[%s6380_s1 + $0x510] ss:$8 sps:$4 sm:$0xff]  }
  0x73   :  { %3091 = vmatpush2.bf16.msra.mxu0 %v4364_v32  ;;  %v4432_v32 = vld [vmem:[%s6380_s1 + $0x404] ss:$8 sps:$4 sm:$0xff]  }
  0x74   :  { %3134 = vmatpush2.bf16.msra.mxu1 %v4367_v33  ;;  %3092 = vmatprep.subr.bf16.mxu0 %v4372_v34  ;;  %v4435_v33 = vld [vmem:[%s6380_s1 + $0x504] ss:$8 sps:$4 sm:$0xff]   ;;  %v4430_v34 = vld [vmem:[%s6380_s1 + $0x400] ss:$8 sps:$4 sm:$0xff]  }
  0x75   :  { %3135 = vmatprep.subr.bf16.mxu1 %v4375_v35  ;;  %v4433_v35 = vld [vmem:[%s6380_s1 + $0x500] ss:$8 sps:$4 sm:$0xff]  }
  0x77   :  { %3093 = vmatpush2.bf16.msra.mxu0 %v4370_v36  ;;  %v4438_v36 = vld [vmem:[%s6380_s1 + $0x4f4] ss:$8 sps:$4 sm:$0xff]  }
  0x78   :  { %3136 = vmatpush2.bf16.msra.mxu1 %v4373_v37  ;;  %3094 = vmatprep.subr.bf16.mxu0 %v4378_v38  ;;  %v4441_v37 = vld [vmem:[%s6380_s1 + $0x5f4] ss:$8 sps:$4 sm:$0xff]   ;;  %v4436_v38 = vld [vmem:[%s6380_s1 + $0x4f0] ss:$8 sps:$4 sm:$0xff]  }
  0x79   :  { %3137 = vmatprep.subr.bf16.mxu1 %v4381_v39  ;;  %v4439_v39 = vld [vmem:[%s6380_s1 + $0x5f0] ss:$8 sps:$4 sm:$0xff]  }
  0x7b   :  { %3095 = vmatpush2.bf16.msra.mxu0 %v4376_v42  ;;  %v4442_v42 = vld [vmem:[%s6380_s1 + $0x4e0] ss:$8 sps:$4 sm:$0xff]  }
  0x7c   :  { %3138 = vmatpush2.bf16.msra.mxu1 %v4379_v43  ;;  %3096 = vmatprep.subr.bf16.mxu0 %v4384_v44  ;;  %v4445_v43 = vld [vmem:[%s6380_s1 + $0x5e0] ss:$8 sps:$4 sm:$0xff]   ;;  %v4450_v44 = vld [vmem:[%s6380_s1 + $0x4d4] ss:$8 sps:$4 sm:$0xff]  }
  0x7d   :  { %3139 = vmatprep.subr.bf16.mxu1 %v4387_v16  ;;  %v4453_v16 = vld [vmem:[%s6380_s1 + $0x5d4] ss:$8 sps:$4 sm:$0xff]  }
  0x7f   :  { %3097 = vmatpush2.bf16.msra.mxu0 %v4382_v19  ;;  %v4456_v19 = vld [vmem:[%s6380_s1 + $0x4c4] ss:$8 sps:$4 sm:$0xff]  }
  0x80   :  { %3140 = vmatpush2.bf16.msra.mxu1 %v4385_v46  ;;  %3152 = vmatprep.subr.bf16.mxu0 %v4390_v47  ;;  %v4459_v46 = vld [vmem:[%s6380_s1 + $0x5c4] ss:$8 sps:$4 sm:$0xff]   ;;  %v4454_v47 = vld [vmem:[%s6380_s1 + $0x4c0] ss:$8 sps:$4 sm:$0xff]  }
  0x81   :  { %3195 = vmatprep.subr.bf16.mxu1 %v4393_v48  ;;  %v4457_v48 = vld [vmem:[%s6380_s1 + $0x5c0] ss:$8 sps:$4 sm:$0xff]  }
  0x82   :  { %3099 = vmatmul.mubr.bf16.vlgmr.msra.gmra.mxu0 %v628_v49  ;;  %v4462_v49 = vld [vmem:[%s6380_s1 + $0x4b4] ss:$8 sps:$4 sm:$0xff]  }
  0x83   :  { %3153 = vmatpush1.bf16.msra.mxu0 %v4388_v50  ;;  %3142 = vmatmul.mubr.bf16.vlgmr.msra.gmra.mxu1 %v629_v51  ;;  %v4465_v50 = vld [vmem:[%s6380_s1 + $0x5b4] ss:$8 sps:$4 sm:$0xff]   ;;  %v4460_v51 = vld [vmem:[%s6380_s1 + $0x4b0] ss:$8 sps:$4 sm:$0xff]  }
  0x84   :  { %3196 = vmatpush1.bf16.msra.mxu1 %v4391_v52  ;;  %3154 = vmatprep.subr.bf16.mxu0 %v4396_v54  ;;  %v4463_v52 = vld [vmem:[%s6380_s1 + $0x5b0] ss:$8 sps:$4 sm:$0xff]   ;;  %v4468_v54 = vld [vmem:[%s6380_s1 + $0x4a4] ss:$8 sps:$4 sm:$0xff]  }
  0x85   :  { %3197 = vmatprep.subr.bf16.mxu1 %v4399_v55  ;;  %3184 = vmatprep.mubr.bf16.mxu0 %v766_v23  ;;  %v4471_v55 = vld [vmem:[%s6380_s1 + $0x5a4] ss:$8 sps:$4 sm:$0xff]  }
  0x86   :  { %3227 = vmatprep.mubr.bf16.mxu1 %v767_v24 }
  0x87   :  { %3155 = vmatpush1.bf16.msra.mxu0 %v4394_v56  ;;  %v4466_v56 = vld [vmem:[%s6380_s1 + $0x4a0] ss:$8 sps:$4 sm:$0xff]  }
  0x88   :  { %3198 = vmatpush1.bf16.msra.mxu1 %v4397_v57  ;;  %3156 = vmatprep.subr.bf16.mxu0 %v4402_v58  ;;  %v4469_v57 = vld [vmem:[%s6380_s1 + $0x5a0] ss:$8 sps:$4 sm:$0xff]  }
  0x89   :  { %3199 = vmatprep.subr.bf16.mxu1 %v4405_v59  ;;  %v4588_v58 = vld [vmem:[%s6379_s0 + $0xc] ss:$25 sps:$4 sm:$0xff]   ;;  %v4589_v59 = vld [vmem:[%s6379_s0 + $0x3e] ss:$25 sps:$4 sm:$0xff]  }
  0x8a   :  { %v5559_v0 = vrot.slane %v4588_v58, %v5044_v53  ;;  %v5562_v1 = vrot.slane %v4589_v59, %v5044_v53  ;;  %v4545_v58 = vld [vmem:[%s6380_s1 + $0x7f4] ss:$8 sps:$4 sm:$0xff]   ;;  %v4543_v59 = vld [vmem:[%s6380_s1 + $0x7f0] ss:$8 sps:$4 sm:$0xff]  }
  0x8b   :  { %3157 = vmatpush1.bf16.msra.mxu0 %v4400_v60  ;;  %v4474_v60 = vld [vmem:[%s6380_s1 + $0x494] ss:$8 sps:$4 sm:$0xff]  }
  0x8c   :  { %3200 = vmatpush1.bf16.msra.mxu1 %v4403_v61  ;;  %3158 = vmatprep.subr.bf16.mxu0 %v4408_v62  ;;  %v4590_v61 = vld [vmem:[%s6379_s0 + $0x70] ss:$25 sps:$4 sm:$0xff]   ;;  %v4591_v62 = vld [vmem:[%s6379_s0 + $0xa2] ss:$25 sps:$4 sm:$0xff]  }
  0x8d   :  { %3201 = vmatprep.subr.bf16.mxu1 %v4411_v3  ;;  %v702_v3 = vcombine.low %v5403_v6, %v5406_v7  ;;  %v5572_v9 = vrot.slane %v4591_v62, %v5044_v53  ;;  %v4483_v6 = vld [vmem:[%s6380_s1 + $0x584] ss:$8 sps:$4 sm:$0xff]   ;;  %v701_v7 = vcombine.high %v5559_v0, %v5562_v1  ;;  %v4546_v62 = vld [vmem:[%s6380_s1 + $0x6e0] ss:$8 sps:$4 sm:$0xff]  }
  0x8f   :  { %3159 = vmatpush1.bf16.msra.mxu0 %v4406_v8  ;;  %v5569_v8 = vrot.slane %v4590_v61, %v5044_v53  ;;  %v4551_v61 = vld [vmem:[%s6380_s1 + $0x7e4] ss:$8 sps:$4 sm:$0xff]  }
  0x90   :  { %3202 = vmatpush1.bf16.msra.mxu1 %v4409_v10  ;;  %3160 = vmatprep.subr.bf16.mxu0 %v4414_v11  ;;  %v4472_v10 = vld [vmem:[%s6380_s1 + $0x490] ss:$8 sps:$4 sm:$0xff]  }
  0x91   :  { %3203 = vmatprep.subr.bf16.mxu1 %v4417_v13  ;;  %v705_v11 = vcombine.high %v5569_v8, %v5572_v9  ;;  %v740_v13 = vrot.slane %v702_v3, %v5044_v53  ;;  %v4557_v3 = vld [vmem:[%s6380_s1 + $0x7d4] ss:$8 sps:$4 sm:$0xff]  }
  0x93   :  { %3161 = vmatpush1.bf16.msra.mxu0 %v4412_v20  ;;  %v4494_v20 = vld [vmem:[%s6380_s1 + $0x674] ss:$8 sps:$4 sm:$0xff]   ;;  %v761_v23 = vrot.slane %v705_v11, %v5044_v53  ;;  %v762_v24 = vcombine.low %v712_v12, %v740_v13  ;;  %v4561_v11 = vld [vmem:[%s6380_s1 + $0x7c0] ss:$8 sps:$4 sm:$0xff]  }
  0x94   :  { %3204 = vmatpush1.bf16.msra.mxu1 %v4415_v21  ;;  %3162 = vmatprep.subr.bf16.mxu0 %v4420_v22  ;;  %v4497_v21 = vld [vmem:[%s6380_s1 + $0x774] ss:$8 sps:$4 sm:$0xff]   ;;  %v733_v22 = vrot.slane %v701_v7, %v5044_v53  ;;  %v4558_v7 = vld [vmem:[%s6380_s1 + $0x6c0] ss:$8 sps:$4 sm:$0xff]  }
  0x95   :  { %3205 = vmatprep.subr.bf16.mxu1 %v4423_v25  ;;  %v4492_v25 = vld [vmem:[%s6380_s1 + $0x670] ss:$8 sps:$4 sm:$0xff]  }
  0x97   :  { %3163 = vmatpush1.bf16.msra.mxu0 %v4418_v26  ;;  %v763_v26 = vcombine.high %v712_v12, %v740_v13  ;;  %v4566_v12 = vld [vmem:[%s6380_s1 + $0x6b4] ss:$8 sps:$4 sm:$0xff]   ;;  %v4564_v13 = vld [vmem:[%s6380_s1 + $0x6b0] ss:$8 sps:$4 sm:$0xff]  }
  0x98   :  { %3206 = vmatpush1.bf16.msra.mxu1 %v4421_v27  ;;  %3164 = vmatprep.subr.bf16.mxu0 %v4426_v28  ;;  %v4495_v27 = vld [vmem:[%s6380_s1 + $0x770] ss:$8 sps:$4 sm:$0xff]   ;;  %v4500_v28 = vld [vmem:[%s6380_s1 + $0x664] ss:$8 sps:$4 sm:$0xff]  }
  0x99   :  { %3207 = vmatprep.subr.bf16.mxu1 %v4429_v29  ;;  %v4503_v29 = vld [vmem:[%s6380_s1 + $0x764] ss:$8 sps:$4 sm:$0xff]  }
  0x9b   :  { %3165 = vmatpush1.bf16.msra.mxu0 %v4424_v30  ;;  %v768_v30 = vcombine.low %v733_v22, %v761_v23 }
  0x9c   :  { %3208 = vmatpush1.bf16.msra.mxu1 %v4427_v31  ;;  %3166 = vmatprep.subr.bf16.mxu0 %v4432_v32  ;;  %v769_v31 = vcombine.high %v733_v22, %v761_v23  ;;  %v4498_v32 = vld [vmem:[%s6380_s1 + $0x660] ss:$8 sps:$4 sm:$0xff]  }
  0x9d   :  { %3209 = vmatprep.subr.bf16.mxu1 %v4435_v33  ;;  %v4501_v33 = vld [vmem:[%s6380_s1 + $0x760] ss:$8 sps:$4 sm:$0xff]  }
  0x9e   :  { %v4688_v22 = vld [vmem:[%s6379_s0 + $0x10] ss:$25 sps:$4 sm:$0xff]   ;;  %v4690_v23 = vld [vmem:[%s6379_s0 + $0x42] ss:$25 sps:$4 sm:$0xff]  }
  0x9f   :  { %3167 = vmatpush1.bf16.msra.mxu0 %v4430_v34  ;;  %v4506_v34 = vld [vmem:[%s6380_s1 + $0x654] ss:$8 sps:$4 sm:$0xff]  }
  0xa0   :  { %3210 = vmatpush1.bf16.msra.mxu1 %v4433_v35  ;;  %3168 = vmatprep.subr.bf16.mxu0 %v4438_v36  ;;  %v4509_v35 = vld [vmem:[%s6380_s1 + $0x754] ss:$8 sps:$4 sm:$0xff]   ;;  %v4504_v36 = vld [vmem:[%s6380_s1 + $0x650] ss:$8 sps:$4 sm:$0xff]  }
  0xa1   :  { %3211 = vmatprep.subr.bf16.mxu1 %v4441_v37  ;;  %v4507_v37 = vld [vmem:[%s6380_s1 + $0x750] ss:$8 sps:$4 sm:$0xff]  }
  0xa3   :  { %3169 = vmatpush2.bf16.msra.mxu0 %v4436_v38  ;;  %v4512_v38 = vld [vmem:[%s6380_s1 + $0x644] ss:$8 sps:$4 sm:$0xff]  }
  0xa4   :  { %3212 = vmatpush2.bf16.msra.mxu1 %v4439_v39  ;;  %3170 = vmatprep.subr.bf16.mxu0 %v4444_v40  ;;  %v4515_v39 = vld [vmem:[%s6380_s1 + $0x744] ss:$8 sps:$4 sm:$0xff]   ;;  %v4510_v40 = vld [vmem:[%s6380_s1 + $0x640] ss:$8 sps:$4 sm:$0xff]  }
  0xa5   :  { %3213 = vmatprep.subr.bf16.mxu1 %v4447_v41  ;;  %v4513_v41 = vld [vmem:[%s6380_s1 + $0x740] ss:$8 sps:$4 sm:$0xff]  }
  0xa7   :  { %3171 = vmatpush2.bf16.msra.mxu0 %v4442_v42  ;;  %v4518_v42 = vld [vmem:[%s6380_s1 + $0x634] ss:$8 sps:$4 sm:$0xff]  }
  0xa8   :  { %3214 = vmatpush2.bf16.msra.mxu1 %v4445_v43  ;;  %3172 = vmatprep.subr.bf16.mxu0 %v4450_v44  ;;  %v4521_v43 = vld [vmem:[%s6380_s1 + $0x734] ss:$8 sps:$4 sm:$0xff]   ;;  %v4516_v44 = vld [vmem:[%s6380_s1 + $0x630] ss:$8 sps:$4 sm:$0xff]  }
  0xa9   :  { %3215 = vmatprep.subr.bf16.mxu1 %v4453_v16  ;;  %v4519_v16 = vld [vmem:[%s6380_s1 + $0x730] ss:$8 sps:$4 sm:$0xff]  }
  0xab   :  { %3173 = vmatpush2.bf16.msra.mxu0 %v4448_v17  ;;  %v4524_v17 = vld [vmem:[%s6380_s1 + $0x624] ss:$8 sps:$4 sm:$0xff]  }
  0xac   :  { %3216 = vmatpush2.bf16.msra.mxu1 %v4451_v18  ;;  %3174 = vmatprep.subr.bf16.mxu0 %v4456_v19  ;;  %v4527_v18 = vld [vmem:[%s6380_s1 + $0x724] ss:$8 sps:$4 sm:$0xff]   ;;  %v4522_v19 = vld [vmem:[%s6380_s1 + $0x620] ss:$8 sps:$4 sm:$0xff]  }
  0xad   :  { %3217 = vmatprep.subr.bf16.mxu1 %v4459_v46  ;;  %v4525_v46 = vld [vmem:[%s6380_s1 + $0x720] ss:$8 sps:$4 sm:$0xff]  }
  0xaf   :  { %3175 = vmatpush2.bf16.msra.mxu0 %v4454_v47  ;;  %v4530_v47 = vld [vmem:[%s6380_s1 + $0x614] ss:$8 sps:$4 sm:$0xff]  }
  0xb0   :  { %3218 = vmatpush2.bf16.msra.mxu1 %v4457_v48  ;;  %3176 = vmatprep.subr.bf16.mxu0 %v4462_v49  ;;  %v4533_v48 = vld [vmem:[%s6380_s1 + $0x714] ss:$8 sps:$4 sm:$0xff]   ;;  %v4528_v49 = vld [vmem:[%s6380_s1 + $0x610] ss:$8 sps:$4 sm:$0xff]  }
  0xb1   :  { %3219 = vmatprep.subr.bf16.mxu1 %v4465_v50  ;;  %v4531_v50 = vld [vmem:[%s6380_s1 + $0x710] ss:$8 sps:$4 sm:$0xff]  }
  0xb3   :  { %3177 = vmatpush2.bf16.msra.mxu0 %v4460_v51  ;;  %v4536_v51 = vld [vmem:[%s6380_s1 + $0x604] ss:$8 sps:$4 sm:$0xff]  }
  0xb4   :  { %3220 = vmatpush2.bf16.msra.mxu1 %v4463_v52  ;;  %3178 = vmatprep.subr.bf16.mxu0 %v4468_v54  ;;  %v4539_v52 = vld [vmem:[%s6380_s1 + $0x704] ss:$8 sps:$4 sm:$0xff]   ;;  %v4534_v54 = vld [vmem:[%s6380_s1 + $0x600] ss:$8 sps:$4 sm:$0xff]  }
  0xb5   :  { %3221 = vmatprep.subr.bf16.mxu1 %v4471_v55  ;;  %v4537_v55 = vld [vmem:[%s6380_s1 + $0x700] ss:$8 sps:$4 sm:$0xff]  }
  0xb7   :  { %3179 = vmatpush2.bf16.msra.mxu0 %v4466_v56  ;;  %v4542_v56 = vld [vmem:[%s6380_s1 + $0x6f4] ss:$8 sps:$4 sm:$0xff]  }
  0xb8   :  { %3222 = vmatpush2.bf16.msra.mxu1 %v4469_v57  ;;  %3180 = vmatprep.subr.bf16.mxu0 %v4474_v60  ;;  %v4540_v57 = vld [vmem:[%s6380_s1 + $0x6f0] ss:$8 sps:$4 sm:$0xff]   ;;  %v4548_v60 = vld [vmem:[%s6380_s1 + $0x6e4] ss:$8 sps:$4 sm:$0xff]  }
  0xb9   :  { %3223 = vmatprep.subr.bf16.mxu1 %v4477_v63  ;;  %v4549_v63 = vld [vmem:[%s6380_s1 + $0x7e0] ss:$8 sps:$4 sm:$0xff]  }
  0xbb   :  { %3181 = vmatpush2.bf16.msra.mxu0 %v4472_v10  ;;  %v4552_v10 = vld [vmem:[%s6380_s1 + $0x6d0] ss:$8 sps:$4 sm:$0xff]  }
  0xbc   :  { %3224 = vmatpush2.bf16.msra.mxu1 %v4475_v4  ;;  %3182 = vmatprep.subr.bf16.mxu0 %v4480_v5  ;;  %v4555_v4 = vld [vmem:[%s6380_s1 + $0x7d0] ss:$8 sps:$4 sm:$0xff]   ;;  %v4560_v5 = vld [vmem:[%s6380_s1 + $0x6c4] ss:$8 sps:$4 sm:$0xff]  }
  0xbd   :  { %3225 = vmatprep.subr.bf16.mxu1 %v4483_v6  ;;  %v4563_v6 = vld [vmem:[%s6380_s1 + $0x7c4] ss:$8 sps:$4 sm:$0xff]  }
  0xbf   :  { %3183 = vmatpush2.bf16.msra.mxu0 %v4478_v14  ;;  %v4569_v14 = vld [vmem:[%s6380_s1 + $0x7b4] ss:$8 sps:$4 sm:$0xff]  }
  0xc0   :  { %3226 = vmatpush2.bf16.msra.mxu1 %v4481_v15  ;;  %3238 = vmatprep.subr.bf16.mxu0 %v4494_v20  ;;  %v4567_v15 = vld [vmem:[%s6380_s1 + $0x7b0] ss:$8 sps:$4 sm:$0xff]   ;;  %v4572_v20 = vld [vmem:[%s6380_s1 + $0x6a4] ss:$8 sps:$4 sm:$0xff]  }
  0xc1   :  { %3281 = vmatprep.subr.bf16.mxu1 %v4497_v21  ;;  %v4575_v21 = vld [vmem:[%s6380_s1 + $0x7a4] ss:$8 sps:$4 sm:$0xff]  }
  0xc2   :  { %3185 = vmatmul.mubr.bf16.vlgmr.msra.gmra.mxu0 %v762_v24  ;;  %v4692_v24 = vld [vmem:[%s6379_s0 + $0x74] ss:$25 sps:$4 sm:$0xff]  }
  0xc3   :  { %3239 = vmatpush1.bf16.msra.mxu0 %v4492_v25  ;;  %3228 = vmatmul.mubr.bf16.vlgmr.msra.gmra.mxu1 %v763_v26  ;;  %v4694_v25 = vld [vmem:[%s6379_s0 + $0xa6] ss:$25 sps:$4 sm:$0xff]  }
  0xc4   :  { %3282 = vmatpush1.bf16.msra.mxu1 %v4495_v27  ;;  %3240 = vmatprep.subr.bf16.mxu0 %v4500_v28  ;;  %v4570_v26 = vld [vmem:[%s6380_s1 + $0x6a0] ss:$8 sps:$4 sm:$0xff]   ;;  %v4578_v28 = vld [vmem:[%s6380_s1 + $0x694] ss:$8 sps:$4 sm:$0xff]  }
  0xc5   :  { %3283 = vmatprep.subr.bf16.mxu1 %v4503_v29  ;;  %3270 = vmatprep.mubr.bf16.mxu0 %v768_v30  ;;  %v4573_v27 = vld [vmem:[%s6380_s1 + $0x7a0] ss:$8 sps:$4 sm:$0xff]   ;;  %v4581_v29 = vld [vmem:[%s6380_s1 + $0x794] ss:$8 sps:$4 sm:$0xff]   ;;  %v5787_v30 = vrot.slane %v4688_v22, %v5044_v53 }
  0xc6   :  { %3313 = vmatprep.mubr.bf16.mxu1 %v769_v31  ;;  %v5790_v31 = vrot.slane %v4690_v23, %v5044_v53  ;;  %v4642_v22 = vld [vmem:[%s6380_s1 + $0x8f4] ss:$8 sps:$4 sm:$0xff]  }
  0xc7   :  { %3241 = vmatpush1.bf16.msra.mxu0 %v4498_v32  ;;  %v5793_v32 = vrot.slane %v4692_v24, %v5044_v53  ;;  %v4645_v23 = vld [vmem:[%s6380_s1 + $0x9f4] ss:$8 sps:$4 sm:$0xff]   ;;  %v4640_v24 = vld [vmem:[%s6380_s1 + $0x8f0] ss:$8 sps:$4 sm:$0xff]  }
  0xc8   :  { %3284 = vmatpush1.bf16.msra.mxu1 %v4501_v33  ;;  %3242 = vmatprep.subr.bf16.mxu0 %v4506_v34  ;;  %v5796_v33 = vrot.slane %v4694_v25, %v5044_v53  ;;  %v700_v34 = vcombine.low %v5559_v0, %v5562_v1  ;;  %v4587_v0 = vld [vmem:[%s6380_s1 + $0x784] ss:$8 sps:$4 sm:$0xff]   ;;  %v835_v1 = vcombine.high %v5787_v30, %v5790_v31  ;;  %v4643_v25 = vld [vmem:[%s6380_s1 + $0x9f0] ss:$8 sps:$4 sm:$0xff]  }
  0xc9   :  { %3285 = vmatprep.subr.bf16.mxu1 %v4509_v35  ;;  %v704_v35 = vcombine.low %v5569_v8, %v5572_v9 }
  0xca   :  { %v839_v8 = vcombine.high %v5793_v32, %v5796_v33  ;;  %v719_v9 = vrot.slane %v700_v34, %v5044_v53  ;;  %v4654_v34 = vld [vmem:[%s6380_s1 + $0x8d4] ss:$8 sps:$4 sm:$0xff]  }
  0xcb   :  { %3243 = vmatpush1.bf16.msra.mxu0 %v4504_v36  ;;  %v4576_v36 = vld [vmem:[%s6380_s1 + $0x690] ss:$8 sps:$4 sm:$0xff]  }
  0xcc   :  { %3286 = vmatpush1.bf16.msra.mxu1 %v4507_v37  ;;  %3244 = vmatprep.subr.bf16.mxu0 %v4512_v38  ;;  %v4579_v37 = vld [vmem:[%s6380_s1 + $0x790] ss:$8 sps:$4 sm:$0xff]   ;;  %v4584_v38 = vld [vmem:[%s6380_s1 + $0x684] ss:$8 sps:$4 sm:$0xff]  }
  0xcd   :  { %3287 = vmatprep.subr.bf16.mxu1 %v4515_v39  ;;  %v747_v39 = vrot.slane %v704_v35, %v5044_v53  ;;  %v4657_v35 = vld [vmem:[%s6380_s1 + $0x9d4] ss:$8 sps:$4 sm:$0xff]  }
  0xcf   :  { %3245 = vmatpush1.bf16.msra.mxu0 %v4510_v40  ;;  %v4582_v40 = vld [vmem:[%s6380_s1 + $0x680] ss:$8 sps:$4 sm:$0xff]  }
  0xd0   :  { %3288 = vmatpush1.bf16.msra.mxu1 %v4513_v41  ;;  %3246 = vmatprep.subr.bf16.mxu0 %v4518_v42  ;;  %v4585_v41 = vld [vmem:[%s6380_s1 + $0x780] ss:$8 sps:$4 sm:$0xff]   ;;  %v4594_v42 = vld [vmem:[%s6380_s1 + $0x874] ss:$8 sps:$4 sm:$0xff]  }
  0xd1   :  { %3289 = vmatprep.subr.bf16.mxu1 %v4521_v43  ;;  %v4597_v43 = vld [vmem:[%s6380_s1 + $0x974] ss:$8 sps:$4 sm:$0xff]  }
  0xd3   :  { %3247 = vmatpush1.bf16.msra.mxu0 %v4516_v44  ;;  %v862_v44 = vrot.slane %v835_v1, %v5044_v53  ;;  %v4658_v1 = vld [vmem:[%s6380_s1 + $0x8c0] ss:$8 sps:$4 sm:$0xff]  }
  0xd4   :  { %3290 = vmatpush1.bf16.msra.mxu1 %v4519_v16  ;;  %3248 = vmatprep.subr.bf16.mxu0 %v4524_v17  ;;  %v890_v16 = vrot.slane %v839_v8, %v5044_v53  ;;  %v764_v17 = vcombine.low %v719_v9, %v747_v39  ;;  %v4661_v8 = vld [vmem:[%s6380_s1 + $0x9c0] ss:$8 sps:$4 sm:$0xff]  }
  0xd5   :  { %3291 = vmatprep.subr.bf16.mxu1 %v4527_v18  ;;  %v4592_v18 = vld [vmem:[%s6380_s1 + $0x870] ss:$8 sps:$4 sm:$0xff]  }
  0xd7   :  { %3249 = vmatpush1.bf16.msra.mxu0 %v4522_v19  ;;  %v765_v19 = vcombine.high %v719_v9, %v747_v39  ;;  %v4666_v9 = vld [vmem:[%s6380_s1 + $0x8b4] ss:$8 sps:$4 sm:$0xff]  }
  0xd8   :  { %3292 = vmatpush1.bf16.msra.mxu1 %v4525_v46  ;;  %3250 = vmatprep.subr.bf16.mxu0 %v4530_v47  ;;  %v4595_v46 = vld [vmem:[%s6380_s1 + $0x970] ss:$8 sps:$4 sm:$0xff]   ;;  %v4600_v47 = vld [vmem:[%s6380_s1 + $0x864] ss:$8 sps:$4 sm:$0xff]   ;;  %v4669_v39 = vld [vmem:[%s6380_s1 + $0x9b4] ss:$8 sps:$4 sm:$0xff]  }
  0xd9   :  { %3293 = vmatprep.subr.bf16.mxu1 %v4533_v48  ;;  %v4603_v48 = vld [vmem:[%s6380_s1 + $0x964] ss:$8 sps:$4 sm:$0xff]  }
  0xdb   :  { %3251 = vmatpush1.bf16.msra.mxu0 %v4528_v49  ;;  %v902_v49 = vcombine.low %v862_v44, %v890_v16 }
  0xdc   :  { %3294 = vmatpush1.bf16.msra.mxu1 %v4531_v50  ;;  %3252 = vmatprep.subr.bf16.mxu0 %v4536_v51  ;;  %v903_v50 = vcombine.high %v862_v44, %v890_v16  ;;  %v4598_v51 = vld [vmem:[%s6380_s1 + $0x860] ss:$8 sps:$4 sm:$0xff]   ;;  %v4792_v44 = vld [vmem:[%s6379_s0 + $0x14] ss:$25 sps:$4 sm:$0xff]  }
  0xdd   :  { %3295 = vmatprep.subr.bf16.mxu1 %v4539_v52  ;;  %v4601_v52 = vld [vmem:[%s6380_s1 + $0x960] ss:$8 sps:$4 sm:$0xff]  }
  0xde   :  { %v4793_v16 = vld [vmem:[%s6379_s0 + $0x46] ss:$25 sps:$4 sm:$0xff]  }
  0xdf   :  { %3253 = vmatpush1.bf16.msra.mxu0 %v4534_v54  ;;  %v4606_v54 = vld [vmem:[%s6380_s1 + $0x854] ss:$8 sps:$4 sm:$0xff]  }
  0xe0   :  { %3296 = vmatpush1.bf16.msra.mxu1 %v4537_v55  ;;  %3254 = vmatprep.subr.bf16.mxu0 %v4542_v56  ;;  %v4609_v55 = vld [vmem:[%s6380_s1 + $0x954] ss:$8 sps:$4 sm:$0xff]   ;;  %v4604_v56 = vld [vmem:[%s6380_s1 + $0x850] ss:$8 sps:$4 sm:$0xff]  }
  0xe1   :  { %3297 = vmatprep.subr.bf16.mxu1 %v4545_v58  ;;  %v4612_v58 = vld [vmem:[%s6380_s1 + $0x844] ss:$8 sps:$4 sm:$0xff]  }
  0xe3   :  { %3255 = vmatpush2.bf16.msra.mxu0 %v4540_v57  ;;  %v4607_v57 = vld [vmem:[%s6380_s1 + $0x950] ss:$8 sps:$4 sm:$0xff]  }
  0xe4   :  { %3298 = vmatpush2.bf16.msra.mxu1 %v4543_v59  ;;  %3256 = vmatprep.subr.bf16.mxu0 %v4548_v60  ;;  %v4615_v59 = vld [vmem:[%s6380_s1 + $0x944] ss:$8 sps:$4 sm:$0xff]   ;;  %v4610_v60 = vld [vmem:[%s6380_s1 + $0x840] ss:$8 sps:$4 sm:$0xff]  }
  0xe5   :  { %3299 = vmatprep.subr.bf16.mxu1 %v4551_v61  ;;  %v4613_v61 = vld [vmem:[%s6380_s1 + $0x940] ss:$8 sps:$4 sm:$0xff]  }
  0xe7   :  { %3257 = vmatpush2.bf16.msra.mxu0 %v4546_v62  ;;  %v4618_v62 = vld [vmem:[%s6380_s1 + $0x834] ss:$8 sps:$4 sm:$0xff]  }
  0xe8   :  { %3300 = vmatpush2.bf16.msra.mxu1 %v4549_v63  ;;  %3258 = vmatprep.subr.bf16.mxu0 %v4554_v2  ;;  %v4621_v63 = vld [vmem:[%s6380_s1 + $0x934] ss:$8 sps:$4 sm:$0xff]   ;;  %v4616_v2 = vld [vmem:[%s6380_s1 + $0x830] ss:$8 sps:$4 sm:$0xff]  }
  0xe9   :  { %3301 = vmatprep.subr.bf16.mxu1 %v4557_v3  ;;  %v4619_v3 = vld [vmem:[%s6380_s1 + $0x930] ss:$8 sps:$4 sm:$0xff]  }
  0xeb   :  { %3259 = vmatpush2.bf16.msra.mxu0 %v4552_v10  ;;  %v4624_v10 = vld [vmem:[%s6380_s1 + $0x824] ss:$8 sps:$4 sm:$0xff]  }
  0xec   :  { %3302 = vmatpush2.bf16.msra.mxu1 %v4555_v4  ;;  %3260 = vmatprep.subr.bf16.mxu0 %v4560_v5  ;;  %v4627_v4 = vld [vmem:[%s6380_s1 + $0x924] ss:$8 sps:$4 sm:$0xff]   ;;  %v4622_v5 = vld [vmem:[%s6380_s1 + $0x820] ss:$8 sps:$4 sm:$0xff]  }
  0xed   :  { %3303 = vmatprep.subr.bf16.mxu1 %v4563_v6  ;;  %v4625_v6 = vld [vmem:[%s6380_s1 + $0x920] ss:$8 sps:$4 sm:$0xff]  }
  0xef   :  { %3261 = vmatpush2.bf16.msra.mxu0 %v4558_v7  ;;  %v4630_v7 = vld [vmem:[%s6380_s1 + $0x814] ss:$8 sps:$4 sm:$0xff]  }
  0xf0   :  { %3304 = vmatpush2.bf16.msra.mxu1 %v4561_v11  ;;  %3262 = vmatprep.subr.bf16.mxu0 %v4566_v12  ;;  %v4633_v11 = vld [vmem:[%s6380_s1 + $0x914] ss:$8 sps:$4 sm:$0xff]   ;;  %v4628_v12 = vld [vmem:[%s6380_s1 + $0x810] ss:$8 sps:$4 sm:$0xff]  }
  0xf1   :  { %3305 = vmatprep.subr.bf16.mxu1 %v4569_v14  ;;  %v4636_v14 = vld [vmem:[%s6380_s1 + $0x804] ss:$8 sps:$4 sm:$0xff]  }
  0xf3   :  { %3263 = vmatpush2.bf16.msra.mxu0 %v4564_v13  ;;  %v4631_v13 = vld [vmem:[%s6380_s1 + $0x910] ss:$8 sps:$4 sm:$0xff]  }
  0xf4   :  { %3306 = vmatpush2.bf16.msra.mxu1 %v4567_v15  ;;  %3264 = vmatprep.subr.bf16.mxu0 %v4572_v20  ;;  %v4639_v15 = vld [vmem:[%s6380_s1 + $0x904] ss:$8 sps:$4 sm:$0xff]   ;;  %v4634_v20 = vld [vmem:[%s6380_s1 + $0x800] ss:$8 sps:$4 sm:$0xff]  }
  0xf5   :  { %3307 = vmatprep.subr.bf16.mxu1 %v4575_v21  ;;  %v4637_v21 = vld [vmem:[%s6380_s1 + $0x900] ss:$8 sps:$4 sm:$0xff]  }
  0xf7   :  { %3265 = vmatpush2.bf16.msra.mxu0 %v4570_v26  ;;  %v4648_v26 = vld [vmem:[%s6380_s1 + $0x8e4] ss:$8 sps:$4 sm:$0xff]  }
  0xf8   :  { %3308 = vmatpush2.bf16.msra.mxu1 %v4573_v27  ;;  %3266 = vmatprep.subr.bf16.mxu0 %v4578_v28  ;;  %v4651_v27 = vld [vmem:[%s6380_s1 + $0x9e4] ss:$8 sps:$4 sm:$0xff]   ;;  %v4646_v28 = vld [vmem:[%s6380_s1 + $0x8e0] ss:$8 sps:$4 sm:$0xff]  }
  0xf9   :  { %3309 = vmatprep.subr.bf16.mxu1 %v4581_v29  ;;  %v4649_v29 = vld [vmem:[%s6380_s1 + $0x9e0] ss:$8 sps:$4 sm:$0xff]  }
  0xfb   :  { %3267 = vmatpush2.bf16.msra.mxu0 %v4576_v36  ;;  %v4652_v36 = vld [vmem:[%s6380_s1 + $0x8d0] ss:$8 sps:$4 sm:$0xff]  }
  0xfc   :  { %3310 = vmatpush2.bf16.msra.mxu1 %v4579_v37  ;;  %3268 = vmatprep.subr.bf16.mxu0 %v4584_v38  ;;  %v4655_v37 = vld [vmem:[%s6380_s1 + $0x9d0] ss:$8 sps:$4 sm:$0xff]   ;;  %v4660_v38 = vld [vmem:[%s6380_s1 + $0x8c4] ss:$8 sps:$4 sm:$0xff]  }
  0xfd   :  { %3311 = vmatprep.subr.bf16.mxu1 %v4587_v0  ;;  %v4663_v0 = vld [vmem:[%s6380_s1 + $0x9c4] ss:$8 sps:$4 sm:$0xff]  }
  0xff   :  { %3269 = vmatpush2.bf16.msra.mxu0 %v4582_v40  ;;  %v4664_v40 = vld [vmem:[%s6380_s1 + $0x8b0] ss:$8 sps:$4 sm:$0xff]  }
 0x100   :  { %3312 = vmatpush2.bf16.msra.mxu1 %v4585_v41  ;;  %3324 = vmatprep.subr.bf16.mxu0 %v4594_v42  ;;  %v4667_v41 = vld [vmem:[%s6380_s1 + $0x9b0] ss:$8 sps:$4 sm:$0xff]   ;;  %v4672_v42 = vld [vmem:[%s6380_s1 + $0x8a4] ss:$8 sps:$4 sm:$0xff]  }
 0x101   :  { %3367 = vmatprep.subr.bf16.mxu1 %v4597_v43  ;;  %v4675_v43 = vld [vmem:[%s6380_s1 + $0x9a4] ss:$8 sps:$4 sm:$0xff]  }
 0x102   :  { %3271 = vmatmul.mubr.bf16.vlgmr.msra.gmra.mxu0 %v764_v17  ;;  %v4794_v17 = vld [vmem:[%s6379_s0 + $0x78] ss:$25 sps:$4 sm:$0xff]  }
 0x103   :  { %3325 = vmatpush1.bf16.msra.mxu0 %v4592_v18  ;;  %3314 = vmatmul.mubr.bf16.vlgmr.msra.gmra.mxu1 %v765_v19  ;;  %v4795_v18 = vld [vmem:[%s6379_s0 + $0xaa] ss:$25 sps:$4 sm:$0xff]  }
 0x104   :  { %3368 = vmatpush1.bf16.msra.mxu1 %v4595_v46  ;;  %3326 = vmatprep.subr.bf16.mxu0 %v4600_v47  ;;  %v4670_v19 = vld [vmem:[%s6380_s1 + $0x8a0] ss:$8 sps:$4 sm:$0xff]   ;;  %v4678_v47 = vld [vmem:[%s6380_s1 + $0x894] ss:$8 sps:$4 sm:$0xff]  }
 0x105   :  { %3369 = vmatprep.subr.bf16.mxu1 %v4603_v48  ;;  %3356 = vmatprep.mubr.bf16.mxu0 %v902_v49  ;;  %v4673_v46 = vld [vmem:[%s6380_s1 + $0x9a0] ss:$8 sps:$4 sm:$0xff]   ;;  %v4681_v48 = vld [vmem:[%s6380_s1 + $0x994] ss:$8 sps:$4 sm:$0xff]   ;;  %v6015_v49 = vrot.slane %v4792_v44, %v5044_v53 }
 0x106   :  { %3399 = vmatprep.mubr.bf16.mxu1 %v903_v50  ;;  %v6018_v50 = vrot.slane %v4793_v16, %v5044_v53  ;;  %v4746_v44 = vld [vmem:[%s6380_s1 + $0xaf4] ss:$8 sps:$4 sm:$0xff]  }
 0x107   :  { %3327 = vmatpush1.bf16.msra.mxu0 %v4598_v51  ;;  %v6021_v51 = vrot.slane %v4794_v17, %v5044_v53  ;;  %v4749_v16 = vld [vmem:[%s6380_s1 + $0xbf4] ss:$8 sps:$4 sm:$0xff]   ;;  %v4744_v17 = vld [vmem:[%s6380_s1 + $0xaf0] ss:$8 sps:$4 sm:$0xff]  }
 0x108   :  { %3370 = vmatpush1.bf16.msra.mxu1 %v4601_v52  ;;  %3328 = vmatprep.subr.bf16.mxu0 %v4606_v54  ;;  %v6024_v52 = vrot.slane %v4795_v18, %v5044_v53  ;;  %v834_v54 = vcombine.low %v5787_v30, %v5790_v31  ;;  %v4687_v30 = vld [vmem:[%s6380_s1 + $0x984] ss:$8 sps:$4 sm:$0xff]   ;;  %v837_v31 = vcombine.high %v6015_v49, %v6018_v50  ;;  %v4747_v18 = vld [vmem:[%s6380_s1 + $0xbf0] ss:$8 sps:$4 sm:$0xff]  }
 0x109   :  { %3371 = vmatprep.subr.bf16.mxu1 %v4609_v55  ;;  %v838_v55 = vcombine.low %v5793_v32, %v5796_v33 }
 0x10a   :  { %v841_v32 = vcombine.high %v6021_v51, %v6024_v52  ;;  %v848_v33 = vrot.slane %v834_v54, %v5044_v53  ;;  %v4758_v54 = vld [vmem:[%s6380_s1 + $0xad4] ss:$8 sps:$4 sm:$0xff]  }
 0x10b   :  { %3329 = vmatpush1.bf16.msra.mxu0 %v4604_v56  ;;  %v4676_v56 = vld [vmem:[%s6380_s1 + $0x890] ss:$8 sps:$4 sm:$0xff]  }
 0x10c   :  { %3372 = vmatpush1.bf16.msra.mxu1 %v4607_v57  ;;  %3330 = vmatprep.subr.bf16.mxu0 %v4612_v58  ;;  %v4679_v57 = vld [vmem:[%s6380_s1 + $0x990] ss:$8 sps:$4 sm:$0xff]   ;;  %v4684_v58 = vld [vmem:[%s6380_s1 + $0x884] ss:$8 sps:$4 sm:$0xff]  }
 0x10d   :  { %3373 = vmatprep.subr.bf16.mxu1 %v4615_v59  ;;  %v876_v59 = vrot.slane %v838_v55, %v5044_v53  ;;  %v4761_v55 = vld [vmem:[%s6380_s1 + $0xbd4] ss:$8 sps:$4 sm:$0xff]  }
 0x10f   :  { %3331 = vmatpush1.bf16.msra.mxu0 %v4610_v60  ;;  %v4682_v60 = vld [vmem:[%s6380_s1 + $0x880] ss:$8 sps:$4 sm:$0xff]  }
 0x110   :  { %3374 = vmatpush1.bf16.msra.mxu1 %v4613_v61  ;;  %3332 = vmatprep.subr.bf16.mxu0 %v4618_v62  ;;  %v4685_v61 = vld [vmem:[%s6380_s1 + $0x980] ss:$8 sps:$4 sm:$0xff]   ;;  %v4698_v62 = vld [vmem:[%s6380_s1 + $0xa74] ss:$8 sps:$4 sm:$0xff]  }
 0x111   :  { %3375 = vmatprep.subr.bf16.mxu1 %v4621_v63  ;;  %v4701_v63 = vld [vmem:[%s6380_s1 + $0xb74] ss:$8 sps:$4 sm:$0xff]  }
 0x113   :  { %3333 = vmatpush1.bf16.msra.mxu0 %v4616_v2  ;;  %v869_v2 = vrot.slane %v837_v31, %v5044_v53  ;;  %v4762_v31 = vld [vmem:[%s6380_s1 + $0xac0] ss:$8 sps:$4 sm:$0xff]  }
 0x114   :  { %3376 = vmatpush1.bf16.msra.mxu1 %v4619_v3  ;;  %3334 = vmatprep.subr.bf16.mxu0 %v4624_v10  ;;  %v897_v3 = vrot.slane %v841_v32, %v5044_v53  ;;  %v898_v10 = vcombine.low %v848_v33, %v876_v59  ;;  %v4765_v32 = vld [vmem:[%s6380_s1 + $0xbc0] ss:$8 sps:$4 sm:$0xff]  }
 0x115   :  { %3377 = vmatprep.subr.bf16.mxu1 %v4627_v4  ;;  %v4696_v4 = vld [vmem:[%s6380_s1 + $0xa70] ss:$8 sps:$4 sm:$0xff]  }
 0x117   :  { %3335 = vmatpush1.bf16.msra.mxu0 %v4622_v5  ;;  %v899_v5 = vcombine.high %v848_v33, %v876_v59  ;;  %v4770_v33 = vld [vmem:[%s6380_s1 + $0xab4] ss:$8 sps:$4 sm:$0xff]  }
 0x118   :  { %3378 = vmatpush1.bf16.msra.mxu1 %v4625_v6  ;;  %3336 = vmatprep.subr.bf16.mxu0 %v4630_v7  ;;  %v4699_v6 = vld [vmem:[%s6380_s1 + $0xb70] ss:$8 sps:$4 sm:$0xff]   ;;  %v4704_v7 = vld [vmem:[%s6380_s1 + $0xa64] ss:$8 sps:$4 sm:$0xff]   ;;  %v4773_v59 = vld [vmem:[%s6380_s1 + $0xbb4] ss:$8 sps:$4 sm:$0xff]  }
 0x119   :  { %3379 = vmatprep.subr.bf16.mxu1 %v4633_v11  ;;  %v4707_v11 = vld [vmem:[%s6380_s1 + $0xb64] ss:$8 sps:$4 sm:$0xff]  }
 0x11b   :  { %3337 = vmatpush1.bf16.msra.mxu0 %v4628_v12  ;;  %v904_v12 = vcombine.low %v869_v2, %v897_v3 }
 0x11c   :  { %3380 = vmatpush1.bf16.msra.mxu1 %v4631_v13  ;;  %3338 = vmatprep.subr.bf16.mxu0 %v4636_v14  ;;  %v905_v13 = vcombine.high %v869_v2, %v897_v3  ;;  %v4702_v14 = vld [vmem:[%s6380_s1 + $0xa60] ss:$8 sps:$4 sm:$0xff]  }
 0x11d   :  { %3381 = vmatprep.subr.bf16.mxu1 %v4639_v15  ;;  %v4705_v15 = vld [vmem:[%s6380_s1 + $0xb60] ss:$8 sps:$4 sm:$0xff]  }
 0x11e   :  { %v4774_v2 = vld [vmem:[%s6380_s1 + $0xaa0] ss:$8 sps:$4 sm:$0xff]  }
 0x11f   :  { %3339 = vmatpush1.bf16.msra.mxu0 %v4634_v20  ;;  %v4710_v20 = vld [vmem:[%s6380_s1 + $0xa54] ss:$8 sps:$4 sm:$0xff]   ;;  %v4777_v3 = vld [vmem:[%s6380_s1 + $0xba0] ss:$8 sps:$4 sm:$0xff]  }
 0x120   :  { %3382 = vmatpush1.bf16.msra.mxu1 %v4637_v21  ;;  %3340 = vmatprep.subr.bf16.mxu0 %v4642_v22  ;;  %v4713_v21 = vld [vmem:[%s6380_s1 + $0xb54] ss:$8 sps:$4 sm:$0xff]   ;;  %v4708_v22 = vld [vmem:[%s6380_s1 + $0xa50] ss:$8 sps:$4 sm:$0xff]  }
 0x121   :  { %3383 = vmatprep.subr.bf16.mxu1 %v4645_v23  ;;  %v4711_v23 = vld [vmem:[%s6380_s1 + $0xb50] ss:$8 sps:$4 sm:$0xff]  }
 0x123   :  { %3341 = vmatpush2.bf16.msra.mxu0 %v4640_v24  ;;  %v4716_v24 = vld [vmem:[%s6380_s1 + $0xa44] ss:$8 sps:$4 sm:$0xff]  }
 0x124   :  { %3384 = vmatpush2.bf16.msra.mxu1 %v4643_v25  ;;  %3342 = vmatprep.subr.bf16.mxu0 %v4648_v26  ;;  %v4719_v25 = vld [vmem:[%s6380_s1 + $0xb44] ss:$8 sps:$4 sm:$0xff]   ;;  %v4714_v26 = vld [vmem:[%s6380_s1 + $0xa40] ss:$8 sps:$4 sm:$0xff]  }
 0x125   :  { %3385 = vmatprep.subr.bf16.mxu1 %v4651_v27  ;;  %v4717_v27 = vld [vmem:[%s6380_s1 + $0xb40] ss:$8 sps:$4 sm:$0xff]  }
 0x127   :  { %3343 = vmatpush2.bf16.msra.mxu0 %v4646_v28  ;;  %v4722_v28 = vld [vmem:[%s6380_s1 + $0xa34] ss:$8 sps:$4 sm:$0xff]  }
 0x128   :  { %3386 = vmatpush2.bf16.msra.mxu1 %v4649_v29  ;;  %3344 = vmatprep.subr.bf16.mxu0 %v4654_v34  ;;  %v4725_v29 = vld [vmem:[%s6380_s1 + $0xb34] ss:$8 sps:$4 sm:$0xff]   ;;  %v4720_v34 = vld [vmem:[%s6380_s1 + $0xa30] ss:$8 sps:$4 sm:$0xff]  }
 0x129   :  { %3387 = vmatprep.subr.bf16.mxu1 %v4657_v35  ;;  %v4723_v35 = vld [vmem:[%s6380_s1 + $0xb30] ss:$8 sps:$4 sm:$0xff]  }
 0x12b   :  { %3345 = vmatpush2.bf16.msra.mxu0 %v4652_v36  ;;  %v4728_v36 = vld [vmem:[%s6380_s1 + $0xa24] ss:$8 sps:$4 sm:$0xff]  }
 0x12c   :  { %3388 = vmatpush2.bf16.msra.mxu1 %v4655_v37  ;;  %3346 = vmatprep.subr.bf16.mxu0 %v4660_v38  ;;  %v4731_v37 = vld [vmem:[%s6380_s1 + $0xb24] ss:$8 sps:$4 sm:$0xff]   ;;  %v4726_v38 = vld [vmem:[%s6380_s1 + $0xa20] ss:$8 sps:$4 sm:$0xff]  }
 0x12d   :  { %3389 = vmatprep.subr.bf16.mxu1 %v4663_v0  ;;  %v4729_v0 = vld [vmem:[%s6380_s1 + $0xb20] ss:$8 sps:$4 sm:$0xff]  }
 0x12f   :  { %3347 = vmatpush2.bf16.msra.mxu0 %v4658_v1  ;;  %v4734_v1 = vld [vmem:[%s6380_s1 + $0xa14] ss:$8 sps:$4 sm:$0xff]  }
 0x130   :  { %3390 = vmatpush2.bf16.msra.mxu1 %v4661_v8  ;;  %3348 = vmatprep.subr.bf16.mxu0 %v4666_v9  ;;  %v4737_v8 = vld [vmem:[%s6380_s1 + $0xb14] ss:$8 sps:$4 sm:$0xff]   ;;  %v4732_v9 = vld [vmem:[%s6380_s1 + $0xa10] ss:$8 sps:$4 sm:$0xff]  }
 0x131   :  { %3391 = vmatprep.subr.bf16.mxu1 %v4669_v39  ;;  %v4735_v39 = vld [vmem:[%s6380_s1 + $0xb10] ss:$8 sps:$4 sm:$0xff]  }
 0x133   :  { %3349 = vmatpush2.bf16.msra.mxu0 %v4664_v40  ;;  %v4740_v40 = vld [vmem:[%s6380_s1 + $0xa04] ss:$8 sps:$4 sm:$0xff]  }
 0x134   :  { %3392 = vmatpush2.bf16.msra.mxu1 %v4667_v41  ;;  %3350 = vmatprep.subr.bf16.mxu0 %v4672_v42  ;;  %v4743_v41 = vld [vmem:[%s6380_s1 + $0xb04] ss:$8 sps:$4 sm:$0xff]   ;;  %v4738_v42 = vld [vmem:[%s6380_s1 + $0xa00] ss:$8 sps:$4 sm:$0xff]  }
 0x135   :  { %3393 = vmatprep.subr.bf16.mxu1 %v4675_v43  ;;  %v4741_v43 = vld [vmem:[%s6380_s1 + $0xb00] ss:$8 sps:$4 sm:$0xff]  }
 0x137   :  { %3351 = vmatpush2.bf16.msra.mxu0 %v4670_v19  ;;  %v4752_v19 = vld [vmem:[%s6380_s1 + $0xae4] ss:$8 sps:$4 sm:$0xff]  }
 0x138   :  { %3394 = vmatpush2.bf16.msra.mxu1 %v4673_v46  ;;  %3352 = vmatprep.subr.bf16.mxu0 %v4678_v47  ;;  %v4755_v46 = vld [vmem:[%s6380_s1 + $0xbe4] ss:$8 sps:$4 sm:$0xff]   ;;  %v4750_v47 = vld [vmem:[%s6380_s1 + $0xae0] ss:$8 sps:$4 sm:$0xff]  }
 0x139   :  { %3395 = vmatprep.subr.bf16.mxu1 %v4681_v48  ;;  %v4753_v48 = vld [vmem:[%s6380_s1 + $0xbe0] ss:$8 sps:$4 sm:$0xff]  }
 0x13b   :  { %3353 = vmatpush2.bf16.msra.mxu0 %v4676_v56  ;;  %v4756_v56 = vld [vmem:[%s6380_s1 + $0xad0] ss:$8 sps:$4 sm:$0xff]  }
 0x13c   :  { %3396 = vmatpush2.bf16.msra.mxu1 %v4679_v57  ;;  %3354 = vmatprep.subr.bf16.mxu0 %v4684_v58  ;;  %v4759_v57 = vld [vmem:[%s6380_s1 + $0xbd0] ss:$8 sps:$4 sm:$0xff]   ;;  %v4764_v58 = vld [vmem:[%s6380_s1 + $0xac4] ss:$8 sps:$4 sm:$0xff]  }
 0x13d   :  { %3397 = vmatprep.subr.bf16.mxu1 %v4687_v30  ;;  %v4767_v30 = vld [vmem:[%s6380_s1 + $0xbc4] ss:$8 sps:$4 sm:$0xff]  }
 0x13f   :  { %3355 = vmatpush2.bf16.msra.mxu0 %v4682_v60  ;;  %v4768_v60 = vld [vmem:[%s6380_s1 + $0xab0] ss:$8 sps:$4 sm:$0xff]  }
 0x140   :  { %3398 = vmatpush2.bf16.msra.mxu1 %v4685_v61  ;;  %3410 = vmatprep.subr.bf16.mxu0 %v4698_v62  ;;  %v4771_v61 = vld [vmem:[%s6380_s1 + $0xbb0] ss:$8 sps:$4 sm:$0xff]   ;;  %v4776_v62 = vld [vmem:[%s6380_s1 + $0xaa4] ss:$8 sps:$4 sm:$0xff]  }
 0x141   :  { %3453 = vmatprep.subr.bf16.mxu1 %v4701_v63  ;;  %v4779_v63 = vld [vmem:[%s6380_s1 + $0xba4] ss:$8 sps:$4 sm:$0xff]  }
 0x142   :  { %3357 = vmatmul.mubr.bf16.vlgmr.msra.gmra.mxu0 %v898_v10  ;;  %v4782_v10 = vld [vmem:[%s6380_s1 + $0xa94] ss:$8 sps:$4 sm:$0xff]  }
 0x143   :  { %3411 = vmatpush1.bf16.msra.mxu0 %v4696_v4  ;;  %3400 = vmatmul.mubr.bf16.vlgmr.msra.gmra.mxu1 %v899_v5  ;;  %v4785_v4 = vld [vmem:[%s6380_s1 + $0xb94] ss:$8 sps:$4 sm:$0xff]   ;;  %v836_v5 = vcombine.low %v6015_v49, %v6018_v50  ;;  %v4791_v49 = vld [vmem:[%s6380_s1 + $0xb84] ss:$8 sps:$4 sm:$0xff]  }
 0x144   :  { %3454 = vmatpush1.bf16.msra.mxu1 %v4699_v6  ;;  %3412 = vmatprep.subr.bf16.mxu0 %v4704_v7  ;;  %v840_v6 = vcombine.low %v6021_v51, %v6024_v52  ;;  %v4780_v7 = vld [vmem:[%s6380_s1 + $0xa90] ss:$8 sps:$4 sm:$0xff]   ;;  %v4786_v52 = vld [vmem:[%s6380_s1 + $0xa80] ss:$8 sps:$4 sm:$0xff]  }
 0x145   :  { %3455 = vmatprep.subr.bf16.mxu1 %v4707_v11  ;;  %3442 = vmatprep.mubr.bf16.mxu0 %v904_v12  ;;  %v4783_v11 = vld [vmem:[%s6380_s1 + $0xb90] ss:$8 sps:$4 sm:$0xff]   ;;  %v4788_v12 = vld [vmem:[%s6380_s1 + $0xa84] ss:$8 sps:$4 sm:$0xff]   ;;  %v855_v50 = vrot.slane %v836_v5, %v5044_v53 }
 0x146   :  { %3485 = vmatprep.mubr.bf16.mxu1 %v905_v13  ;;  %v883_v51 = vrot.slane %v840_v6, %v5044_v53  ;;  %v4789_v13 = vld [vmem:[%s6380_s1 + $0xb80] ss:$8 sps:$4 sm:$0xff]  }
 0x147   :  { %3413 = vmatpush1.bf16.msra.mxu0 %v4702_v14  ;;  %v4798_v14 = vld [vmem:[%s6380_s1 + $0xc74] ss:$8 sps:$4 sm:$0xff]  }
 0x148   :  { %3456 = vmatpush1.bf16.msra.mxu1 %v4705_v15  ;;  %3414 = vmatprep.subr.bf16.mxu0 %v4710_v20  ;;  %v900_v15 = vcombine.low %v855_v50, %v883_v51  ;;  %v4796_v20 = vld [vmem:[%s6380_s1 + $0xc70] ss:$8 sps:$4 sm:$0xff]  }
 0x149   :  { %3457 = vmatprep.subr.bf16.mxu1 %v4713_v21  ;;  %v901_v21 = vcombine.high %v855_v50, %v883_v51 }
 0x14b   :  { %3415 = vmatpush1.bf16.msra.mxu0 %v4708_v22  ;;  %v4801_v22 = vld [vmem:[%s6380_s1 + $0xc64] ss:$8 sps:$4 sm:$0xff]  }
 0x14c   :  { %3458 = vmatpush1.bf16.msra.mxu1 %v4711_v23  ;;  %3416 = vmatprep.subr.bf16.mxu0 %v4716_v24  ;;  %v4799_v23 = vld [vmem:[%s6380_s1 + $0xc60] ss:$8 sps:$4 sm:$0xff]   ;;  %v4804_v24 = vld [vmem:[%s6380_s1 + $0xc54] ss:$8 sps:$4 sm:$0xff]  }
 0x14d   :  { %3459 = vmatprep.subr.bf16.mxu1 %v4719_v25  ;;  %v4863_v25 = vmov 0  }
 0x14f   :  { %3417 = vmatpush1.bf16.msra.mxu0 %v4714_v26  ;;  %v4802_v26 = vld [vmem:[%s6380_s1 + $0xc50] ss:$8 sps:$4 sm:$0xff]  }
 0x150   :  { %3460 = vmatpush1.bf16.msra.mxu1 %v4717_v27  ;;  %3418 = vmatprep.subr.bf16.mxu0 %v4722_v28  ;;  %v4807_v27 = vld [vmem:[%s6380_s1 + $0xc44] ss:$8 sps:$4 sm:$0xff]   ;;  %v4805_v28 = vld [vmem:[%s6380_s1 + $0xc40] ss:$8 sps:$4 sm:$0xff]  }
 0x151   :  { %3461 = vmatprep.subr.bf16.mxu1 %v4725_v29  ;;  %v4810_v29 = vld [vmem:[%s6380_s1 + $0xc34] ss:$8 sps:$4 sm:$0xff]  }
 0x153   :  { %3419 = vmatpush1.bf16.msra.mxu0 %v4720_v34  ;;  %v4820_v34 = vld [vmem:[%s6379_s0 + $0x18] ss:$25 sps:$4 sm:$0x11]  }
 0x154   :  { %3462 = vmatpush1.bf16.msra.mxu1 %v4723_v35  ;;  %3420 = vmatprep.subr.bf16.mxu0 %v4728_v36  ;;  %v4821_v35 = vld [vmem:[%s6379_s0 + $0x4a] ss:$25 sps:$4 sm:$0x11]   ;;  %v4822_v36 = vld [vmem:[%s6379_s0 + $0x7c] ss:$25 sps:$4 sm:$0x11]  }
 0x155   :  { %3463 = vmatprep.subr.bf16.mxu1 %v4731_v37  ;;  %v4823_v37 = vld [vmem:[%s6379_s0 + $0xae] ss:$25 sps:$4 sm:$0x11]  }
 0x157   :  { %3421 = vmatpush1.bf16.msra.mxu0 %v4726_v38  ;;  %v4808_v38 = vld [vmem:[%s6380_s1 + $0xc30] ss:$8 sps:$4 sm:$0xff]  }
 0x158   :  { %3464 = vmatpush1.bf16.msra.mxu1 %v4729_v0  ;;  %3422 = vmatprep.subr.bf16.mxu0 %v4734_v1  ;;  %v4813_v0 = vld [vmem:[%s6380_s1 + $0xc24] ss:$8 sps:$4 sm:$0xff]   ;;  %v916_v1 = vrot.slane %v4820_v34, %v5044_v53  ;;  %v458_v34 = vsub.s32 0, %v5023_v45 }
 0x159   :  { %3465 = vmatprep.subr.bf16.mxu1 %v4737_v8  ;;  %v923_v8 = vrot.slane %v4821_v35, %v5044_v53 }
 0x15b   :  { %3423 = vmatpush1.bf16.msra.mxu0 %v4732_v9  ;;  %v930_v9 = vrot.slane %v4822_v36, %v5044_v53 }
 0x15c   :  { %3466 = vmatpush1.bf16.msra.mxu1 %v4735_v39  ;;  %3424 = vmatprep.subr.bf16.mxu0 %v4740_v40  ;;  %v937_v39 = vrot.slane %v4823_v37, %v5044_v53  ;;  %v4811_v40 = vld [vmem:[%s6380_s1 + $0xc20] ss:$8 sps:$4 sm:$0xff]  }
 0x15d   :  { %3467 = vmatprep.subr.bf16.mxu1 %v4743_v41  ;;  %v4816_v41 = vld [vmem:[%s6380_s1 + $0xc14] ss:$8 sps:$4 sm:$0xff]  }
 0x15f   :  { %3425 = vmatpush1.bf16.msra.mxu0 %v4738_v42  ;;  %v938_v42 = vcombine.low %v916_v1, %v923_v8 }
 0x160   :  { %3468 = vmatpush1.bf16.msra.mxu1 %v4741_v43  ;;  %3426 = vmatprep.subr.bf16.mxu0 %v4746_v44  ;;  %v939_v43 = vcombine.low %v930_v9, %v937_v39  ;;  %v4814_v44 = vld [vmem:[%s6380_s1 + $0xc10] ss:$8 sps:$4 sm:$0xff]  }
 0x161   :  { %3469 = vmatprep.subr.bf16.mxu1 %v4749_v16  ;;  %v4819_v16 = vld [vmem:[%s6380_s1 + $0xc04] ss:$8 sps:$4 sm:$0xff]  }
 0x163   :  { %3427 = vmatpush2.bf16.msra.mxu0 %v4744_v17  ;;  %v946_v17 = vrot.slane %v938_v42, %v5044_v53 }
 0x164   :  { %3470 = vmatpush2.bf16.msra.mxu1 %v4747_v18  ;;  %3428 = vmatprep.subr.bf16.mxu0 %v4752_v19  ;;  %v953_v18 = vrot.slane %v939_v43, %v5044_v53  ;;  %v4817_v19 = vld [vmem:[%s6380_s1 + $0xc00] ss:$8 sps:$4 sm:$0xff]   ;;  %v4826_v53 = vld [vmem:[%s6382_s3 + $0x70] sm:$0xff]  }
 0x165   :  { %3471 = vmatprep.subr.bf16.mxu1 %v4755_v46 }
 0x166   :  { %v954_v46 = vcombine.low %v946_v17, %v953_v18 }
 0x167   :  { %3429 = vmatpush2.bf16.msra.mxu0 %v4750_v47  ;;  %v4824_v47 = vld [vmem:[%s6382_s3 + $0x78] sm:$0xff]  }
 0x168   :  { %3472 = vmatpush2.bf16.msra.mxu1 %v4753_v48  ;;  %3430 = vmatprep.subr.bf16.mxu0 %v4758_v54  ;;  %v4825_v48 = vld [vmem:[%s6382_s3 + $0x38] sm:$0xff]   ;;  %v4827_v54 = vld [vmem:[%s6382_s3 + $0x30] sm:$0xff]  }
 0x169   :  { %3473 = vmatprep.subr.bf16.mxu1 %v4761_v55  ;;  %v4828_v55 = vld [vmem:[%s6382_s3 + $0x68] sm:$0xff]  }
 0x16b   :  { %3431 = vmatpush2.bf16.msra.mxu0 %v4756_v56  ;;  %v4829_v56 = vld [vmem:[%s6382_s3 + $0x28] sm:$0xff]  }
 0x16c   :  { %3474 = vmatpush2.bf16.msra.mxu1 %v4759_v57  ;;  %3432 = vmatprep.subr.bf16.mxu0 %v4764_v58  ;;  %v4830_v57 = vld [vmem:[%s6382_s3 + $0x60] sm:$0xff]  }
 0x16d   :  { %3475 = vmatprep.subr.bf16.mxu1 %v4767_v30  ;;  %v4831_v58 = vld [vmem:[%s6382_s3 + $0x20] sm:$0xff]   ;;  %v4832_v30 = vld [vmem:[%s6382_s3 + $0x58] sm:$0xff]  }
 0x16f   :  { %3433 = vmatpush2.bf16.msra.mxu0 %v4762_v31  ;;  %v4833_v31 = vld [vmem:[%s6382_s3 + $0x18] sm:$0xff]  }
 0x170   :  { %3476 = vmatpush2.bf16.msra.mxu1 %v4765_v32  ;;  %3434 = vmatprep.subr.bf16.mxu0 %v4770_v33  ;;  %v4834_v32 = vld [vmem:[%s6382_s3 + $0x50] sm:$0xff]  }
 0x171   :  { %3477 = vmatprep.subr.bf16.mxu1 %v4773_v59  ;;  %v4835_v33 = vld [vmem:[%s6382_s3 + $0x10] sm:$0xff]   ;;  %v4836_v59 = vld [vmem:[%s6382_s3 + $0x48] sm:$0xff]  }
 0x173   :  { %3435 = vmatpush2.bf16.msra.mxu0 %v4768_v60  ;;  %v4837_v60 = vld [vmem:[%s6382_s3 + $0x8] sm:$0xff]  }
 0x174   :  { %3478 = vmatpush2.bf16.msra.mxu1 %v4771_v61  ;;  %3436 = vmatprep.subr.bf16.mxu0 %v4776_v62  ;;  %v4838_v61 = vld [vmem:[%s6382_s3 + $0x40] sm:$0xff]  }
 0x175   :  { %3479 = vmatprep.subr.bf16.mxu1 %v4779_v63  ;;  %v4839_v62 = vld [vmem:[%s6382_s3] sm:$0xff]   ;;  %v3014_v63 = vpop.f32.mrf.mxu0 }
 0x177   :  { %3437 = vmatpush2.bf16.msra.mxu0 %v4774_v2  ;;  %v3016_v2 = vpop.f32.mrf.mxu0 }
 0x178   :  { %3480 = vmatpush2.bf16.msra.mxu1 %v4777_v3  ;;  %3438 = vmatprep.subr.bf16.mxu0 %v4782_v10  ;;  %v3057_v3 = vpop.f32.mrf.mxu1 }
 0x179   :  { %3481 = vmatprep.subr.bf16.mxu1 %v4785_v4  ;;  %v3018_v10 = vpop.f32.mrf.mxu0 }
 0x17a   :  { %v3059_v4 = vpop.f32.mrf.mxu1 }
 0x17b   :  { %3439 = vmatpush2.bf16.msra.mxu0 %v4780_v7  ;;  %v3020_v5 = vpop.f32.mrf.mxu0 }
 0x17c   :  { %3482 = vmatpush2.bf16.msra.mxu1 %v4783_v11  ;;  %3440 = vmatprep.subr.bf16.mxu0 %v4788_v12  ;;  %v3061_v6 = vpop.f32.mrf.mxu1 }
 0x17d   :  { %3483 = vmatprep.subr.bf16.mxu1 %v4791_v49  ;;  %v3100_v7 = vpop.f32.mrf.mxu0 }
 0x17e   :  { %v3063_v11 = vpop.f32.mrf.mxu1 }
 0x17f   :  { %3441 = vmatpush2.bf16.msra.mxu0 %v4786_v52  ;;  %v3102_v12 = vpop.f32.mrf.mxu0 }
 0x180   :  { %3484 = vmatpush2.bf16.msra.mxu1 %v4789_v13  ;;  %3496 = vmatprep.subr.bf16.mxu0 %v4798_v14  ;;  %v3143_v49 = vpop.f32.mrf.mxu1 }
 0x181   :  { %4157 = vmatprep.subr.bf16.mxu1 %v4824_v47  ;;  %v3104_v50 = vpop.f32.mrf.mxu0 }
 0x182   :  { %3443 = vmatmul.mubr.bf16.vlgmr.msra.gmra.mxu0 %v900_v15  ;;  %v3145_v51 = vpop.f32.mrf.mxu1 }
 0x183   :  { %3497 = vmatpush1.bf16.msra.mxu0 %v4796_v20  ;;  %3486 = vmatmul.mubr.bf16.vlgmr.msra.gmra.mxu1 %v901_v21  ;;  %v3106_v52 = vpop.f32.mrf.mxu0 }
 0x184   :  { %3498 = vmatprep.subr.bf16.mxu0 %v4801_v22  ;;  %3528 = vmatprep.mubr.bf16.mxu0 %v4863_v25  ;;  %v3147_v13 = vpop.f32.mrf.mxu1 }
 0x185   :  { %4158 = vmatpush3.bf16.msra.mxu1 %v4825_v48  ;;  %v3186_v14 = vpop.f32.mrf.mxu0 }
 0x186   :  { %4159 = vmatprep.subr.bf16.mxu1 %v4826_v53  ;;  %v3149_v15 = vpop.f32.mrf.mxu1 }
 0x187   :  { %3499 = vmatpush1.bf16.msra.mxu0 %v4799_v23  ;;  %v3188_v20 = vpop.f32.mrf.mxu0 }
 0x188   :  { %3500 = vmatprep.subr.bf16.mxu0 %v4804_v24  ;;  %v3229_v21 = vpop.f32.mrf.mxu1 }
 0x189   :  { %4160 = vmatpush3.bf16.msra.mxu1 %v4827_v54  ;;  %v3190_v22 = vpop.f32.mrf.mxu0 }
 0x18a   :  { %4161 = vmatprep.subr.bf16.mxu1 %v4828_v55  ;;  %v3231_v23 = vpop.f32.mrf.mxu1 }
 0x18b   :  { %3501 = vmatpush1.bf16.msra.mxu0 %v4802_v26  ;;  %v3192_v24 = vpop.f32.mrf.mxu0 }
 0x18c   :  { %3502 = vmatprep.subr.bf16.mxu0 %v4807_v27  ;;  %v3233_v25 = vpop.f32.mrf.mxu1 }
 0x18d   :  { %4162 = vmatpush3.bf16.msra.mxu1 %v4829_v56 }
 0x18e   :  { %4163 = vmatprep.subr.bf16.mxu1 %v4830_v57  ;;  %v3235_v27 = vpop.f32.mrf.mxu1 }
 0x18f   :  { %3503 = vmatpush1.bf16.msra.mxu0 %v4805_v28  ;;  %v462_v28 = vsub.s32 1, %v5023_v45 }
 0x190   :  { %3504 = vmatprep.subr.bf16.mxu0 %v4810_v29  ;;  %v454_v29 = vld [vmem:[%s6381_s2] sm:$0x3] }
 0x191   :  { %4164 = vmatpush3.bf16.msra.mxu1 %v4831_v58  ;;  %v463_v37 = vrot.slane %v454_v29, %v462_v28 }
 0x192   :  { %4165 = vmatprep.subr.bf16.mxu1 %v4832_v30 }
 0x193   :  { %3505 = vmatpush1.bf16.msra.mxu0 %v4808_v38  ;;  %v459_v38 = vrot.slane %v454_v29, %v458_v34  ;;  %v3017_v8 = vadd.f32 %v3016_v2, %v463_v37  ;;  %v3021_v42 = vadd.f32 %v3020_v5, %v463_v37 }
 0x194   :  { %3506 = vmatprep.subr.bf16.mxu0 %v4813_v0 }
 0x195   :  { %4166 = vmatpush3.bf16.msra.mxu1 %v4833_v31  ;;  %v3019_v9 = vadd.f32 %v3018_v10, %v459_v38  ;;  %v3015_v39 = vadd.f32 %v3014_v63, %v459_v38 }
 0x196   :  { %4167 = vmatprep.subr.bf16.mxu1 %v4834_v32 }
 0x197   :  { %3507 = vmatpush1.bf16.msra.mxu0 %v4811_v40  ;;  %v3058_v17 = vadd.f32 %v3057_v3, %v3015_v39 }
 0x198   :  { %3508 = vmatprep.subr.bf16.mxu0 %v4816_v41 }
 0x199   :  { %4168 = vmatpush3.bf16.msra.mxu1 %v4835_v33  ;;  %v3101_v47 = vadd.f32 %v3100_v7, %v3058_v17 }
 0x19a   :  { %4169 = vmatprep.subr.bf16.mxu1 %v4836_v59 }
 0x19b   :  { %3509 = vmatpush1.bf16.msra.mxu0 %v4814_v44  ;;  %v3060_v44 = vadd.f32 %v3059_v4, %v3017_v8  ;;  %v3144_v57 = vadd.f32 %v3143_v49, %v3101_v47 }
 0x19c   :  { %3510 = vmatprep.subr.bf16.mxu0 %v4819_v16  ;;  %v3062_v16 = vadd.f32 %v3061_v6, %v3019_v9 }
 0x19d   :  { %4170 = vmatpush3.bf16.msra.mxu1 %v4837_v60  ;;  %v3187_v59 = vadd.f32 %v3186_v14, %v3144_v57 }
 0x19e   :  { %4171 = vmatprep.subr.bf16.mxu1 %v4838_v61  ;;  %v3105_v45 = vadd.f32 %v3104_v50, %v3062_v16 }
 0x19f   :  { %3511 = vmatpush1.bf16.msra.mxu0 %v4817_v19  ;;  %v3064_v19 = vadd.f32 %v3063_v11, %v3021_v42  ;;  %v3230_v3 = vadd.f32 %v3229_v21, %v3187_v59 }
 0x1a0   :  { %v3148_v56 = vadd.f32 %v3147_v13, %v3105_v45 }
 0x1a1   :  { %4172 = vmatpush3.bf16.msra.mxu1 %v4839_v62  ;;  %v3107_v54 = vadd.f32 %v3106_v52, %v3064_v19 }
 0x1a2   :  { %3529 = vmatmul.mubr.bf16.vlgmr.msra.gmra.mxu0 %v954_v46  ;;  %v3103_v46 = vadd.f32 %v3102_v12, %v3060_v44  ;;  %v3191_v33 = vadd.f32 %v3190_v22, %v3148_v56 }
 0x1a3   :  { %v3150_v31 = vadd.f32 %v3149_v15, %v3107_v54 }
 0x1a4   :  { %v3146_v55 = vadd.f32 %v3145_v51, %v3103_v46  ;;  %v3234_v2 = vadd.f32 %v3233_v25, %v3191_v33 }
 0x1a5   :  { %v3193_v60 = vadd.f32 %v3192_v24, %v3150_v31 }
 0x1a6   :  { %v3189_v32 = vadd.f32 %v3188_v20, %v3146_v55  ;;  %v4140_v55 = vld [vmem:[%s6383_s4] ss:$0 sm:$0xff] }
 0x1a7   :  { %v3236_v4 = vadd.f32 %v3235_v27, %v3193_v60 }
 0x1a8   :  { %v3232_v63 = vadd.f32 %v3231_v23, %v3189_v32 }
 0x1c2   :  { %v3272_v26 = vpop.f32.mrf.mxu0 }
 0x1c3   :  { %v3315_v36 = vpop.f32.mrf.mxu1  ;;  %v3273_v7 = vadd.f32 %v3272_v26, %v3230_v3 }
 0x1c4   :  { %v3274_v35 = vpop.f32.mrf.mxu0 }
 0x1c5   :  { %v3317_v1 = vpop.f32.mrf.mxu1  ;;  %v3275_v5 = vadd.f32 %v3274_v35, %v3232_v63  ;;  %v3316_v13 = vadd.f32 %v3315_v36, %v3273_v7 }
 0x1c6   :  { %v3276_v0 = vpop.f32.mrf.mxu0 }
 0x1c7   :  { %v3319_v41 = vpop.f32.mrf.mxu1  ;;  %v3277_v6 = vadd.f32 %v3276_v0, %v3234_v2  ;;  %v3318_v51 = vadd.f32 %v3317_v1, %v3275_v5 }
 0x1c8   :  { %v3278_v40 = vpop.f32.mrf.mxu0 }
 0x1c9   :  { %v3321_v18 = vpop.f32.mrf.mxu1  ;;  %v3279_v12 = vadd.f32 %v3278_v40, %v3236_v4  ;;  %v3320_v52 = vadd.f32 %v3319_v41, %v3277_v6 }
 0x1cb   :  { %v3322_v15 = vadd.f32 %v3321_v18, %v3279_v12 }
 0x202   :  { %v3358_v43 = vpop.f32.mrf.mxu0 }
 0x203   :  { %v3401_v53 = vpop.f32.mrf.mxu1  ;;  %v3359_v22 = vadd.f32 %v3358_v43, %v3316_v13 }
 0x204   :  { %v3360_v48 = vpop.f32.mrf.mxu0 }
 0x205   :  { %v3403_v30 = vpop.f32.mrf.mxu1  ;;  %v3361_v14 = vadd.f32 %v3360_v48, %v3318_v51  ;;  %v3402_v27 = vadd.f32 %v3401_v53, %v3359_v22 }
 0x206   :  { %v3362_v58 = vpop.f32.mrf.mxu0 }
 0x207   :  { %v3405_v62 = vpop.f32.mrf.mxu1  ;;  %v3363_v20 = vadd.f32 %v3362_v58, %v3320_v52  ;;  %v3404_v21 = vadd.f32 %v3403_v30, %v3361_v14 }
 0x208   :  { %v3364_v61 = vpop.f32.mrf.mxu0 }
 0x209   :  { %v3407_v11 = vpop.f32.mrf.mxu1  ;;  %v3365_v25 = vadd.f32 %v3364_v61, %v3322_v15  ;;  %v3406_v28 = vadd.f32 %v3405_v62, %v3363_v20 }
 0x20b   :  { %v3408_v26 = vadd.f32 %v3407_v11, %v3365_v25 }
 0x242   :  { %v3444_v10 = vpop.f32.mrf.mxu0 }
 0x243   :  { %v3487_v50 = vpop.f32.mrf.mxu1  ;;  %v3445_v38 = vadd.f32 %v3444_v10, %v3402_v27 }
 0x244   :  { %v3446_v49 = vpop.f32.mrf.mxu0 }
 0x245   :  { %v3489_v23 = vpop.f32.mrf.mxu1  ;;  %v3447_v35 = vadd.f32 %v3446_v49, %v3404_v21  ;;  %v3488_v40 = vadd.f32 %v3487_v50, %v3445_v38 }
 0x246   :  { %v3448_v24 = vpop.f32.mrf.mxu0 }
 0x247   :  { %v3491_v34 = vpop.f32.mrf.mxu1  ;;  %v3449_v37 = vadd.f32 %v3448_v24, %v3406_v28  ;;  %v3490_v9 = vadd.f32 %v3489_v23, %v3447_v35 }
 0x248   :  { %v3450_v29 = vpop.f32.mrf.mxu0 }
 0x249   :  { %v3451_v1 = vadd.f32 %v3450_v29, %v3408_v26  ;;  %v3493_v8 = vpop.f32.mrf.mxu1  ;;  %v3492_v39 = vadd.f32 %v3491_v34, %v3449_v37 }
 0x24b   :  { %v3494_v42 = vadd.f32 %v3493_v8, %v3451_v1 }
 0x262   :  { %v3530_v0 = vpop.f32.mrf.mxu0 }
 0x263   :  { %v3531_v16 = vadd.f32 %v3530_v0, %v3488_v40 }
 0x264   :  { %v3532_v36 = vpop.f32.mrf.mxu0 }
 0x265   :  { %v3533_v43 = vadd.f32 %v3532_v36, %v3490_v9  ;;  %v3539_v47 = vmax.f32 %v3531_v16, 0.0 }
 0x266   :  { %v3534_v41 = vpop.f32.mrf.mxu0 }
 0x267   :  { %v3535_v44 = vadd.f32 %v3534_v41, %v3492_v39  ;;  %v3540_v46 = vmax.f32 %v3533_v43, 0.0 }
 0x268   :  { %v3536_v17 = vpop.f32.mrf.mxu0 }
 0x269   :  { %v3537_v18 = vadd.f32 %v3536_v17, %v3494_v42  ;;  %v3541_v19 = vmax.f32 %v3535_v44, 0.0 }
 0x26b   :  { %v3542_v45 = vmax.f32 %v3537_v18, 0.0  ;;  %v3543_v53 = vpack.c.bf16 %v3541_v19, %v3539_v47 }
 0x26d   :  { %v3544_v48 = vpack.c.bf16 %v3542_v45, %v3540_v46 }
 0x26f   :  { %3712 = vmatprep.mubr.bf16.mxu1 %v3544_v48 }
 0x270   :  { %3713 = vmatmul.mubr.bf16.vlgmr.msra.gmra.mxu1 %v3543_v53 }
 0x330   :  { %v4173_v54 = vpop.f32.mrf.mxu1 }
 0x332   :  { %v4174_v56 = vpop.f32.mrf.mxu1 }
 0x333   :  { %v4175_v57 = vadd.f32 %v4174_v56, %v4173_v54 }
 0x334   :  { %v4176_v58 = vpop.f32.mrf.mxu1 }
 0x335   :  { %v3715_v30 = vadd.f32 %v4175_v57, %v4140_v55 }
 0x336   :  { %v4177_v31 = vpop.f32.mrf.mxu1 }
 0x337   :  { %3722 = vst.msk [vmem:[#allocation2] sm:$0xff] %vm3721_vm0, %v3715_v30  ;;  %v4178_v32 = vadd.f32 %v4177_v31, %v4176_v58 }
 0x339   :  { %v3718_v33 = vadd.f32 %v4178_v32, %v4140_v55 }
 0x33b   :  { %3723 = vst.msk [vmem:[#allocation2 + $0x8] sm:$0xff] %vm3721_vm0, %v3718_v33 }
 0x33c   :  { %3728 = vsyncadd [#allocation3], 224  ;;  %s4864_s1 = smov [#allocation2]  }
 0x33d   :  { %s3729_s30 = sshll.u32 %s4864_s1, 4  ;;  %s3730_s30 = int_to_ptr.vmem [resolvable:$true] %s3729_s30 }
 0x33e   :  { %s4840_s6 = scalar_lea.vmem %s3730_s30, 32  ;;  %s4844_s7 = scalar_lea.vmem %s3730_s30, 256 }
 0x33f   :  { %p4841_p0 = scmp.ne.s32.totalorder %s3730_s30, %s4840_s6  ;;  %p4845_p1 = scmp.lt.s32.totalorder %s3730_s30, %s3730_s30 }
 0x340   :  { %p4846_p2 = scmp.lt.s32.totalorder %s4844_s7, %s4840_s6 }
 0x342   :  { %p4847_p3 = por %p4846_p2, %p4845_p1 }
 0x344   :  { %p4848_p4 = pnand %p4847_p3, %p4841_p0 }
 0x346   :  { %4851 = shalt.err (!%p4848_p4)
}
 0x347   :  { %s4865_s4 = smov 32   ;;  %s4866_s8 = smov 2  }
 0x348   :  { %3735 = dma.vmem_to_hbm [thread:$0]  %s3730_s30, 32, %s6384_s5, [#allocation3], %s4865_s4, %s4865_s4, %s4866_s8  }
 0x349   :  { %4860 = dma.done.wait [#allocation3], 256  }
 0x34a   :  { %4861 = vsyncadd [#allocation3], 4294967040 }
 0x34b   :  { %3739 = vsyncpa [#allocation3], 1 }

</bundles_post_ra>
